<compile_context>
chip_gen: v7x
topology: tpu7x:2x2x1
jax: 0.10.0
libtpu: 0.0.40
codegen_flags: <defaults>
</compile_context>

<pallas_src>
import jax
import jax.numpy as jnp
from jax import lax
from jax.experimental import pallas as pl
from jax.experimental.pallas import tpu as pltpu

EPS = 1e-15
MU = 0.01
LAMBDA_REG = 2.0
N_REWIRE_STEPS = 5


# ----------------------------------------------------------------------------
# small in-kernel helpers
# ----------------------------------------------------------------------------
def _mm(a, b):
    return jnp.dot(a, b, preferred_element_type=jnp.float32)


def _mTm(a, b):
    # a^T @ b without materializing the transpose (MXU handles the layout)
    return lax.dot_general(a, b, (((0,), (0,)), ((), ())),
                           preferred_element_type=jnp.float32)


def _abT(a, b):
    # a @ b^T without materializing the transpose
    return lax.dot_general(a, b, (((1,), (1,)), ((), ())),
                           preferred_element_type=jnp.float32)


def _softmax_last(x):
    m = jnp.max(x, axis=-1, keepdims=True)
    e = jnp.exp(x - m)
    return e * pl.reciprocal(jnp.sum(e, axis=-1, keepdims=True), approx=True)


def _diag_mask(n):
    r = lax.broadcasted_iota(jnp.int32, (n, n), 0)
    c = lax.broadcasted_iota(jnp.int32, (n, n), 1)
    return r == c


# ----------------------------------------------------------------------------
# fused forward kernel (one program per graph)
# ----------------------------------------------------------------------------
def _diffwire_fwd_kernel(x_ref, adj_ref, mask_ref,
                         wl1_ref, bl1_ref,
                         wpool_ref, bpool_ref,
                         wconv1_ref, brel1_ref,
                         wmc_ref, bmc_ref,
                         wconv2_ref, brel2_ref,
                         wl2_ref, bl2_ref, wl3_ref, bl3_ref,
                         loss_ref, logp_ref):
    N = adj_ref.shape[1]
    adj = adj_ref[0]                                   # (N, N) original adjacency
    mask = mask_ref[0]                                 # (N, 1)
    x = x_ref[0]                                       # (N, Cin)

    # ---- lin1 + fused pool_rw/pool_ct projection (h never leaves VMEM) ----
    h = _mm(x, wl1_ref[...]) + bl1_ref[...]            # (N, H)
    proj = _mm(h, wpool_ref[...]) + bpool_ref[...]     # (N, 2+K)  [pool_rw | pool_ct]
    s0 = proj[:, 0:2]                                  # (N, 2)
    s1 = proj[:, 2:]                                   # (N, K)

    # ================= dense_mincut_rewiring ('normalized') ================
    s = _softmax_last(s0)                              # (N, 2)
    d_col = jnp.sum(adj, axis=1, keepdims=True)        # (N, 1) degrees

    inv = 1.0 / (float(N) ** 0.5)
    fied = jnp.where(s[:, 1:2] > s[:, 0:1], -inv, inv)  # approx Fiedler (N, 1)

    d2 = jnp.sqrt(d_col + EPS) + EPS                   # (N, 1)
    inv_d = pl.reciprocal(d_col + EPS, approx=True)
    inv_d2 = pl.reciprocal(d2, approx=True)
    dder = -0.5 * d2 * inv_d                           # (N, 1)
    adjT_u = _mTm(adj, fied)                           # adj^T @ u2
    adj_u = _mm(adj, fied)                             # adj   @ u2
    firstT_s = jnp.sum(fied * adjT_u * inv_d2)         # scalar
    secT_s = jnp.sum(fied * adj_u * inv_d2)            # scalar
    w = fied * inv_d2                                  # D^{-1/2} u2  (N, 1)
    Du2u2TD = w * w.T                                  # (N, N) outer product
    der = -(dder * (firstT_s + secT_s) + Du2u2TD)      # (N, N)

    # NLfiedler value (L = D - A)
    g = fied * d2
    Lf = d_col * w - _mm(adj, w)
    fval = N * jnp.abs(jnp.sum(w * Lf) / (jnp.sum(g * g) + EPS))

    reg = (2.0 * LAMBDA_REG * fval) * der              # loop-invariant
    dmask = _diag_mask(N)
    c = reg - 2.0 * adj                                # loop-invariant
    const = c + c.T - jnp.where(dmask, c, 0.0)         # hoisted symmetric part

    Ac = adj
    for _ in range(N_REWIRE_STEPS):
        # dJ = partialJ + partialJ^T - diag(partialJ), partialJ = 2*Ac + c
        dJ = 2.0 * (Ac + Ac.T - jnp.where(dmask, Ac, 0.0)) + const
        Ac = Ac - MU * dJ
        Ac = _softmax_last(Ac)
        Ac = Ac * adj
    adj1 = Ac

    # rewiring losses (reference uses the ORIGINAL adjacency here)
    mc_num_rw = jnp.sum(s * _mm(adj, s))               # tr(s^T A s)
    mc_den_rw = jnp.sum(d_col * s * s)                 # tr(s^T D s)
    loss_rw = -(mc_num_rw / mc_den_rw)
    ss = _mTm(s, s)                                    # (2, 2)
    tr_rw = jnp.sum(s * s)
    fro_rw = jnp.sqrt(jnp.sum(ss * ss))
    # || ss/||ss|| - I_2/sqrt(2) ||_F in closed form (no 2x2 eye materialized)
    ortho_rw = jnp.sqrt(jnp.maximum(2.0 - (2.0 ** 0.5) * tr_rw / fro_rw, 0.0))

    # ====================== dense_CT_rewiring (on adj1) ====================
    sc = jnp.tanh(s1) * mask                           # (N, K)
    K = sc.shape[1]
    d1_col = jnp.sum(adj1, axis=1, keepdims=True)      # (N, 1)
    colsum_sc = jnp.sum(sc, axis=0, keepdims=True)     # (1, K) == ones^T s
    ds = d1_col * sc + EPS * colsum_sc                 # (diag(d) + EPS*J) @ s
    Ls = ds - _mm(adj1, sc)                            # L @ s
    loss_ct = jnp.sum(sc * Ls) / (jnp.sum(sc * ds) + EPS)
    ss_ct = _mTm(sc, sc)                               # (K, K)
    tr_ct = jnp.sum(sc * sc)
    fro_ct = jnp.sqrt(jnp.sum(ss_ct * ss_ct))
    # per-graph || ss_n - I_K ||_F^2 ; the global sqrt(sum) happens in glue
    ortho_ct_sq = jnp.maximum(1.0 - 2.0 * tr_ct / fro_ct + K, 0.0)

    vol = jnp.sum(d1_col) + N * EPS                    # tr(diag(d) + EPS*J)
    G = _abT(sc, sc)                                   # s s^T  (N, N)
    r = jnp.sum(sc * sc, axis=1, keepdims=True)        # (N, 1)
    dist = jnp.sqrt(jnp.maximum(r + r.T - 2.0 * G, 0.0))   # cdist(s, s)
    adj2 = (dist * (1.0 / vol)) * adj1                 # CT-rescaled adjacency

    # ============ conv1 (DenseGraphConv) + pool_mc + mincut_pool ===========
    # single (N, 2H) x (2H, H) MXU pass: wconv1 = [w_rel1 ; w_root1]
    cat1 = jnp.concatenate([_mm(adj2, h), h], axis=-1)          # (N, 2H)
    h1 = _mm(cat1, wconv1_ref[...]) + brel1_ref[...]            # (N, H)

    s2 = _softmax_last(_mm(h1, wmc_ref[...]) + bmc_ref[...]) * mask   # (N, 16)
    xm = h1 * mask
    xp = _mTm(s2, xm)                                  # pooled features (16, H)
    As2 = _mm(adj2, s2)                                # (N, 16)
    oa = _mTm(s2, As2)                                 # s^T A s  (16, 16)
    mc_num = jnp.sum(s2 * As2)
    mc_den = jnp.sum((jnp.sum(adj2, axis=1, keepdims=True) + EPS) * s2 * s2)
    loss_mc = -(mc_num / mc_den)
    ss_mc = _mTm(s2, s2)
    tr_mc = jnp.sum(s2 * s2)
    fro_mc = jnp.sqrt(jnp.sum(ss_mc * ss_mc))
    # || ss_n - I_16 / 4 ||_F per graph, closed form
    ortho_mc = jnp.sqrt(jnp.maximum(2.0 - 0.5 * tr_mc / fro_mc, 0.0))

    # zero the diagonal and D^{-1/2} A D^{-1/2}
    kp = oa.shape[0]
    oa0 = jnp.where(_diag_mask(kp), 0.0, oa)
    dk = jnp.sqrt(jnp.sum(oa0, axis=1, keepdims=True) + EPS) + EPS
    inv_dk = pl.reciprocal(dk, approx=True)
    adj3 = oa0 * inv_dk * inv_dk.T                     # (16, 16)

    # ===================== conv2 + readout head ============================
    cat2 = jnp.concatenate([_mm(adj3, xp), xp], axis=-1)        # (16, 2H)
    h2 = _mm(cat2, wconv2_ref[...]) + brel2_ref[...]            # (16, H)
    xs = jnp.sum(h2, axis=0, keepdims=True)            # (1, H) sum over nodes
    hh = jnp.maximum(_mm(xs, wl2_ref[...]) + bl2_ref[...], 0.0)
    logits = _mm(hh, wl3_ref[...]) + bl3_ref[...]      # (1, O)
    mx = jnp.max(logits, axis=-1, keepdims=True)
    lse = jnp.log(jnp.sum(jnp.exp(logits - mx), axis=-1, keepdims=True)) + mx
    logp_ref[...] = (logits - lse)[None]

    # pack the six per-graph loss scalars into one lane-dense 128-wide row
    lane = lax.broadcasted_iota(jnp.int32, (1, 128), 1)
    slab = jnp.zeros((1, 128), jnp.float32)
    for idx, val in enumerate((loss_rw, ortho_rw, loss_ct,
                               ortho_ct_sq, loss_mc, ortho_mc)):
        slab = jnp.where(lane == idx, val, slab)
    loss_ref[...] = slab[None]


# ----------------------------------------------------------------------------
# wrapper: single pallas_call + a few scalar reductions of the packed losses
# ----------------------------------------------------------------------------
def diffwire_forward(x, adj, mask, params):
    B, N, Cin = x.shape
    H = params['w_lin1'].shape[1]
    K = params['w_ct'].shape[1]
    KP = params['w_mc'].shape[1]
    O = params['w_lin3'].shape[1]
    f32 = jnp.float32

    # host-side weight stacking: fused pool projection and fused GraphConvs
    w_pool = jnp.concatenate([params['w_rw'], params['w_ct']], axis=1)      # (H, 2+K)
    b_pool = jnp.concatenate([params['b_rw'], params['b_ct']]).reshape(1, 2 + K)
    w_conv1 = jnp.concatenate([params['w_rel1'], params['w_root1']], axis=0)  # (2H, H)
    w_conv2 = jnp.concatenate([params['w_rel2'], params['w_root2']], axis=0)  # (2H, H)

    weights = [
        params['w_lin1'], params['b_lin1'].reshape(1, H),
        w_pool, b_pool,
        w_conv1, params['b_rel1'].reshape(1, H),
        params['w_mc'], params['b_mc'].reshape(1, KP),
        w_conv2, params['b_rel2'].reshape(1, H),
        params['w_lin2'], params['b_lin2'].reshape(1, H),
        params['w_lin3'], params['b_lin3'].reshape(1, O),
    ]

    # explicit scoped-VMEM budget: >= 32 MiB (v5e default is 16 MiB), capped
    # at 48 MiB so the same setting is valid on v7x (64 MiB physical VMEM).
    vmem_limit = int(min(48 * 1024 * 1024,
                         max(32 * 1024 * 1024, 32 * N * N * 4)))

    in_specs = [
        pl.BlockSpec((1, N, Cin), lambda b: (b, 0, 0)),
        pl.BlockSpec((1, N, N), lambda b: (b, 0, 0)),
        pl.BlockSpec((1, N, 1), lambda b: (b, 0, 0)),
    ] + [pl.BlockSpec(w.shape, lambda b: (0, 0)) for w in weights]

    losses, logp = pl.pallas_call(
        _diffwire_fwd_kernel,
        out_shape=(jax.ShapeDtypeStruct((B, 1, 128), f32),
                   jax.ShapeDtypeStruct((B, 1, O), f32)),
        grid=(B,),
        in_specs=in_specs,
        out_specs=(pl.BlockSpec((1, 1, 128), lambda b: (b, 0, 0)),
                   pl.BlockSpec((1, 1, O), lambda b: (b, 0, 0))),
        compiler_params=pltpu.CompilerParams(
            dimension_semantics=("parallel",),
            vmem_limit_bytes=vmem_limit),
    )(x, adj, mask, *weights)

    losses = losses[:, 0, :]                           # (B, 128)
    logp = logp[:, 0, :]                               # (B, O)

    main_loss = (jnp.mean(losses[:, 0])                # mincut rewiring loss
                 + jnp.mean(losses[:, 2])              # CT loss
                 + jnp.mean(losses[:, 4]))             # mincut pool loss
    ortho_loss = (jnp.mean(losses[:, 1])               # rewiring ortho (per-graph mean)
                  + jnp.sqrt(jnp.sum(losses[:, 3]))    # CT ortho (global Frobenius)
                  + jnp.mean(losses[:, 5]))            # pool ortho (per-graph mean)
    return logp, main_loss, ortho_loss


# ----------------------------------------------------------------------------
# main
# ----------------------------------------------------------------------------
if __name__ == "__main__":
    B, N, C_IN, H, K_CENTERS, C_OUT = 2, 16, 8, 32, 8, 4
    key = jax.random.PRNGKey(0)
    keys = jax.random.split(key, 20)

    # synthetic batched graphs (graph 0: 16 nodes, graph 1: 12 nodes)
    n_nodes = jnp.array([16, 12])
    mask_bool = jnp.arange(N)[None, :] < n_nodes[:, None]        # (B, N)
    mask = mask_bool.astype(jnp.float32)[..., None]              # (B, N, 1)

    x = jax.random.normal(keys[0], (B, N, C_IN), jnp.float32) * mask
    up = (jax.random.uniform(keys[1], (B, N, N)) < 0.4).astype(jnp.float32)
    up = jnp.triu(up, k=1)
    adj = up + jnp.swapaxes(up, 1, 2)
    adj = adj * mask * jnp.swapaxes(mask, 1, 2)                  # symmetric, masked

    def init_w(k, shape, scale=0.1):
        return jax.random.normal(k, shape, jnp.float32) * scale

    params = dict(
        w_lin1=init_w(keys[2], (C_IN, H)), b_lin1=jnp.zeros((H,), jnp.float32),
        w_rw=init_w(keys[3], (H, 2)), b_rw=jnp.zeros((2,), jnp.float32),
        w_ct=init_w(keys[4], (H, K_CENTERS)), b_ct=jnp.zeros((K_CENTERS,), jnp.float32),
        w_rel1=init_w(keys[5], (H, H)), b_rel1=init_w(keys[6], (H,), 0.01),
        w_root1=init_w(keys[7], (H, H)),
        w_mc=init_w(keys[8], (H, 16)), b_mc=jnp.zeros((16,), jnp.float32),
        w_rel2=init_w(keys[9], (H, H)), b_rel2=init_w(keys[10], (H,), 0.01),
        w_root2=init_w(keys[11], (H, H)),
        w_lin2=init_w(keys[12], (H, H)), b_lin2=jnp.zeros((H,), jnp.float32),
        w_lin3=init_w(keys[13], (H, C_OUT)), b_lin3=jnp.zeros((C_OUT,), jnp.float32),
    )

    logp, main_loss, ortho_loss = jax.jit(diffwire_forward)(x, adj, mask, params)
    jax.block_until_ready((logp, main_loss, ortho_loss))
    print("KERNEL_OK")
</pallas_src>

<mosaic_0001>
module attributes {stable_mosaic.version = 11 : i64} {
  func.func @_diffwire_fwd_kernel(%arg0: i32, %arg1: memref<1x16x8xf32, #tpu.memory_space<vmem>>, %arg2: memref<1x16x16xf32, #tpu.memory_space<vmem>>, %arg3: memref<1x16x1xf32, #tpu.memory_space<vmem>>, %arg4: memref<8x32xf32, #tpu.memory_space<vmem>>, %arg5: memref<1x32xf32, #tpu.memory_space<vmem>>, %arg6: memref<32x10xf32, #tpu.memory_space<vmem>>, %arg7: memref<1x10xf32, #tpu.memory_space<vmem>>, %arg8: memref<64x32xf32, #tpu.memory_space<vmem>>, %arg9: memref<1x32xf32, #tpu.memory_space<vmem>>, %arg10: memref<32x16xf32, #tpu.memory_space<vmem>>, %arg11: memref<1x16xf32, #tpu.memory_space<vmem>>, %arg12: memref<64x32xf32, #tpu.memory_space<vmem>>, %arg13: memref<1x32xf32, #tpu.memory_space<vmem>>, %arg14: memref<32x32xf32, #tpu.memory_space<vmem>>, %arg15: memref<1x32xf32, #tpu.memory_space<vmem>>, %arg16: memref<32x4xf32, #tpu.memory_space<vmem>>, %arg17: memref<1x4xf32, #tpu.memory_space<vmem>>, %arg18: memref<1x1x128xf32, #tpu.memory_space<vmem>>, %arg19: memref<1x1x4xf32, #tpu.memory_space<vmem>>) attributes {dimension_semantics = [#tpu.dimension_semantics<parallel>], iteration_bounds = array<i64: 2>, scalar_prefetch = 0 : i64, scratch_operands = 0 : i64, tpu.core_type = #tpu.core_type<tc>, window_params = [{transform_indices = @transform_0, window_bounds = array<i64: 1, 16, 8>}, {transform_indices = @transform_1, window_bounds = array<i64: 1, 16, 16>}, {transform_indices = @transform_2, window_bounds = array<i64: 1, 16, 1>}, {pipeline_mode = #tpu.pipeline_mode<synchronous>, transform_indices = @transform_3, window_bounds = array<i64: 8, 32>}, {pipeline_mode = #tpu.pipeline_mode<synchronous>, transform_indices = @transform_4, window_bounds = array<i64: 1, 32>}, {pipeline_mode = #tpu.pipeline_mode<synchronous>, transform_indices = @transform_5, window_bounds = array<i64: 32, 10>}, {pipeline_mode = #tpu.pipeline_mode<synchronous>, transform_indices = @transform_6, window_bounds = array<i64: 1, 10>}, {pipeline_mode = #tpu.pipeline_mode<synchronous>, transform_indices = @transform_7, window_bounds = array<i64: 64, 32>}, {pipeline_mode = #tpu.pipeline_mode<synchronous>, transform_indices = @transform_8, window_bounds = array<i64: 1, 32>}, {pipeline_mode = #tpu.pipeline_mode<synchronous>, transform_indices = @transform_9, window_bounds = array<i64: 32, 16>}, {pipeline_mode = #tpu.pipeline_mode<synchronous>, transform_indices = @transform_10, window_bounds = array<i64: 1, 16>}, {pipeline_mode = #tpu.pipeline_mode<synchronous>, transform_indices = @transform_11, window_bounds = array<i64: 64, 32>}, {pipeline_mode = #tpu.pipeline_mode<synchronous>, transform_indices = @transform_12, window_bounds = array<i64: 1, 32>}, {pipeline_mode = #tpu.pipeline_mode<synchronous>, transform_indices = @transform_13, window_bounds = array<i64: 32, 32>}, {pipeline_mode = #tpu.pipeline_mode<synchronous>, transform_indices = @transform_14, window_bounds = array<i64: 1, 32>}, {pipeline_mode = #tpu.pipeline_mode<synchronous>, transform_indices = @transform_15, window_bounds = array<i64: 32, 4>}, {pipeline_mode = #tpu.pipeline_mode<synchronous>, transform_indices = @transform_16, window_bounds = array<i64: 1, 4>}, {transform_indices = @transform_17, window_bounds = array<i64: 1, 1, 128>}, {transform_indices = @transform_18, window_bounds = array<i64: 1, 1, 4>}]} {
    %c0 = arith.constant 0 : index
    %c0_0 = arith.constant 0 : index
    %c0_1 = arith.constant 0 : index
    %0 = vector.load %arg2[%c0, %c0_0, %c0_1] : memref<1x16x16xf32, #tpu.memory_space<vmem>>, vector<1x16x16xf32>
    %1 = vector.shape_cast %0 : vector<1x16x16xf32> to vector<16x16xf32>
    %c0_2 = arith.constant 0 : index
    %c0_3 = arith.constant 0 : index
    %c0_4 = arith.constant 0 : index
    %2 = vector.load %arg3[%c0_2, %c0_3, %c0_4] : memref<1x16x1xf32, #tpu.memory_space<vmem>>, vector<1x16x1xf32>
    %3 = vector.shape_cast %2 : vector<1x16x1xf32> to vector<16x1xf32>
    %c0_5 = arith.constant 0 : index
    %c0_6 = arith.constant 0 : index
    %c0_7 = arith.constant 0 : index
    %4 = vector.load %arg1[%c0_5, %c0_6, %c0_7] : memref<1x16x8xf32, #tpu.memory_space<vmem>>, vector<1x16x8xf32>
    %5 = vector.shape_cast %4 : vector<1x16x8xf32> to vector<16x8xf32>
    %c0_8 = arith.constant 0 : index
    %c0_9 = arith.constant 0 : index
    %6 = vector.load %arg4[%c0_8, %c0_9] : memref<8x32xf32, #tpu.memory_space<vmem>>, vector<8x32xf32>
    %cst = arith.constant dense<0.000000e+00> : vector<16x32xf32>
    %7 = tpu.matmul %5, %6, %cst {dimension_numbers = #tpu.dot_dimension_numbers<[1], [0], [0], [1], [0, 0, 1, 1], [], []>} : vector<16x8xf32>, vector<8x32xf32>, vector<16x32xf32> -> vector<16x32xf32>
    %c0_10 = arith.constant 0 : index
    %c0_11 = arith.constant 0 : index
    %8 = vector.load %arg5[%c0_10, %c0_11] : memref<1x32xf32, #tpu.memory_space<vmem>>, vector<1x32xf32>
    %9 = vector.broadcast %8 : vector<1x32xf32> to vector<16x32xf32>
    %10 = arith.addf %7, %9 : vector<16x32xf32>
    %c0_12 = arith.constant 0 : index
    %c0_13 = arith.constant 0 : index
    %11 = vector.load %arg6[%c0_12, %c0_13] : memref<32x10xf32, #tpu.memory_space<vmem>>, vector<32x10xf32>
    %cst_14 = arith.constant dense<0.000000e+00> : vector<16x10xf32>
    %12 = tpu.matmul %10, %11, %cst_14 {dimension_numbers = #tpu.dot_dimension_numbers<[1], [0], [0], [1], [0, 0, 1, 1], [], []>} : vector<16x32xf32>, vector<32x10xf32>, vector<16x10xf32> -> vector<16x10xf32>
    %c0_15 = arith.constant 0 : index
    %c0_16 = arith.constant 0 : index
    %13 = vector.load %arg7[%c0_15, %c0_16] : memref<1x10xf32, #tpu.memory_space<vmem>>, vector<1x10xf32>
    %14 = vector.broadcast %13 : vector<1x10xf32> to vector<16x10xf32>
    %15 = arith.addf %12, %14 : vector<16x10xf32>
    %16 = vector.extract_strided_slice %15 {offsets = [0, 0], sizes = [16, 2], strides = [1, 1]} : vector<16x10xf32> to vector<16x2xf32>
    %17 = vector.extract_strided_slice %15 {offsets = [0, 2], sizes = [16, 8], strides = [1, 1]} : vector<16x10xf32> to vector<16x8xf32>
    %cst_17 = arith.constant dense<0xFF800000> : vector<16xf32>
    %18 = vector.multi_reduction <maximumf>, %16, %cst_17 [1] : vector<16x2xf32> to vector<16xf32>
    %19 = vector.shape_cast %18 : vector<16xf32> to vector<16x1xf32>
    %20 = vector.broadcast %19 : vector<16x1xf32> to vector<16x2xf32>
    %21 = arith.subf %16, %20 : vector<16x2xf32>
    %22 = math.exp %21 : vector<16x2xf32>
    %cst_18 = arith.constant dense<0.000000e+00> : vector<16xf32>
    %23 = vector.multi_reduction <add>, %22, %cst_18 [1] : vector<16x2xf32> to vector<16xf32>
    %24 = vector.shape_cast %23 : vector<16xf32> to vector<16x1xf32>
    %25 = tpu.reciprocal %24 {approx = true} : vector<16x1xf32> -> vector<16x1xf32>
    %26 = vector.broadcast %25 : vector<16x1xf32> to vector<16x2xf32>
    %27 = arith.mulf %22, %26 : vector<16x2xf32>
    %cst_19 = arith.constant dense<0.000000e+00> : vector<16xf32>
    %28 = vector.multi_reduction <add>, %1, %cst_19 [1] : vector<16x16xf32> to vector<16xf32>
    %29 = vector.shape_cast %28 : vector<16xf32> to vector<16x1xf32>
    %30 = vector.extract_strided_slice %27 {offsets = [0, 1], sizes = [16, 1], strides = [1, 1]} : vector<16x2xf32> to vector<16x1xf32>
    %31 = vector.extract_strided_slice %27 {offsets = [0, 0], sizes = [16, 1], strides = [1, 1]} : vector<16x2xf32> to vector<16x1xf32>
    %32 = arith.cmpf ogt, %30, %31 : vector<16x1xf32>
    %cst_20 = arith.constant -2.500000e-01 : f32
    %cst_21 = arith.constant 2.500000e-01 : f32
    %33 = vector.broadcast %cst_20 : f32 to vector<16x1xf32>
    %34 = vector.broadcast %cst_21 : f32 to vector<16x1xf32>
    %35 = arith.select %32, %33, %34 : vector<16x1xi1>, vector<16x1xf32>
    %cst_22 = arith.constant 1.000000e-15 : f32
    %36 = vector.broadcast %cst_22 : f32 to vector<16x1xf32>
    %37 = arith.addf %29, %36 : vector<16x1xf32>
    %38 = math.sqrt %37 : vector<16x1xf32>
    %cst_23 = arith.constant 1.000000e-15 : f32
    %39 = vector.broadcast %cst_23 : f32 to vector<16x1xf32>
    %40 = arith.addf %38, %39 : vector<16x1xf32>
    %cst_24 = arith.constant 1.000000e-15 : f32
    %41 = vector.broadcast %cst_24 : f32 to vector<16x1xf32>
    %42 = arith.addf %29, %41 : vector<16x1xf32>
    %43 = tpu.reciprocal %42 {approx = true} : vector<16x1xf32> -> vector<16x1xf32>
    %44 = tpu.reciprocal %40 {approx = true} : vector<16x1xf32> -> vector<16x1xf32>
    %cst_25 = arith.constant -5.000000e-01 : f32
    %45 = vector.broadcast %cst_25 : f32 to vector<16x1xf32>
    %46 = arith.mulf %45, %40 : vector<16x1xf32>
    %47 = arith.mulf %46, %43 : vector<16x1xf32>
    %cst_26 = arith.constant dense<0.000000e+00> : vector<16x1xf32>
    %48 = tpu.matmul %1, %35, %cst_26 {dimension_numbers = #tpu.dot_dimension_numbers<[0], [0], [1], [1], [0, 1, 1, 1], [], []>} : vector<16x16xf32>, vector<16x1xf32>, vector<16x1xf32> -> vector<16x1xf32>
    %cst_27 = arith.constant dense<0.000000e+00> : vector<16x1xf32>
    %49 = tpu.matmul %1, %35, %cst_27 {dimension_numbers = #tpu.dot_dimension_numbers<[1], [0], [0], [1], [0, 0, 1, 1], [], []>} : vector<16x16xf32>, vector<16x1xf32>, vector<16x1xf32> -> vector<16x1xf32>
    %50 = arith.mulf %35, %48 : vector<16x1xf32>
    %51 = arith.mulf %50, %44 : vector<16x1xf32>
    %52 = vector.shape_cast %51 : vector<16x1xf32> to vector<1x16x1xf32>
    %cst_28 = arith.constant dense<0.000000e+00> : vector<1xf32>
    %53 = vector.multi_reduction <add>, %52, %cst_28 [1, 2] : vector<1x16x1xf32> to vector<1xf32>
    %54 = vector.shape_cast %53 : vector<1xf32> to vector<1x1x1xf32>
    %55 = vector.extract %54[0, 0, 0] : f32 from vector<1x1x1xf32>
    %56 = arith.mulf %35, %49 : vector<16x1xf32>
    %57 = arith.mulf %56, %44 : vector<16x1xf32>
    %58 = vector.shape_cast %57 : vector<16x1xf32> to vector<1x16x1xf32>
    %cst_29 = arith.constant dense<0.000000e+00> : vector<1xf32>
    %59 = vector.multi_reduction <add>, %58, %cst_29 [1, 2] : vector<1x16x1xf32> to vector<1xf32>
    %60 = vector.shape_cast %59 : vector<1xf32> to vector<1x1x1xf32>
    %61 = vector.extract %60[0, 0, 0] : f32 from vector<1x1x1xf32>
    %62 = arith.mulf %35, %44 : vector<16x1xf32>
    %63 = tpu.transpose %62, [1, 0] : vector<16x1xf32> -> vector<1x16xf32>
    %64 = vector.broadcast %62 : vector<16x1xf32> to vector<16x16xf32>
    %65 = vector.broadcast %63 : vector<1x16xf32> to vector<16x16xf32>
    %66 = arith.mulf %64, %65 : vector<16x16xf32>
    %67 = arith.addf %55, %61 : f32
    %68 = vector.broadcast %67 : f32 to vector<16x1xf32>
    %69 = arith.mulf %47, %68 : vector<16x1xf32>
    %70 = vector.broadcast %69 : vector<16x1xf32> to vector<16x16xf32>
    %71 = arith.addf %70, %66 : vector<16x16xf32>
    %cst_30 = arith.constant 0.000000e+00 : f32
    %72 = vector.broadcast %cst_30 : f32 to vector<16x16xf32>
    %73 = arith.subf %72, %71 : vector<16x16xf32>
    %74 = arith.mulf %35, %40 : vector<16x1xf32>
    %75 = arith.mulf %29, %62 : vector<16x1xf32>
    %cst_31 = arith.constant dense<0.000000e+00> : vector<16x1xf32>
    %76 = tpu.matmul %1, %62, %cst_31 {dimension_numbers = #tpu.dot_dimension_numbers<[1], [0], [0], [1], [0, 0, 1, 1], [], []>} : vector<16x16xf32>, vector<16x1xf32>, vector<16x1xf32> -> vector<16x1xf32>
    %77 = arith.subf %75, %76 : vector<16x1xf32>
    %78 = arith.mulf %62, %77 : vector<16x1xf32>
    %79 = vector.shape_cast %78 : vector<16x1xf32> to vector<1x16x1xf32>
    %cst_32 = arith.constant dense<0.000000e+00> : vector<1xf32>
    %80 = vector.multi_reduction <add>, %79, %cst_32 [1, 2] : vector<1x16x1xf32> to vector<1xf32>
    %81 = vector.shape_cast %80 : vector<1xf32> to vector<1x1x1xf32>
    %82 = vector.extract %81[0, 0, 0] : f32 from vector<1x1x1xf32>
    %83 = arith.mulf %74, %74 : vector<16x1xf32>
    %84 = vector.shape_cast %83 : vector<16x1xf32> to vector<1x16x1xf32>
    %cst_33 = arith.constant dense<0.000000e+00> : vector<1xf32>
    %85 = vector.multi_reduction <add>, %84, %cst_33 [1, 2] : vector<1x16x1xf32> to vector<1xf32>
    %86 = vector.shape_cast %85 : vector<1xf32> to vector<1x1x1xf32>
    %87 = vector.extract %86[0, 0, 0] : f32 from vector<1x1x1xf32>
    %cst_34 = arith.constant 1.000000e-15 : f32
    %88 = arith.addf %87, %cst_34 : f32
    %89 = arith.divf %82, %88 : f32
    %90 = math.absf %89 : f32
    %cst_35 = arith.constant 1.600000e+01 : f32
    %91 = arith.mulf %cst_35, %90 : f32
    %cst_36 = arith.constant 4.000000e+00 : f32
    %92 = arith.mulf %cst_36, %91 : f32
    %93 = vector.broadcast %92 : f32 to vector<16x16xf32>
    %94 = arith.mulf %93, %73 : vector<16x16xf32>
    %95 = tpu.iota {dimensions = array<i32: 0>} : vector<16x16xi32>
    %96 = tpu.iota {dimensions = array<i32: 1>} : vector<16x16xi32>
    %97 = arith.cmpi eq, %95, %96 : vector<16x16xi32>
    %cst_37 = arith.constant 2.000000e+00 : f32
    %98 = vector.broadcast %cst_37 : f32 to vector<16x16xf32>
    %99 = arith.mulf %98, %1 : vector<16x16xf32>
    %100 = arith.subf %94, %99 : vector<16x16xf32>
    %101 = tpu.transpose %100, [1, 0] : vector<16x16xf32> -> vector<16x16xf32>
    %102 = arith.addf %100, %101 : vector<16x16xf32>
    %cst_38 = arith.constant 0.000000e+00 : f32
    %103 = vector.broadcast %cst_38 : f32 to vector<16x16xf32>
    %104 = arith.select %97, %100, %103 : vector<16x16xi1>, vector<16x16xf32>
    %105 = arith.subf %102, %104 : vector<16x16xf32>
    %106 = tpu.transpose %1, [1, 0] : vector<16x16xf32> -> vector<16x16xf32>
    %107 = arith.addf %1, %106 : vector<16x16xf32>
    %cst_39 = arith.constant 0.000000e+00 : f32
    %108 = vector.broadcast %cst_39 : f32 to vector<16x16xf32>
    %109 = arith.select %97, %1, %108 : vector<16x16xi1>, vector<16x16xf32>
    %110 = arith.subf %107, %109 : vector<16x16xf32>
    %cst_40 = arith.constant 2.000000e+00 : f32
    %111 = vector.broadcast %cst_40 : f32 to vector<16x16xf32>
    %112 = arith.mulf %111, %110 : vector<16x16xf32>
    %113 = arith.addf %112, %105 : vector<16x16xf32>
    %cst_41 = arith.constant 0.00999999977 : f32
    %114 = vector.broadcast %cst_41 : f32 to vector<16x16xf32>
    %115 = arith.mulf %114, %113 : vector<16x16xf32>
    %116 = arith.subf %1, %115 : vector<16x16xf32>
    %cst_42 = arith.constant dense<0xFF800000> : vector<16xf32>
    %117 = vector.multi_reduction <maximumf>, %116, %cst_42 [1] : vector<16x16xf32> to vector<16xf32>
    %118 = vector.shape_cast %117 : vector<16xf32> to vector<16x1xf32>
    %119 = vector.broadcast %118 : vector<16x1xf32> to vector<16x16xf32>
    %120 = arith.subf %116, %119 : vector<16x16xf32>
    %121 = math.exp %120 : vector<16x16xf32>
    %cst_43 = arith.constant dense<0.000000e+00> : vector<16xf32>
    %122 = vector.multi_reduction <add>, %121, %cst_43 [1] : vector<16x16xf32> to vector<16xf32>
    %123 = vector.shape_cast %122 : vector<16xf32> to vector<16x1xf32>
    %124 = tpu.reciprocal %123 {approx = true} : vector<16x1xf32> -> vector<16x1xf32>
    %125 = vector.broadcast %124 : vector<16x1xf32> to vector<16x16xf32>
    %126 = arith.mulf %121, %125 : vector<16x16xf32>
    %127 = arith.mulf %126, %1 : vector<16x16xf32>
    %128 = tpu.transpose %127, [1, 0] : vector<16x16xf32> -> vector<16x16xf32>
    %129 = arith.addf %127, %128 : vector<16x16xf32>
    %cst_44 = arith.constant 0.000000e+00 : f32
    %130 = vector.broadcast %cst_44 : f32 to vector<16x16xf32>
    %131 = arith.select %97, %127, %130 : vector<16x16xi1>, vector<16x16xf32>
    %132 = arith.subf %129, %131 : vector<16x16xf32>
    %cst_45 = arith.constant 2.000000e+00 : f32
    %133 = vector.broadcast %cst_45 : f32 to vector<16x16xf32>
    %134 = arith.mulf %133, %132 : vector<16x16xf32>
    %135 = arith.addf %134, %105 : vector<16x16xf32>
    %cst_46 = arith.constant 0.00999999977 : f32
    %136 = vector.broadcast %cst_46 : f32 to vector<16x16xf32>
    %137 = arith.mulf %136, %135 : vector<16x16xf32>
    %138 = arith.subf %127, %137 : vector<16x16xf32>
    %cst_47 = arith.constant dense<0xFF800000> : vector<16xf32>
    %139 = vector.multi_reduction <maximumf>, %138, %cst_47 [1] : vector<16x16xf32> to vector<16xf32>
    %140 = vector.shape_cast %139 : vector<16xf32> to vector<16x1xf32>
    %141 = vector.broadcast %140 : vector<16x1xf32> to vector<16x16xf32>
    %142 = arith.subf %138, %141 : vector<16x16xf32>
    %143 = math.exp %142 : vector<16x16xf32>
    %cst_48 = arith.constant dense<0.000000e+00> : vector<16xf32>
    %144 = vector.multi_reduction <add>, %143, %cst_48 [1] : vector<16x16xf32> to vector<16xf32>
    %145 = vector.shape_cast %144 : vector<16xf32> to vector<16x1xf32>
    %146 = tpu.reciprocal %145 {approx = true} : vector<16x1xf32> -> vector<16x1xf32>
    %147 = vector.broadcast %146 : vector<16x1xf32> to vector<16x16xf32>
    %148 = arith.mulf %143, %147 : vector<16x16xf32>
    %149 = arith.mulf %148, %1 : vector<16x16xf32>
    %150 = tpu.transpose %149, [1, 0] : vector<16x16xf32> -> vector<16x16xf32>
    %151 = arith.addf %149, %150 : vector<16x16xf32>
    %cst_49 = arith.constant 0.000000e+00 : f32
    %152 = vector.broadcast %cst_49 : f32 to vector<16x16xf32>
    %153 = arith.select %97, %149, %152 : vector<16x16xi1>, vector<16x16xf32>
    %154 = arith.subf %151, %153 : vector<16x16xf32>
    %cst_50 = arith.constant 2.000000e+00 : f32
    %155 = vector.broadcast %cst_50 : f32 to vector<16x16xf32>
    %156 = arith.mulf %155, %154 : vector<16x16xf32>
    %157 = arith.addf %156, %105 : vector<16x16xf32>
    %cst_51 = arith.constant 0.00999999977 : f32
    %158 = vector.broadcast %cst_51 : f32 to vector<16x16xf32>
    %159 = arith.mulf %158, %157 : vector<16x16xf32>
    %160 = arith.subf %149, %159 : vector<16x16xf32>
    %cst_52 = arith.constant dense<0xFF800000> : vector<16xf32>
    %161 = vector.multi_reduction <maximumf>, %160, %cst_52 [1] : vector<16x16xf32> to vector<16xf32>
    %162 = vector.shape_cast %161 : vector<16xf32> to vector<16x1xf32>
    %163 = vector.broadcast %162 : vector<16x1xf32> to vector<16x16xf32>
    %164 = arith.subf %160, %163 : vector<16x16xf32>
    %165 = math.exp %164 : vector<16x16xf32>
    %cst_53 = arith.constant dense<0.000000e+00> : vector<16xf32>
    %166 = vector.multi_reduction <add>, %165, %cst_53 [1] : vector<16x16xf32> to vector<16xf32>
    %167 = vector.shape_cast %166 : vector<16xf32> to vector<16x1xf32>
    %168 = tpu.reciprocal %167 {approx = true} : vector<16x1xf32> -> vector<16x1xf32>
    %169 = vector.broadcast %168 : vector<16x1xf32> to vector<16x16xf32>
    %170 = arith.mulf %165, %169 : vector<16x16xf32>
    %171 = arith.mulf %170, %1 : vector<16x16xf32>
    %172 = tpu.transpose %171, [1, 0] : vector<16x16xf32> -> vector<16x16xf32>
    %173 = arith.addf %171, %172 : vector<16x16xf32>
    %cst_54 = arith.constant 0.000000e+00 : f32
    %174 = vector.broadcast %cst_54 : f32 to vector<16x16xf32>
    %175 = arith.select %97, %171, %174 : vector<16x16xi1>, vector<16x16xf32>
    %176 = arith.subf %173, %175 : vector<16x16xf32>
    %cst_55 = arith.constant 2.000000e+00 : f32
    %177 = vector.broadcast %cst_55 : f32 to vector<16x16xf32>
    %178 = arith.mulf %177, %176 : vector<16x16xf32>
    %179 = arith.addf %178, %105 : vector<16x16xf32>
    %cst_56 = arith.constant 0.00999999977 : f32
    %180 = vector.broadcast %cst_56 : f32 to vector<16x16xf32>
    %181 = arith.mulf %180, %179 : vector<16x16xf32>
    %182 = arith.subf %171, %181 : vector<16x16xf32>
    %cst_57 = arith.constant dense<0xFF800000> : vector<16xf32>
    %183 = vector.multi_reduction <maximumf>, %182, %cst_57 [1] : vector<16x16xf32> to vector<16xf32>
    %184 = vector.shape_cast %183 : vector<16xf32> to vector<16x1xf32>
    %185 = vector.broadcast %184 : vector<16x1xf32> to vector<16x16xf32>
    %186 = arith.subf %182, %185 : vector<16x16xf32>
    %187 = math.exp %186 : vector<16x16xf32>
    %cst_58 = arith.constant dense<0.000000e+00> : vector<16xf32>
    %188 = vector.multi_reduction <add>, %187, %cst_58 [1] : vector<16x16xf32> to vector<16xf32>
    %189 = vector.shape_cast %188 : vector<16xf32> to vector<16x1xf32>
    %190 = tpu.reciprocal %189 {approx = true} : vector<16x1xf32> -> vector<16x1xf32>
    %191 = vector.broadcast %190 : vector<16x1xf32> to vector<16x16xf32>
    %192 = arith.mulf %187, %191 : vector<16x16xf32>
    %193 = arith.mulf %192, %1 : vector<16x16xf32>
    %194 = tpu.transpose %193, [1, 0] : vector<16x16xf32> -> vector<16x16xf32>
    %195 = arith.addf %193, %194 : vector<16x16xf32>
    %cst_59 = arith.constant 0.000000e+00 : f32
    %196 = vector.broadcast %cst_59 : f32 to vector<16x16xf32>
    %197 = arith.select %97, %193, %196 : vector<16x16xi1>, vector<16x16xf32>
    %198 = arith.subf %195, %197 : vector<16x16xf32>
    %cst_60 = arith.constant 2.000000e+00 : f32
    %199 = vector.broadcast %cst_60 : f32 to vector<16x16xf32>
    %200 = arith.mulf %199, %198 : vector<16x16xf32>
    %201 = arith.addf %200, %105 : vector<16x16xf32>
    %cst_61 = arith.constant 0.00999999977 : f32
    %202 = vector.broadcast %cst_61 : f32 to vector<16x16xf32>
    %203 = arith.mulf %202, %201 : vector<16x16xf32>
    %204 = arith.subf %193, %203 : vector<16x16xf32>
    %cst_62 = arith.constant dense<0xFF800000> : vector<16xf32>
    %205 = vector.multi_reduction <maximumf>, %204, %cst_62 [1] : vector<16x16xf32> to vector<16xf32>
    %206 = vector.shape_cast %205 : vector<16xf32> to vector<16x1xf32>
    %207 = vector.broadcast %206 : vector<16x1xf32> to vector<16x16xf32>
    %208 = arith.subf %204, %207 : vector<16x16xf32>
    %209 = math.exp %208 : vector<16x16xf32>
    %cst_63 = arith.constant dense<0.000000e+00> : vector<16xf32>
    %210 = vector.multi_reduction <add>, %209, %cst_63 [1] : vector<16x16xf32> to vector<16xf32>
    %211 = vector.shape_cast %210 : vector<16xf32> to vector<16x1xf32>
    %212 = tpu.reciprocal %211 {approx = true} : vector<16x1xf32> -> vector<16x1xf32>
    %213 = vector.broadcast %212 : vector<16x1xf32> to vector<16x16xf32>
    %214 = arith.mulf %209, %213 : vector<16x16xf32>
    %215 = arith.mulf %214, %1 : vector<16x16xf32>
    %cst_64 = arith.constant dense<0.000000e+00> : vector<16x2xf32>
    %216 = tpu.matmul %1, %27, %cst_64 {dimension_numbers = #tpu.dot_dimension_numbers<[1], [0], [0], [1], [0, 0, 1, 1], [], []>} : vector<16x16xf32>, vector<16x2xf32>, vector<16x2xf32> -> vector<16x2xf32>
    %217 = arith.mulf %27, %216 : vector<16x2xf32>
    %218 = vector.shape_cast %217 : vector<16x2xf32> to vector<1x16x2xf32>
    %cst_65 = arith.constant dense<0.000000e+00> : vector<1xf32>
    %219 = vector.multi_reduction <add>, %218, %cst_65 [1, 2] : vector<1x16x2xf32> to vector<1xf32>
    %220 = vector.shape_cast %219 : vector<1xf32> to vector<1x1x1xf32>
    %221 = vector.extract %220[0, 0, 0] : f32 from vector<1x1x1xf32>
    %222 = vector.broadcast %29 : vector<16x1xf32> to vector<16x2xf32>
    %223 = arith.mulf %222, %27 : vector<16x2xf32>
    %224 = arith.mulf %223, %27 : vector<16x2xf32>
    %225 = vector.shape_cast %224 : vector<16x2xf32> to vector<1x16x2xf32>
    %cst_66 = arith.constant dense<0.000000e+00> : vector<1xf32>
    %226 = vector.multi_reduction <add>, %225, %cst_66 [1, 2] : vector<1x16x2xf32> to vector<1xf32>
    %227 = vector.shape_cast %226 : vector<1xf32> to vector<1x1x1xf32>
    %228 = vector.extract %227[0, 0, 0] : f32 from vector<1x1x1xf32>
    %229 = arith.divf %221, %228 : f32
    %cst_67 = arith.constant 0.000000e+00 : f32
    %230 = arith.subf %cst_67, %229 : f32
    %cst_68 = arith.constant dense<0.000000e+00> : vector<2x2xf32>
    %231 = tpu.matmul %27, %27, %cst_68 {dimension_numbers = #tpu.dot_dimension_numbers<[0], [0], [1], [1], [0, 1, 1, 1], [], []>} : vector<16x2xf32>, vector<16x2xf32>, vector<2x2xf32> -> vector<2x2xf32>
    %232 = arith.mulf %27, %27 : vector<16x2xf32>
    %233 = vector.shape_cast %232 : vector<16x2xf32> to vector<1x16x2xf32>
    %cst_69 = arith.constant dense<0.000000e+00> : vector<1xf32>
    %234 = vector.multi_reduction <add>, %233, %cst_69 [1, 2] : vector<1x16x2xf32> to vector<1xf32>
    %235 = vector.shape_cast %234 : vector<1xf32> to vector<1x1x1xf32>
    %236 = vector.extract %235[0, 0, 0] : f32 from vector<1x1x1xf32>
    %237 = arith.mulf %231, %231 : vector<2x2xf32>
    %238 = vector.shape_cast %237 : vector<2x2xf32> to vector<1x2x2xf32>
    %cst_70 = arith.constant dense<0.000000e+00> : vector<1xf32>
    %239 = vector.multi_reduction <add>, %238, %cst_70 [1, 2] : vector<1x2x2xf32> to vector<1xf32>
    %240 = vector.shape_cast %239 : vector<1xf32> to vector<1x1x1xf32>
    %241 = vector.extract %240[0, 0, 0] : f32 from vector<1x1x1xf32>
    %242 = math.sqrt %241 : f32
    %cst_71 = arith.constant 1.41421354 : f32
    %243 = arith.mulf %cst_71, %236 : f32
    %244 = arith.divf %243, %242 : f32
    %cst_72 = arith.constant 2.000000e+00 : f32
    %245 = arith.subf %cst_72, %244 : f32
    %cst_73 = arith.constant 0.000000e+00 : f32
    %246 = arith.maximumf %245, %cst_73 : f32
    %247 = math.sqrt %246 : f32
    %248 = math.tanh %17 : vector<16x8xf32>
    %249 = vector.broadcast %3 : vector<16x1xf32> to vector<16x8xf32>
    %250 = arith.mulf %248, %249 : vector<16x8xf32>
    %cst_74 = arith.constant dense<0.000000e+00> : vector<16xf32>
    %251 = vector.multi_reduction <add>, %215, %cst_74 [1] : vector<16x16xf32> to vector<16xf32>
    %252 = vector.shape_cast %251 : vector<16xf32> to vector<16x1xf32>
    %cst_75 = arith.constant dense<0.000000e+00> : vector<8xf32>
    %253 = vector.multi_reduction <add>, %250, %cst_75 [0] : vector<16x8xf32> to vector<8xf32>
    %254 = vector.shape_cast %253 : vector<8xf32> to vector<1x8xf32>
    %255 = vector.broadcast %252 : vector<16x1xf32> to vector<16x8xf32>
    %256 = arith.mulf %255, %250 : vector<16x8xf32>
    %cst_76 = arith.constant 1.000000e-15 : f32
    %257 = vector.broadcast %cst_76 : f32 to vector<1x8xf32>
    %258 = arith.mulf %257, %254 : vector<1x8xf32>
    %259 = vector.broadcast %258 : vector<1x8xf32> to vector<16x8xf32>
    %260 = arith.addf %256, %259 : vector<16x8xf32>
    %cst_77 = arith.constant dense<0.000000e+00> : vector<16x8xf32>
    %261 = tpu.matmul %215, %250, %cst_77 {dimension_numbers = #tpu.dot_dimension_numbers<[1], [0], [0], [1], [0, 0, 1, 1], [], []>} : vector<16x16xf32>, vector<16x8xf32>, vector<16x8xf32> -> vector<16x8xf32>
    %262 = arith.subf %260, %261 : vector<16x8xf32>
    %263 = arith.mulf %250, %262 : vector<16x8xf32>
    %264 = vector.shape_cast %263 : vector<16x8xf32> to vector<1x16x8xf32>
    %cst_78 = arith.constant dense<0.000000e+00> : vector<1xf32>
    %265 = vector.multi_reduction <add>, %264, %cst_78 [1, 2] : vector<1x16x8xf32> to vector<1xf32>
    %266 = vector.shape_cast %265 : vector<1xf32> to vector<1x1x1xf32>
    %267 = vector.extract %266[0, 0, 0] : f32 from vector<1x1x1xf32>
    %268 = arith.mulf %250, %260 : vector<16x8xf32>
    %269 = vector.shape_cast %268 : vector<16x8xf32> to vector<1x16x8xf32>
    %cst_79 = arith.constant dense<0.000000e+00> : vector<1xf32>
    %270 = vector.multi_reduction <add>, %269, %cst_79 [1, 2] : vector<1x16x8xf32> to vector<1xf32>
    %271 = vector.shape_cast %270 : vector<1xf32> to vector<1x1x1xf32>
    %272 = vector.extract %271[0, 0, 0] : f32 from vector<1x1x1xf32>
    %cst_80 = arith.constant 1.000000e-15 : f32
    %273 = arith.addf %272, %cst_80 : f32
    %274 = arith.divf %267, %273 : f32
    %cst_81 = arith.constant dense<0.000000e+00> : vector<8x8xf32>
    %275 = tpu.matmul %250, %250, %cst_81 {dimension_numbers = #tpu.dot_dimension_numbers<[0], [0], [1], [1], [0, 1, 1, 1], [], []>} : vector<16x8xf32>, vector<16x8xf32>, vector<8x8xf32> -> vector<8x8xf32>
    %276 = arith.mulf %250, %250 : vector<16x8xf32>
    %277 = vector.shape_cast %276 : vector<16x8xf32> to vector<1x16x8xf32>
    %cst_82 = arith.constant dense<0.000000e+00> : vector<1xf32>
    %278 = vector.multi_reduction <add>, %277, %cst_82 [1, 2] : vector<1x16x8xf32> to vector<1xf32>
    %279 = vector.shape_cast %278 : vector<1xf32> to vector<1x1x1xf32>
    %280 = vector.extract %279[0, 0, 0] : f32 from vector<1x1x1xf32>
    %281 = arith.mulf %275, %275 : vector<8x8xf32>
    %282 = vector.shape_cast %281 : vector<8x8xf32> to vector<1x8x8xf32>
    %cst_83 = arith.constant dense<0.000000e+00> : vector<1xf32>
    %283 = vector.multi_reduction <add>, %282, %cst_83 [1, 2] : vector<1x8x8xf32> to vector<1xf32>
    %284 = vector.shape_cast %283 : vector<1xf32> to vector<1x1x1xf32>
    %285 = vector.extract %284[0, 0, 0] : f32 from vector<1x1x1xf32>
    %286 = math.sqrt %285 : f32
    %cst_84 = arith.constant 2.000000e+00 : f32
    %287 = arith.mulf %cst_84, %280 : f32
    %288 = arith.divf %287, %286 : f32
    %cst_85 = arith.constant 1.000000e+00 : f32
    %289 = arith.subf %cst_85, %288 : f32
    %cst_86 = arith.constant 8.000000e+00 : f32
    %290 = arith.addf %289, %cst_86 : f32
    %cst_87 = arith.constant 0.000000e+00 : f32
    %291 = arith.maximumf %290, %cst_87 : f32
    %292 = vector.shape_cast %252 : vector<16x1xf32> to vector<1x16x1xf32>
    %cst_88 = arith.constant dense<0.000000e+00> : vector<1xf32>
    %293 = vector.multi_reduction <add>, %292, %cst_88 [1, 2] : vector<1x16x1xf32> to vector<1xf32>
    %294 = vector.shape_cast %293 : vector<1xf32> to vector<1x1x1xf32>
    %295 = vector.extract %294[0, 0, 0] : f32 from vector<1x1x1xf32>
    %cst_89 = arith.constant 1.600000e-14 : f32
    %296 = arith.addf %295, %cst_89 : f32
    %cst_90 = arith.constant dense<0.000000e+00> : vector<16x16xf32>
    %297 = tpu.matmul %250, %250, %cst_90 {dimension_numbers = #tpu.dot_dimension_numbers<[1], [1], [0], [0], [0, 0, 1, 0], [], []>} : vector<16x8xf32>, vector<16x8xf32>, vector<16x16xf32> -> vector<16x16xf32>
    %298 = arith.mulf %250, %250 : vector<16x8xf32>
    %cst_91 = arith.constant dense<0.000000e+00> : vector<16xf32>
    %299 = vector.multi_reduction <add>, %298, %cst_91 [1] : vector<16x8xf32> to vector<16xf32>
    %300 = vector.shape_cast %299 : vector<16xf32> to vector<16x1xf32>
    %301 = tpu.transpose %300, [1, 0] : vector<16x1xf32> -> vector<1x16xf32>
    %302 = vector.broadcast %300 : vector<16x1xf32> to vector<16x16xf32>
    %303 = vector.broadcast %301 : vector<1x16xf32> to vector<16x16xf32>
    %304 = arith.addf %302, %303 : vector<16x16xf32>
    %cst_92 = arith.constant 2.000000e+00 : f32
    %305 = vector.broadcast %cst_92 : f32 to vector<16x16xf32>
    %306 = arith.mulf %305, %297 : vector<16x16xf32>
    %307 = arith.subf %304, %306 : vector<16x16xf32>
    %cst_93 = arith.constant 0.000000e+00 : f32
    %308 = vector.broadcast %cst_93 : f32 to vector<16x16xf32>
    %309 = arith.maximumf %307, %308 : vector<16x16xf32>
    %310 = math.sqrt %309 : vector<16x16xf32>
    %cst_94 = arith.constant 1.000000e+00 : f32
    %311 = arith.divf %cst_94, %296 : f32
    %312 = vector.broadcast %311 : f32 to vector<16x16xf32>
    %313 = arith.mulf %310, %312 : vector<16x16xf32>
    %314 = arith.mulf %313, %215 : vector<16x16xf32>
    %cst_95 = arith.constant dense<0.000000e+00> : vector<16x32xf32>
    %315 = tpu.matmul %314, %10, %cst_95 {dimension_numbers = #tpu.dot_dimension_numbers<[1], [0], [0], [1], [0, 0, 1, 1], [], []>} : vector<16x16xf32>, vector<16x32xf32>, vector<16x32xf32> -> vector<16x32xf32>
    %316 = tpu.concatenate %315, %10 in 1 : vector<16x32xf32>, vector<16x32xf32> -> vector<16x64xf32>
    %c0_96 = arith.constant 0 : index
    %c0_97 = arith.constant 0 : index
    %317 = vector.load %arg8[%c0_96, %c0_97] : memref<64x32xf32, #tpu.memory_space<vmem>>, vector<64x32xf32>
    %cst_98 = arith.constant dense<0.000000e+00> : vector<16x32xf32>
    %318 = tpu.matmul %316, %317, %cst_98 {dimension_numbers = #tpu.dot_dimension_numbers<[1], [0], [0], [1], [0, 0, 1, 1], [], []>} : vector<16x64xf32>, vector<64x32xf32>, vector<16x32xf32> -> vector<16x32xf32>
    %c0_99 = arith.constant 0 : index
    %c0_100 = arith.constant 0 : index
    %319 = vector.load %arg9[%c0_99, %c0_100] : memref<1x32xf32, #tpu.memory_space<vmem>>, vector<1x32xf32>
    %320 = vector.broadcast %319 : vector<1x32xf32> to vector<16x32xf32>
    %321 = arith.addf %318, %320 : vector<16x32xf32>
    %c0_101 = arith.constant 0 : index
    %c0_102 = arith.constant 0 : index
    %322 = vector.load %arg10[%c0_101, %c0_102] : memref<32x16xf32, #tpu.memory_space<vmem>>, vector<32x16xf32>
    %cst_103 = arith.constant dense<0.000000e+00> : vector<16x16xf32>
    %323 = tpu.matmul %321, %322, %cst_103 {dimension_numbers = #tpu.dot_dimension_numbers<[1], [0], [0], [1], [0, 0, 1, 1], [], []>} : vector<16x32xf32>, vector<32x16xf32>, vector<16x16xf32> -> vector<16x16xf32>
    %c0_104 = arith.constant 0 : index
    %c0_105 = arith.constant 0 : index
    %324 = vector.load %arg11[%c0_104, %c0_105] : memref<1x16xf32, #tpu.memory_space<vmem>>, vector<1x16xf32>
    %325 = vector.broadcast %324 : vector<1x16xf32> to vector<16x16xf32>
    %326 = arith.addf %323, %325 : vector<16x16xf32>
    %cst_106 = arith.constant dense<0xFF800000> : vector<16xf32>
    %327 = vector.multi_reduction <maximumf>, %326, %cst_106 [1] : vector<16x16xf32> to vector<16xf32>
    %328 = vector.shape_cast %327 : vector<16xf32> to vector<16x1xf32>
    %329 = vector.broadcast %328 : vector<16x1xf32> to vector<16x16xf32>
    %330 = arith.subf %326, %329 : vector<16x16xf32>
    %331 = math.exp %330 : vector<16x16xf32>
    %cst_107 = arith.constant dense<0.000000e+00> : vector<16xf32>
    %332 = vector.multi_reduction <add>, %331, %cst_107 [1] : vector<16x16xf32> to vector<16xf32>
    %333 = vector.shape_cast %332 : vector<16xf32> to vector<16x1xf32>
    %334 = tpu.reciprocal %333 {approx = true} : vector<16x1xf32> -> vector<16x1xf32>
    %335 = vector.broadcast %334 : vector<16x1xf32> to vector<16x16xf32>
    %336 = arith.mulf %331, %335 : vector<16x16xf32>
    %337 = vector.broadcast %3 : vector<16x1xf32> to vector<16x16xf32>
    %338 = arith.mulf %336, %337 : vector<16x16xf32>
    %339 = vector.broadcast %3 : vector<16x1xf32> to vector<16x32xf32>
    %340 = arith.mulf %321, %339 : vector<16x32xf32>
    %cst_108 = arith.constant dense<0.000000e+00> : vector<16x32xf32>
    %341 = tpu.matmul %338, %340, %cst_108 {dimension_numbers = #tpu.dot_dimension_numbers<[0], [0], [1], [1], [0, 1, 1, 1], [], []>} : vector<16x16xf32>, vector<16x32xf32>, vector<16x32xf32> -> vector<16x32xf32>
    %cst_109 = arith.constant dense<0.000000e+00> : vector<16x16xf32>
    %342 = tpu.matmul %314, %338, %cst_109 {dimension_numbers = #tpu.dot_dimension_numbers<[1], [0], [0], [1], [0, 0, 1, 1], [], []>} : vector<16x16xf32>, vector<16x16xf32>, vector<16x16xf32> -> vector<16x16xf32>
    %cst_110 = arith.constant dense<0.000000e+00> : vector<16x16xf32>
    %343 = tpu.matmul %338, %342, %cst_110 {dimension_numbers = #tpu.dot_dimension_numbers<[0], [0], [1], [1], [0, 1, 1, 1], [], []>} : vector<16x16xf32>, vector<16x16xf32>, vector<16x16xf32> -> vector<16x16xf32>
    %344 = arith.mulf %338, %342 : vector<16x16xf32>
    %345 = vector.shape_cast %344 : vector<16x16xf32> to vector<1x16x16xf32>
    %cst_111 = arith.constant dense<0.000000e+00> : vector<1xf32>
    %346 = vector.multi_reduction <add>, %345, %cst_111 [1, 2] : vector<1x16x16xf32> to vector<1xf32>
    %347 = vector.shape_cast %346 : vector<1xf32> to vector<1x1x1xf32>
    %348 = vector.extract %347[0, 0, 0] : f32 from vector<1x1x1xf32>
    %cst_112 = arith.constant dense<0.000000e+00> : vector<16xf32>
    %349 = vector.multi_reduction <add>, %314, %cst_112 [1] : vector<16x16xf32> to vector<16xf32>
    %350 = vector.shape_cast %349 : vector<16xf32> to vector<16x1xf32>
    %cst_113 = arith.constant 1.000000e-15 : f32
    %351 = vector.broadcast %cst_113 : f32 to vector<16x1xf32>
    %352 = arith.addf %350, %351 : vector<16x1xf32>
    %353 = vector.broadcast %352 : vector<16x1xf32> to vector<16x16xf32>
    %354 = arith.mulf %353, %338 : vector<16x16xf32>
    %355 = arith.mulf %354, %338 : vector<16x16xf32>
    %356 = vector.shape_cast %355 : vector<16x16xf32> to vector<1x16x16xf32>
    %cst_114 = arith.constant dense<0.000000e+00> : vector<1xf32>
    %357 = vector.multi_reduction <add>, %356, %cst_114 [1, 2] : vector<1x16x16xf32> to vector<1xf32>
    %358 = vector.shape_cast %357 : vector<1xf32> to vector<1x1x1xf32>
    %359 = vector.extract %358[0, 0, 0] : f32 from vector<1x1x1xf32>
    %360 = arith.divf %348, %359 : f32
    %cst_115 = arith.constant 0.000000e+00 : f32
    %361 = arith.subf %cst_115, %360 : f32
    %cst_116 = arith.constant dense<0.000000e+00> : vector<16x16xf32>
    %362 = tpu.matmul %338, %338, %cst_116 {dimension_numbers = #tpu.dot_dimension_numbers<[0], [0], [1], [1], [0, 1, 1, 1], [], []>} : vector<16x16xf32>, vector<16x16xf32>, vector<16x16xf32> -> vector<16x16xf32>
    %363 = arith.mulf %338, %338 : vector<16x16xf32>
    %364 = vector.shape_cast %363 : vector<16x16xf32> to vector<1x16x16xf32>
    %cst_117 = arith.constant dense<0.000000e+00> : vector<1xf32>
    %365 = vector.multi_reduction <add>, %364, %cst_117 [1, 2] : vector<1x16x16xf32> to vector<1xf32>
    %366 = vector.shape_cast %365 : vector<1xf32> to vector<1x1x1xf32>
    %367 = vector.extract %366[0, 0, 0] : f32 from vector<1x1x1xf32>
    %368 = arith.mulf %362, %362 : vector<16x16xf32>
    %369 = vector.shape_cast %368 : vector<16x16xf32> to vector<1x16x16xf32>
    %cst_118 = arith.constant dense<0.000000e+00> : vector<1xf32>
    %370 = vector.multi_reduction <add>, %369, %cst_118 [1, 2] : vector<1x16x16xf32> to vector<1xf32>
    %371 = vector.shape_cast %370 : vector<1xf32> to vector<1x1x1xf32>
    %372 = vector.extract %371[0, 0, 0] : f32 from vector<1x1x1xf32>
    %373 = math.sqrt %372 : f32
    %cst_119 = arith.constant 5.000000e-01 : f32
    %374 = arith.mulf %cst_119, %367 : f32
    %375 = arith.divf %374, %373 : f32
    %cst_120 = arith.constant 2.000000e+00 : f32
    %376 = arith.subf %cst_120, %375 : f32
    %cst_121 = arith.constant 0.000000e+00 : f32
    %377 = arith.maximumf %376, %cst_121 : f32
    %378 = math.sqrt %377 : f32
    %379 = tpu.iota {dimensions = array<i32: 0>} : vector<16x16xi32>
    %380 = tpu.iota {dimensions = array<i32: 1>} : vector<16x16xi32>
    %381 = arith.cmpi eq, %379, %380 : vector<16x16xi32>
    %cst_122 = arith.constant 0.000000e+00 : f32
    %382 = vector.broadcast %cst_122 : f32 to vector<16x16xf32>
    %383 = arith.select %381, %382, %343 : vector<16x16xi1>, vector<16x16xf32>
    %cst_123 = arith.constant dense<0.000000e+00> : vector<16xf32>
    %384 = vector.multi_reduction <add>, %383, %cst_123 [1] : vector<16x16xf32> to vector<16xf32>
    %385 = vector.shape_cast %384 : vector<16xf32> to vector<16x1xf32>
    %cst_124 = arith.constant 1.000000e-15 : f32
    %386 = vector.broadcast %cst_124 : f32 to vector<16x1xf32>
    %387 = arith.addf %385, %386 : vector<16x1xf32>
    %388 = math.sqrt %387 : vector<16x1xf32>
    %cst_125 = arith.constant 1.000000e-15 : f32
    %389 = vector.broadcast %cst_125 : f32 to vector<16x1xf32>
    %390 = arith.addf %388, %389 : vector<16x1xf32>
    %391 = tpu.reciprocal %390 {approx = true} : vector<16x1xf32> -> vector<16x1xf32>
    %392 = vector.broadcast %391 : vector<16x1xf32> to vector<16x16xf32>
    %393 = arith.mulf %383, %392 : vector<16x16xf32>
    %394 = tpu.transpose %391, [1, 0] : vector<16x1xf32> -> vector<1x16xf32>
    %395 = vector.broadcast %394 : vector<1x16xf32> to vector<16x16xf32>
    %396 = arith.mulf %393, %395 : vector<16x16xf32>
    %cst_126 = arith.constant dense<0.000000e+00> : vector<16x32xf32>
    %397 = tpu.matmul %396, %341, %cst_126 {dimension_numbers = #tpu.dot_dimension_numbers<[1], [0], [0], [1], [0, 0, 1, 1], [], []>} : vector<16x16xf32>, vector<16x32xf32>, vector<16x32xf32> -> vector<16x32xf32>
    %398 = tpu.concatenate %397, %341 in 1 : vector<16x32xf32>, vector<16x32xf32> -> vector<16x64xf32>
    %c0_127 = arith.constant 0 : index
    %c0_128 = arith.constant 0 : index
    %399 = vector.load %arg12[%c0_127, %c0_128] : memref<64x32xf32, #tpu.memory_space<vmem>>, vector<64x32xf32>
    %cst_129 = arith.constant dense<0.000000e+00> : vector<16x32xf32>
    %400 = tpu.matmul %398, %399, %cst_129 {dimension_numbers = #tpu.dot_dimension_numbers<[1], [0], [0], [1], [0, 0, 1, 1], [], []>} : vector<16x64xf32>, vector<64x32xf32>, vector<16x32xf32> -> vector<16x32xf32>
    %c0_130 = arith.constant 0 : index
    %c0_131 = arith.constant 0 : index
    %401 = vector.load %arg13[%c0_130, %c0_131] : memref<1x32xf32, #tpu.memory_space<vmem>>, vector<1x32xf32>
    %402 = vector.broadcast %401 : vector<1x32xf32> to vector<16x32xf32>
    %403 = arith.addf %400, %402 : vector<16x32xf32>
    %cst_132 = arith.constant dense<0.000000e+00> : vector<32xf32>
    %404 = vector.multi_reduction <add>, %403, %cst_132 [0] : vector<16x32xf32> to vector<32xf32>
    %405 = vector.shape_cast %404 : vector<32xf32> to vector<1x32xf32>
    %c0_133 = arith.constant 0 : index
    %c0_134 = arith.constant 0 : index
    %406 = vector.load %arg14[%c0_133, %c0_134] : memref<32x32xf32, #tpu.memory_space<vmem>>, vector<32x32xf32>
    %cst_135 = arith.constant dense<0.000000e+00> : vector<1x32xf32>
    %407 = tpu.matmul %405, %406, %cst_135 {dimension_numbers = #tpu.dot_dimension_numbers<[1], [0], [0], [1], [0, 0, 1, 1], [], []>} : vector<1x32xf32>, vector<32x32xf32>, vector<1x32xf32> -> vector<1x32xf32>
    %c0_136 = arith.constant 0 : index
    %c0_137 = arith.constant 0 : index
    %408 = vector.load %arg15[%c0_136, %c0_137] : memref<1x32xf32, #tpu.memory_space<vmem>>, vector<1x32xf32>
    %409 = arith.addf %407, %408 : vector<1x32xf32>
    %cst_138 = arith.constant 0.000000e+00 : f32
    %410 = vector.broadcast %cst_138 : f32 to vector<1x32xf32>
    %411 = arith.maximumf %409, %410 : vector<1x32xf32>
    %c0_139 = arith.constant 0 : index
    %c0_140 = arith.constant 0 : index
    %412 = vector.load %arg16[%c0_139, %c0_140] : memref<32x4xf32, #tpu.memory_space<vmem>>, vector<32x4xf32>
    %cst_141 = arith.constant dense<0.000000e+00> : vector<1x4xf32>
    %413 = tpu.matmul %411, %412, %cst_141 {dimension_numbers = #tpu.dot_dimension_numbers<[1], [0], [0], [1], [0, 0, 1, 1], [], []>} : vector<1x32xf32>, vector<32x4xf32>, vector<1x4xf32> -> vector<1x4xf32>
    %c0_142 = arith.constant 0 : index
    %c0_143 = arith.constant 0 : index
    %414 = vector.load %arg17[%c0_142, %c0_143] : memref<1x4xf32, #tpu.memory_space<vmem>>, vector<1x4xf32>
    %415 = arith.addf %413, %414 : vector<1x4xf32>
    %cst_144 = arith.constant dense<0xFF800000> : vector<1xf32>
    %416 = vector.multi_reduction <maximumf>, %415, %cst_144 [1] : vector<1x4xf32> to vector<1xf32>
    %417 = vector.shape_cast %416 : vector<1xf32> to vector<1x1xf32>
    %418 = vector.broadcast %417 : vector<1x1xf32> to vector<1x4xf32>
    %419 = arith.subf %415, %418 : vector<1x4xf32>
    %420 = math.exp %419 : vector<1x4xf32>
    %cst_145 = arith.constant dense<0.000000e+00> : vector<1xf32>
    %421 = vector.multi_reduction <add>, %420, %cst_145 [1] : vector<1x4xf32> to vector<1xf32>
    %422 = vector.shape_cast %421 : vector<1xf32> to vector<1x1xf32>
    %423 = math.log %422 : vector<1x1xf32>
    %424 = arith.addf %423, %417 : vector<1x1xf32>
    %425 = vector.broadcast %424 : vector<1x1xf32> to vector<1x4xf32>
    %426 = arith.subf %415, %425 : vector<1x4xf32>
    %427 = vector.shape_cast %426 : vector<1x4xf32> to vector<1x1x4xf32>
    %c0_146 = arith.constant 0 : index
    %c0_147 = arith.constant 0 : index
    %c0_148 = arith.constant 0 : index
    %428 = vector.load %arg19[%c0_146, %c0_147, %c0_148] : memref<1x1x4xf32, #tpu.memory_space<vmem>>, vector<1x1x4xf32>
    tpu.vector_store %arg19[%c0_146, %c0_147, %c0_148], %427 {strides = array<i32>} : memref<1x1x4xf32, #tpu.memory_space<vmem>>, vector<1x1x4xf32>,
    %429 = tpu.iota {dimensions = array<i32: 1>} : vector<1x128xi32>
    %cst_149 = arith.constant 0.000000e+00 : f32
    %430 = vector.broadcast %cst_149 : f32 to vector<1x128xf32>
    %c0_i32 = arith.constant 0 : i32
    %431 = vector.broadcast %c0_i32 : i32 to vector<1x128xi32>
    %432 = arith.cmpi eq, %429, %431 : vector<1x128xi32>
    %433 = vector.broadcast %230 : f32 to vector<1x128xf32>
    %434 = arith.select %432, %433, %430 : vector<1x128xi1>, vector<1x128xf32>
    %c1_i32 = arith.constant 1 : i32
    %435 = vector.broadcast %c1_i32 : i32 to vector<1x128xi32>
    %436 = arith.cmpi eq, %429, %435 : vector<1x128xi32>
    %437 = vector.broadcast %247 : f32 to vector<1x128xf32>
    %438 = arith.select %436, %437, %434 : vector<1x128xi1>, vector<1x128xf32>
    %c2_i32 = arith.constant 2 : i32
    %439 = vector.broadcast %c2_i32 : i32 to vector<1x128xi32>
    %440 = arith.cmpi eq, %429, %439 : vector<1x128xi32>
    %441 = vector.broadcast %274 : f32 to vector<1x128xf32>
    %442 = arith.select %440, %441, %438 : vector<1x128xi1>, vector<1x128xf32>
    %c3_i32 = arith.constant 3 : i32
    %443 = vector.broadcast %c3_i32 : i32 to vector<1x128xi32>
    %444 = arith.cmpi eq, %429, %443 : vector<1x128xi32>
    %445 = vector.broadcast %291 : f32 to vector<1x128xf32>
    %446 = arith.select %444, %445, %442 : vector<1x128xi1>, vector<1x128xf32>
    %c4_i32 = arith.constant 4 : i32
    %447 = vector.broadcast %c4_i32 : i32 to vector<1x128xi32>
    %448 = arith.cmpi eq, %429, %447 : vector<1x128xi32>
    %449 = vector.broadcast %361 : f32 to vector<1x128xf32>
    %450 = arith.select %448, %449, %446 : vector<1x128xi1>, vector<1x128xf32>
    %c5_i32 = arith.constant 5 : i32
    %451 = vector.broadcast %c5_i32 : i32 to vector<1x128xi32>
    %452 = arith.cmpi eq, %429, %451 : vector<1x128xi32>
    %453 = vector.broadcast %378 : f32 to vector<1x128xf32>
    %454 = arith.select %452, %453, %450 : vector<1x128xi1>, vector<1x128xf32>
    %455 = vector.shape_cast %454 : vector<1x128xf32> to vector<1x1x128xf32>
    %c0_150 = arith.constant 0 : index
    %c0_151 = arith.constant 0 : index
    %c0_152 = arith.constant 0 : index
    %456 = vector.load %arg18[%c0_150, %c0_151, %c0_152] : memref<1x1x128xf32, #tpu.memory_space<vmem>>, vector<1x1x128xf32>
    tpu.vector_store %arg18[%c0_150, %c0_151, %c0_152], %455 {strides = array<i32>} : memref<1x1x128xf32, #tpu.memory_space<vmem>>, vector<1x1x128xf32>,
    return
  }
  func.func @transform_0(%arg0: i32) -> (i32, i32, i32) {
    %c0_i32 = arith.constant 0 : i32
    %c0_i32_0 = arith.constant 0 : i32
    %c0_i32_1 = arith.constant 0 : i32
    return %arg0, %c0_i32, %c0_i32_0 : i32, i32, i32
  }
  func.func @transform_1(%arg0: i32) -> (i32, i32, i32) {
    %c0_i32 = arith.constant 0 : i32
    %c0_i32_0 = arith.constant 0 : i32
    %c0_i32_1 = arith.constant 0 : i32
    return %arg0, %c0_i32, %c0_i32_0 : i32, i32, i32
  }
  func.func @transform_2(%arg0: i32) -> (i32, i32, i32) {
    %c0_i32 = arith.constant 0 : i32
    %c0_i32_0 = arith.constant 0 : i32
    %c0_i32_1 = arith.constant 0 : i32
    return %arg0, %c0_i32, %c0_i32_0 : i32, i32, i32
  }
  func.func @transform_3(%arg0: i32) -> (i32, i32) {
    %c0_i32 = arith.constant 0 : i32
    %c0_i32_0 = arith.constant 0 : i32
    %c0_i32_1 = arith.constant 0 : i32
    return %c0_i32, %c0_i32_0 : i32, i32
  }
  func.func @transform_4(%arg0: i32) -> (i32, i32) {
    %c0_i32 = arith.constant 0 : i32
    %c0_i32_0 = arith.constant 0 : i32
    %c0_i32_1 = arith.constant 0 : i32
    return %c0_i32, %c0_i32_0 : i32, i32
  }
  func.func @transform_5(%arg0: i32) -> (i32, i32) {
    %c0_i32 = arith.constant 0 : i32
    %c0_i32_0 = arith.constant 0 : i32
    %c0_i32_1 = arith.constant 0 : i32
    return %c0_i32, %c0_i32_0 : i32, i32
  }
  func.func @transform_6(%arg0: i32) -> (i32, i32) {
    %c0_i32 = arith.constant 0 : i32
    %c0_i32_0 = arith.constant 0 : i32
    %c0_i32_1 = arith.constant 0 : i32
    return %c0_i32, %c0_i32_0 : i32, i32
  }
  func.func @transform_7(%arg0: i32) -> (i32, i32) {
    %c0_i32 = arith.constant 0 : i32
    %c0_i32_0 = arith.constant 0 : i32
    %c0_i32_1 = arith.constant 0 : i32
    return %c0_i32, %c0_i32_0 : i32, i32
  }
  func.func @transform_8(%arg0: i32) -> (i32, i32) {
    %c0_i32 = arith.constant 0 : i32
    %c0_i32_0 = arith.constant 0 : i32
    %c0_i32_1 = arith.constant 0 : i32
    return %c0_i32, %c0_i32_0 : i32, i32
  }
  func.func @transform_9(%arg0: i32) -> (i32, i32) {
    %c0_i32 = arith.constant 0 : i32
    %c0_i32_0 = arith.constant 0 : i32
    %c0_i32_1 = arith.constant 0 : i32
    return %c0_i32, %c0_i32_0 : i32, i32
  }
  func.func @transform_10(%arg0: i32) -> (i32, i32) {
    %c0_i32 = arith.constant 0 : i32
    %c0_i32_0 = arith.constant 0 : i32
    %c0_i32_1 = arith.constant 0 : i32
    return %c0_i32, %c0_i32_0 : i32, i32
  }
  func.func @transform_11(%arg0: i32) -> (i32, i32) {
    %c0_i32 = arith.constant 0 : i32
    %c0_i32_0 = arith.constant 0 : i32
    %c0_i32_1 = arith.constant 0 : i32
    return %c0_i32, %c0_i32_0 : i32, i32
  }
  func.func @transform_12(%arg0: i32) -> (i32, i32) {
    %c0_i32 = arith.constant 0 : i32
    %c0_i32_0 = arith.constant 0 : i32
    %c0_i32_1 = arith.constant 0 : i32
    return %c0_i32, %c0_i32_0 : i32, i32
  }
  func.func @transform_13(%arg0: i32) -> (i32, i32) {
    %c0_i32 = arith.constant 0 : i32
    %c0_i32_0 = arith.constant 0 : i32
    %c0_i32_1 = arith.constant 0 : i32
    return %c0_i32, %c0_i32_0 : i32, i32
  }
  func.func @transform_14(%arg0: i32) -> (i32, i32) {
    %c0_i32 = arith.constant 0 : i32
    %c0_i32_0 = arith.constant 0 : i32
    %c0_i32_1 = arith.constant 0 : i32
    return %c0_i32, %c0_i32_0 : i32, i32
  }
  func.func @transform_15(%arg0: i32) -> (i32, i32) {
    %c0_i32 = arith.constant 0 : i32
    %c0_i32_0 = arith.constant 0 : i32
    %c0_i32_1 = arith.constant 0 : i32
    return %c0_i32, %c0_i32_0 : i32, i32
  }
  func.func @transform_16(%arg0: i32) -> (i32, i32) {
    %c0_i32 = arith.constant 0 : i32
    %c0_i32_0 = arith.constant 0 : i32
    %c0_i32_1 = arith.constant 0 : i32
    return %c0_i32, %c0_i32_0 : i32, i32
  }
  func.func @transform_17(%arg0: i32) -> (i32, i32, i32) {
    %c0_i32 = arith.constant 0 : i32
    %c0_i32_0 = arith.constant 0 : i32
    %c0_i32_1 = arith.constant 0 : i32
    return %arg0, %c0_i32, %c0_i32_0 : i32, i32, i32
  }
  func.func @transform_18(%arg0: i32) -> (i32, i32, i32) {
    %c0_i32 = arith.constant 0 : i32
    %c0_i32_0 = arith.constant 0 : i32
    %c0_i32_1 = arith.constant 0 : i32
    return %arg0, %c0_i32, %c0_i32_0 : i32, i32, i32
  }
}

</mosaic_0001>

<bundles_post_ra>
// kernel: diffwire_forward.1
= control target key start
LH: loop header
LB: loop body
LE: loop exit
PB: predicated region body
PF: predicated region fallthrough
CT: control target
= control target key end

     0   :  { %s5459_s0 = inlined_call_operand.vmem [shape: f32[2,16,8], index: 0, kind: input, shape index: {}]   ;;  %s5460_s1 = inlined_call_operand.vmem [shape: f32[2,16,16], index: 1, kind: input, shape index: {}]   ;;  %s5461_s2 = inlined_call_operand.vmem [shape: f32[2,16,1], index: 2, kind: input, shape index: {}]   ;;  %s5462_s3 = inlined_call_operand.vmem [shape: f32[8,32], index: 3, kind: input, shape index: {}]   ;;  %s5463_s4 = inlined_call_operand.vmem [shape: f32[1,32], index: 4, kind: input, shape index: {}]   ;;  %s5464_s5 = inlined_call_operand.vmem [shape: f32[32,10], index: 5, kind: input, shape index: {}]   ;;  %s5465_s6 = inlined_call_operand.vmem [shape: f32[1,10], index: 6, kind: input, shape index: {}]   ;;  %s5466_s7 = inlined_call_operand.vmem [shape: f32[64,32], index: 7, kind: input, shape index: {}]   ;;  %s5467_s8 = inlined_call_operand.vmem [shape: f32[1,32], index: 8, kind: input, shape index: {}]   ;;  %s5468_s9 = inlined_call_operand.vmem [shape: f32[32,16], index: 9, kind: input, shape index: {}]   ;;  %s5469_s10 = inlined_call_operand.vmem [shape: f32[1,16], index: 10, kind: input, shape index: {}]   ;;  %s5470_s11 = inlined_call_operand.vmem [shape: f32[64,32], index: 11, kind: input, shape index: {}]   ;;  %s5471_s12 = inlined_call_operand.vmem [shape: f32[1,32], index: 12, kind: input, shape index: {}]   ;;  %s5472_s13 = inlined_call_operand.vmem [shape: f32[32,32], index: 13, kind: input, shape index: {}]   ;;  %s5473_s14 = inlined_call_operand.vmem [shape: f32[1,32], index: 14, kind: input, shape index: {}]   ;;  %s5474_s15 = inlined_call_operand.vmem [shape: f32[32,4], index: 15, kind: input, shape index: {}]   ;;  %s5475_s16 = inlined_call_operand.vmem [shape: f32[1,4], index: 16, kind: input, shape index: {}]   ;;  %s5476_s17 = inlined_call_operand.vmem [shape: f32[2,1,128], index: 17, kind: output, shape index: {0}]   ;;  %s5477_s18 = inlined_call_operand.hbm [shape: f32[2,1,4], index: 18, kind: output, shape index: {1}]  }
   0x1   :  { %5489 = sst [smem:[#allocation11_spill]] %s5459_s0 }
   0x2   :  { %5490 = sst [smem:[#allocation12_spill]] %s5460_s1 }
   0x3   :  { %5491 = sst [smem:[#allocation13_spill]] %s5461_s2 }
   0x4   :  { %5492 = sst [smem:[#allocation14_spill]] %s5462_s3 }
   0x5   :  { %5493 = sst [smem:[#allocation15_spill]] %s5463_s4 }
   0x6   :  { %5494 = sst [smem:[#allocation16_spill]] %s5464_s5 }
   0x7   :  { %5495 = sst [smem:[#allocation17_spill]] %s5465_s6 }
   0x8   :  { %5496 = sst [smem:[#allocation18_spill]] %s5477_s18 }
   0x9   :  { %24 = vsyncpa [#allocation3], 0 }
   0xa   :  { %26 = vsyncpa [#allocation3 + $0x1], 0  ;;  %s4666_s27 = smov 0   ;;  %s4668_s28 = smov 0  }
   0xb   :  { %s4670_s29 = smov 0   ;;  %s4672_s30 = smov 0  }
   0xc LB: > { %5497 = sst [smem:[#allocation5_spill]] %s4544_s27  ;;  %s4687_s0 = sadd.s32 4294967295, %s4556_s30   ;;  %s4556_s30 = sphi %s4672_s30, %s5525_s30   ;;  %s4552_s29 = sphi %s4670_s29, %s5527_s29   ;;  %s4548_s28 = sphi %s4668_s28, %s5529_s28   ;;  %s4544_s27 = sphi %s4666_s27, %s5528_s27  }
   0xd   : > { %5498 = sst [smem:[#allocation6_spill]] %s4552_s29  ;;  %s3797_s19 = sadd.s32 4294967294, %s4556_s30  }
   0xe   : > { %5499 = sst [smem:[#allocation7_spill]] %s4556_s30  ;;  %s4691_s1 = sadd.s32 1, %s4556_s30  }
   0xf   : > { %5500 = sst [smem:[#allocation8_spill]] %s4691_s1  ;;  %s437_s20 = sadd.s32 1, %s4552_s29 }
  0x10   : > { %s434_s21 = ssub.s32 %s4556_s30, %s4691_s1  ;;  %p447_p0 = scmp.ne.s32.totalorder %s4552_s29, %s4548_s28 }
  0x11   : > { %p435_p1 = scmp.eq.s32.totalorder %s434_s21, 0  ;;  %p448_p2 = scmp.eq.s32.totalorder %s4687_s0, 1 }
  0x12   : > { %p453_p3 = scmp.ne.s32.totalorder %s4548_s28, %s4544_s27  ;;  %p454_p4 = scmp.eq.s32.totalorder %s3797_s19, 1 }
  0x13   : > { %s4702_s22 = scalar_select %p435_p1, %s4552_s29, %s437_s20  }
  0x14   : > { %p4704_p5 = por %p448_p2, %p447_p0  ;;  %p4708_p6 = por %p454_p4, %p453_p3 }
  0x15   : > { %5501 = sst [smem:[#allocation9_spill]] %s4702_s22  ;;  %p3800_p7 = scmp.ge.s32.totalorder %s4556_s30, 1 }
  0x16   : > { %s5503_s23 = scalar_select %p4708_p6, 1, 0 }
  0x17   : > { %p538_p8 = scmp.lt.s32.totalorder %s4556_s30, 3 }
  0x18   : > { %5504 = sst [smem:[#allocation10_spill]] %s5503_s23 }
  0x19   : > { %p539_p9 = pnand %p3800_p7, %p538_p8 }
  0x1a   : > { %s5505_s3 = sld [smem:[#allocation14_spill]] (!%p539_p9)  ;;  %p604_p10 = scmp.lt.s32.totalorder (!%p539_p9), %s4687_s0, 1  ;;  %vm636_vm0 = vcmask (!%p539_p9), 64512   ;;  %vm729_vm1 = vcmask (!%p539_p9), 261120   ;;  %vm811_vm2 = vcmask (!%p539_p9), 15360   ;;  %vm834_vm3 = vcmask (!%p539_p9), 130048  }
  0x1b   : > { %542 = sbr.rel (%p539_p9) target bundleno = 8220 (0x201c), region = 88  ;;  %s5506_s5 = sld [smem:[#allocation16_spill]] (!%p539_p9)  ;;  %v4559_v60 = vmov (!%p539_p9), 0.25   ;;  %vm1101_vm10 = vcmask (!%p539_p9), 7168   ;;  %vm4564_vm13 = vmmov (!%p539_p9), 0   ;;  %vm5074_vm14 = vmpackc.low (!%p539_p9), %vm636_vm0, %vm636_vm0  ;;  %vm1951_vm15 = vcmask (!%p539_p9), 9216  }
  0x1c   : > { %s5507_s26 = sld [smem:[#allocation11_spill]] (!%p539_p9)  ;;  %s5508_s4 = sld [smem:[#allocation15_spill]] (!%p539_p9) }
  0x1d   : > { %s5509_s6 = sld [smem:[#allocation17_spill]] (!%p539_p9)  ;;  %s4558_s20 = smov (!%p539_p9), 1  }
  0x1e   : > { %s4560_s21 = smov (!%p539_p9), 127  }
  0x20   : > { %v628_v0 = vld [vmem:[%s5505_s3] sm:$0xff] (!%p539_p9) }
  0x21   : > { %v718_v1 = vld [vmem:[%s5506_s5] sm:$0xff] (!%p539_p9)  ;;  %v719_v2 = vld [vmem:[%s5506_s5 + $0x8] sm:$0xff] (!%p539_p9)  ;;  %3957 = vmatprep.subr.mxu0 (!%p539_p9), %v628_v0  ;;  %v720_v6 = vld [vmem:[%s5506_s5 + $0x10] sm:$0xff] (!%p539_p9) }
  0x22   : > { %v4142_v3 = vpack.c.bf16 %v719_v2, %v718_v1  ;;  %3958 = vmatpush3.msra.mxu0 %v628_v0  ;;  %s4725_s22 = scalar_select %p604_p10, %s4687_s0, 1  ;;  %v721_v7 = vld [vmem:[%s5506_s5 + $0x18] sm:$0xff]  ;;  %v3807_v9 = vld [vmem:[%s5508_s4] ss:$0 sm:$0xff] }
  0x23   : > { %v4146_v8 = vpack.c.bf16 %v721_v7, %v720_v6  ;;  %v3810_v14 = vld [vmem:[%s5509_s6] ss:$0 sm:$0xff] }
  0x24   : > { %4143 = vmatprep.subr.bf16.mxu1 %v4142_v3  ;;  %s4728_s24 = sshll.u32 %s4725_s22, 4 }
  0x25   : > { %4145 = vmatpush3.bf16.msra.mxu1 %v4142_v3  ;;  %s608_s19 = scalar_lea.vmem %s5507_s26, %s4728_s24  ;;  %s5510_s26 = sld [smem:[#allocation12_spill]] }
  0x26   : > { %v626_v4 = vld [vmem:[%s608_s19] sm:$0xff]  ;;  %v627_v5 = vld [vmem:[%s608_s19 + $0x8] sm:$0xff]  ;;  %4147 = vmatprep.subr.bf16.mxu1 %v4146_v8 }
  0x27   : > { %3959 = vmatprep.mubr.msk.f32.mxu0 %vm636_vm0, %v626_v4 }
  0x28   : > { %3960 = vmatmul.mubr.msk.f32.vlgmr.msra.gmra.mrb[0].mxu0 %vm636_vm0, %v627_v5 }
  0x29   : > { %4149 = vmatpush3.bf16.msra.mxu1 %v4146_v8 }
  0x2b   : > { %s4768_s19 = scalar_lea.vmem %s5510_s26, %s4728_s24 }
  0x2c   : > { %v4771_v21 = vld [vmem:[%s4768_s19] sm:$0xff]  ;;  %v4781_v32 = vld [vmem:[%s4768_s19 + $0x8] sm:$0xff] }
  0x2d   : > { %v835_v22 = vsel %vm834_vm3, %v4771_v21, 0.0  ;;  %v838_v34 = vsel %vm834_vm3, %v4781_v32, 0.0 }
  0xfb   : > { %v3961_v10 = vpop.f32.mrb[0].mxu0 }
  0xfc   : > { %v709_v11 = vpop.f32.mrb[1].mxu0  ;;  %v4747_v13 = vadd.f32 %v3961_v10, %v3807_v9 }
  0xfd   : > { %v4745_v12 = vadd.f32 %v3807_v9, %v709_v11 }
  0xff   : > { %3970 = vmatprep.mubr.msk.f32.mxu1 %vm729_vm1, %v4745_v12 }
 0x100   : > { %3971 = vmatmul.mubr.msk.f32.vlgmr.msra.gmra.mrb[0].mxu1 %vm729_vm1, %v4747_v13 }
 0x101   : > { %3991 = vmatprep.mubr.msk.f32.mxu1 %vm834_vm3, %v4771_v21 }
 0x1d3   : > { %v3972_v15 = vpop.f32.mrb[0].mxu1 }
 0x1d4   : > { %v802_v16 = vpop.f32.mrb[1].mxu1  ;;  %v4758_v18 = vadd.f32 %v3972_v15, %v3810_v14 }
 0x1d5   : > { %v4756_v17 = vadd.f32 %v3810_v14, %v802_v16  ;;  %v4561_v14 = vmov 0.0|0.0  }
 0x1d6   : > { %v815_v20 = vsel %vm811_vm2, %v4758_v18, -inf }
 0x1d7   : > { %v812_v19 = vsel %vm811_vm2, %v4756_v17, -inf }
 0x1d8   : > { %813 = vmax.xlane.f32.xlu0 %v812_v19 }
 0x1dc   : > { %816 = vmax.xlane.f32.xlu0 %v815_v20 }
 0x1e0   : > { %836 = vadd.xlane.f32.xlu0 %v835_v22 }
 0x265   : > { %v814_v23 = vpop.xlane.xlu0 %813 }
 0x266   : > { %v818_v24 = vsub.f32 %v4756_v17, %v814_v23 }
 0x268   : > { %v820_v25 = vmul.f32 1.442695, %v818_v24 }
 0x269   : > { %v817_v26 = vpop.xlane.xlu0 %816 }
 0x26a   : > { %4378 = vpow2.f32 %v820_v25  ;;  %v819_v27 = vsub.f32 %v4758_v18, %v817_v26 }
 0x26c   : > { %v822_v28 = vmul.f32 1.442695, %v819_v27 }
 0x26d   : > { %v4800_v43 = vpop.xlane.xlu0 %836 }
 0x26e   : > { %4380 = vpow2.f32 %v822_v28  ;;  %v4803_v44 = vadd.f32 1e-15, %v4800_v43 }
 0x270   : > { %vm857_vm6 = vcmp.eq.f32.partialorder %v4803_v44, inf  ;;  %v860_v52 = vand.u32 2147483648, %v4803_v44  ;;  %vm859_vm7 = vcmp.eq.f32.partialorder %v4803_v44, 0.0 }
 0x274   : > { %v4379_v29 = vpop.eup %4378 }
 0x275   : > { %v824_v30 = vsel %vm811_vm2, %v4379_v29, 0.0 }
 0x276   : > { %825 = vadd.xlane.f32.xlu1 %v824_v30 }
 0x278   : > { %v4381_v31 = vpop.eup %4380 }
 0x279   : > { %v827_v33 = vsel %vm811_vm2, %v4381_v31, 0.0 }
 0x27a   : > { %828 = vadd.xlane.f32.xlu1 %v827_v33 }
 0x27e   : > { %839 = vadd.xlane.f32.xlu1 %v838_v34 }
 0x303   : > { %v826_v35 = vpop.xlane.xlu1 %825 }
 0x304   : > { %4382 = vrcp.f32 %v826_v35 }
 0x307   : > { %v829_v36 = vpop.xlane.xlu1 %828 }
 0x308   : > { %4384 = vrcp.f32 %v829_v36 }
 0x30b   : > { %v4794_v41 = vpop.xlane.xlu1 %839 }
 0x30c   : > { %v4797_v42 = vadd.f32 1e-15, %v4794_v41 }
 0x30e   : > { %v4383_v37 = vpop.eup %4382  ;;  %4386 = vrsqrt.f32 %v4797_v42  ;;  %vm864_vm4 = vcmp.eq.f32.partialorder %v4797_v42, inf  ;;  %v867_v48 = vand.u32 2147483648, %v4797_v42  ;;  %vm866_vm5 = vcmp.eq.f32.partialorder %v4797_v42, 0.0 }
 0x30f   : > { %v4786_v38 = vmul.f32 %v4383_v37, %v4379_v29  ;;  %4388 = vrsqrt.f32 %v4803_v44 }
 0x311   : > { %843 = vrot.lane.b32.xlu0 %v4786_v38, %s4558_s20 }
 0x312   : > { %v4385_v39 = vpop.eup %4384 }
 0x313   : > { %v4790_v40 = vmul.f32 %v4385_v39, %v4381_v31 }
 0x315   : > { %845 = vrot.lane.b32.xlu1 %v4790_v40, %s4558_s20  ;;  %v4162_v15 = vpack.c.bf16 %v4790_v40, %v4786_v38 }
 0x318   : > { %v4387_v45 = vpop.eup %4386 }
 0x319   : > { %v863_v46 = vmul.f32 %v4387_v45, %v4797_v42  ;;  %v4389_v47 = vpop.eup %4388 }
 0x31a   : > { %v856_v50 = vmul.f32 %v4389_v47, %v4803_v44 }
 0x31b   : > { %v865_v49 = vsel %vm864_vm4, %v4797_v42, %v863_v46 }
 0x31c   : > { %v868_v51 = vsel %vm866_vm5, %v867_v48, %v865_v49  ;;  %v858_v53 = vsel %vm857_vm6, %v4803_v44, %v856_v50 }
 0x31d   : > { %v4816_v54 = vadd.f32 1e-15, %v868_v51  ;;  %v861_v55 = vsel %vm859_vm7, %v860_v52, %v858_v53 }
 0x31e   : > { %v4819_v56 = vadd.f32 1e-15, %v861_v55 }
 0x31f   : > { %4390 = vrcp.f32 %v4816_v54 }
 0x320   : > { %4392 = vrcp.f32 %v4819_v56 }
 0x329   : > { %v4823_v58 = vpop.eup %4390 }
 0x32a   : > { %v4839_v1 = vpop.eup %4392 }
 0x383   : > { %v844_v57 = vpop.permute.xlu0 %843 }
 0x384   : > { %vm849_vm8 = vcmp.gt.f32.partialorder %v4786_v38, %v844_v57 }
 0x385   : > { %v4826_v61 = vsel %vm849_vm8, -0.25, %v4559_v60 }
 0x386   : > { %v4843_v2 = vmul.f32 %v4839_v1, %v4826_v61  ;;  %v1210_v3 = vmul.f32 %v4819_v56, %v4826_v61 }
 0x387   : > { %v846_v59 = vpop.permute.xlu1 %845 }
 0x388   : > { %vm850_vm9 = vcmp.gt.f32.partialorder %v4790_v40, %v846_v59  ;;  %v1321_v4 = vmul.f32 %v1210_v3, %v1210_v3  ;;  %v1212_v52 = vmul.f32 %v4843_v2, %v4800_v43 }
 0x389   : > { %v4828_v62 = vsel %vm850_vm9, -0.25, %v4559_v60 }
 0x38a   : > { %v4832_v63 = vmul.f32 %v4823_v58, %v4828_v62  ;;  %v4369_v0 = vpack.i.bf16 %v4828_v62, %v4826_v61 }
 0x38c   : > { %1152 = vrot.lane.b32.xlu0 %v4832_v63, %s4560_s21  ;;  %4370 = vrot.lane.b32.xlu1 %v4369_v0, %s4560_s21  ;;  %v1213_v50 = vmul.f32 %v4832_v63, %v4794_v41 }
 0x390   : > { %1150 = vrot.lane.b32.xlu1 %v4843_v2, %s4560_s21 }
 0x3b9   : > { %879 = vxpose.xlu1.b32.start [1/2] (short) (narrow) %v4771_v21, 16 }
 0x3bd   : > { %880 = vxpose.xlu1.b32.end [2/2] (short) (narrow) %v4781_v32, 16 }
 0x3db   : > { %1325 = vrot.lane.b32.xlu1 %v1321_v4, %s4560_s21  ;;  %v4562_v4 = vmov 1  }
 0x3dc   : > { %4375 = vset.pattern.permute.xlu1 %v4562_v4  ;;  %4374 = vset.pattern.permute.xlu0 %v4562_v4 }
 0x3fe   : > { %v4371_v5 = vpop.permute.xlu1 %4370  ;;  %v4852_v9 = vpop.permute.xlu0 %1152 }
 0x3ff   : > { %v4373_v6 = vunpack.i.h.bf16 %v4371_v5  ;;  %v4372_v7 = vunpack.i.l.bf16 %v4371_v5 }
 0x401   : > { %v4150_v8 = vpack.c.bf16 %v4373_v6, %v4372_v7  ;;  %v1211_v6 = vmul.f32 %v4816_v54, %v4828_v62 }
 0x402   : > { %v4854_v10 = vpop.permute.xlu1 %1150 }
 0x403   : > { %v4158_v11 = vpack.c.bf16 %v4852_v9, %v4854_v10  ;;  %4151 = vmatprep.subr.bf16.mxu0 %v4150_v8  ;;  %v1322_v7 = vmul.f32 %v1211_v6, %v1211_v6 }
 0x404   : > { %4153 = vmatpush3.bf16.msra.mxu0 %v4150_v8 }
 0x405   : > { %4155 = vmatprep.subr.bf16.mxu0 %v4150_v8  ;;  %4159 = vmatprep.subr.bf16.mxu1 %v4158_v11 }
 0x406   : > { %4161 = vmatpush3.bf16.msra.mxu1 %v4158_v11 }
 0x407   : > { %4166 = vmatprep.subr.bf16.mxu1 %v4561_v14 }
 0x409   : > { %3992 = vmatmul.mubr.msk.f32.vlgmr.msra.gmra.mrb[2].mxu1 %vm834_vm3, %v4781_v32 }
 0x40a   : > { %4168 = vmatpush3.bf16.msra.mxu1 %v4162_v15 }
 0x40b   : > { %4173 = vmatprep.subr.bf16.mxu1 %v4561_v14 }
 0x439   : > { %v4864_v16 = vpop.trf.xlu1 }
 0x43a   : > { %3977 = vmatprep.mubr.msk.f32.mxu0 %vm834_vm3, %v4864_v16 }
 0x43d   : > { %v4868_v19 = vpop.trf.xlu1 }
 0x43e   : > { %3978 = vmatmul.mubr.msk.f32.vlgmr.msra.gmra.mrb[2].mxu0 %vm834_vm3, %v4868_v19 }
 0x43f   : > { %4157 = vmatpush3.bf16.msra.mxu0 %v4150_v8  ;;  %3984 = vmatprep.mubr.msk.f32.mxu0 %vm834_vm3, %v4771_v21 }
 0x440   : > { %4163 = vmatprep.subr.bf16.mxu0 %v4162_v15 }
 0x442   : > { %3985 = vmatmul.mubr.msk.f32.vlgmr.msra.gmra.mrb[4].mxu0 %vm834_vm3, %v4781_v32 }
 0x443   : > { %4165 = vmatpush3.bf16.msra.mxu0 %v4162_v15  ;;  %3998 = vmatprep.mubr.msk.f32.mxu0 %vm834_vm3, %v4771_v21 }
 0x446   : > { %3999 = vmatmul.mubr.msk.f32.vlgmr.msra.gmra.mrb[6].mxu0 %vm834_vm3, %v4781_v32 }
 0x4dc   : > { %v3993_v20 = vpop.f32.mrb[2].mxu1 }
 0x4dd   : > { %v1280_v22 = vpop.f32.mrb[3].mxu1 }
 0x511   : > { %v3979_v23 = vpop.f32.mrb[2].mxu0 }
 0x512   : > { %1085 = vrot.lane.b32.xlu0 %v3979_v23, %s4558_s20  ;;  %v991_v24 = vpop.f32.mrb[3].mxu0 }
 0x515   : > { %v3986_v25 = vpop.f32.mrb[4].mxu0 }
 0x516   : > { %1083 = vrot.lane.b32.xlu0 %v991_v24, %s4558_s20  ;;  %v1072_v26 = vpop.f32.mrb[5].mxu0 }
 0x519   : > { %v4000_v27 = vpop.f32.mrb[6].mxu0 }
 0x51a   : > { %v1797_v28 = vmul.f32 %v4000_v27, %v4790_v40  ;;  %v1787_v29 = vpop.f32.mrb[7].mxu0  ;;  %1291 = vrot.lane.b32.xlu0 %v1280_v22, %s4558_s20 }
 0x51b   : > { %v1796_v30 = vmul.f32 %v1787_v29, %v4786_v38 }
 0x51c   : > { %v1799_v31 = vsel %vm811_vm2, %v1797_v28, 0.0  ;;  %v1326_v28 = vpop.permute.xlu1 %1325 }
 0x51d   : > { %v1798_v33 = vsel %vm811_vm2, %v1796_v30, 0.0 }
 0x51e   : > { %1118 = vrot.lane.b32.xlu0 %v3986_v25, %s4558_s20  ;;  %v4888_v34 = vadd.f32 %v1799_v31, %v1798_v33  ;;  %v1331_v31 = vsel %vm1101_vm10, %v1326_v28, 0.0 }
 0x522   : > { %1116 = vrot.lane.b32.xlu0 %v1072_v26, %s4558_s20 }
 0x526   : > { %1293 = vrot.lane.b32.xlu0 %v3993_v20, %s4558_s20 }
 0x584   : > { %v1086_v35 = vpop.permute.xlu0 %1085 }
 0x585   : > { %v1090_v36 = vmul.f32 %v1086_v35, %v4828_v62 }
 0x587   : > { %v1092_v37 = vmul.f32 %v4823_v58, %v1090_v36 }
 0x588   : > { %v1084_v39 = vpop.permute.xlu0 %1083 }
 0x589   : > { %v1089_v45 = vmul.f32 %v1084_v39, %v4826_v61  ;;  %1097 = vrot.lane.b32.xlu0 %v1092_v37, %s4560_s21 }
 0x58b   : > { %v1091_v46 = vmul.f32 %v4839_v1, %v1089_v45 }
 0x58c   : > { %v1292_v47 = vpop.permute.xlu0 %1291 }
 0x58d   : > { %1095 = vrot.lane.b32.xlu0 %v1091_v46, %s4560_s21  ;;  %v1297_v55 = vsub.f32 %v1212_v52, %v1292_v47 }
 0x58f   : > { %v1299_v59 = vmul.f32 %v1297_v55, %v4843_v2 }
 0x590   : > { %v1119_v48 = vpop.permute.xlu0 %1118 }
 0x591   : > { %v1123_v60 = vmul.f32 %v1119_v48, %v4828_v62 }
 0x593   : > { %v1125_v0 = vmul.f32 %v4823_v58, %v1123_v60 }
 0x594   : > { %v1117_v49 = vpop.permute.xlu0 %1116 }
 0x595   : > { %v1122_v3 = vmul.f32 %v1117_v49, %v4826_v61 }
 0x597   : > { %v1124_v5 = vmul.f32 %v4839_v1, %v1122_v3 }
 0x598   : > { %v1294_v51 = vpop.permute.xlu0 %1293 }
 0x599   : > { %v1298_v53 = vsub.f32 %v1213_v50, %v1294_v51 }
 0x59b   : > { %v1300_v57 = vmul.f32 %v1298_v53, %v4832_v63 }
 0x59d   : > { %1305 = vrot.lane.b32.xlu0 %v1300_v57, %s4560_s21 }
 0x5a1   : > { %1303 = vrot.lane.b32.xlu0 %v1299_v59, %s4560_s21 }
 0x5a5   : > { %1130 = vrot.lane.b32.xlu0 %v1125_v0, %s4560_s21 }
 0x5a9   : > { %1128 = vrot.lane.b32.xlu0 %v1124_v5, %s4560_s21 }
 0x5ad   : > { %1327 = vrot.lane.b32.xlu0 %v1322_v7, %s4560_s21 }
 0x5fb   : > { %v1098_v8 = vpop.permute.xlu0 %1097 }
 0x5fc   : > { %v1103_v61 = vsel %vm1101_vm10, %v1098_v8, 0.0 }
 0x5ff   : > { %v1096_v58 = vpop.permute.xlu0 %1095 }
 0x600   : > { %v1102_v11 = vsel %vm1101_vm10, %v1096_v58, 0.0 }
 0x601   : > { %v1104_v15 = vadd.f32 %v1103_v61, %v1102_v11 }
 0x603   : > { %1105 = vadd.xlane.f32.xlu0 %v1104_v15  ;;  %v1196_v15 = vlaneseq }
 0x60f   : > { %v1306_v20 = vpop.permute.xlu0 %1305 }
 0x610   : > { %v1310_v1 = vsel %vm1101_vm10, %v1306_v20, 0.0 }
 0x613   : > { %v1304_v22 = vpop.permute.xlu0 %1303 }
 0x614   : > { %v1309_v62 = vsel %vm1101_vm10, %v1304_v22, 0.0  ;;  %v1197_v22 = vshrl.u32 %v1196_v15, 7 }
 0x615   : > { %v1311_v23 = vadd.f32 %v1310_v1, %v1309_v62  ;;  %v875_v62 = vmul.f32 -0.5, %v4819_v56 }
 0x616   : > { %v4931_v1 = vsub.s32 0, %v1197_v22 }
 0x617   : > { %1312 = vadd.xlane.f32.xlu0 %v1311_v23  ;;  %v1131_v24 = vpop.permute.xlu0 %1130 }
 0x618   : > { %v1135_v26 = vsel %vm1101_vm10, %v1131_v24, 0.0 }
 0x61b   : > { %v1129_v25 = vpop.permute.xlu0 %1128 }
 0x61c   : > { %v1134_v27 = vsel %vm1101_vm10, %v1129_v25, 0.0  ;;  %v876_v25 = vmul.f32 -0.5, %v4816_v54  ;;  %v1361_v54 = vmul.f32 2.0, %v4771_v21 }
 0x61d   : > { %v1136_v29 = vadd.f32 %v1135_v26, %v1134_v27 }
 0x61f   : > { %1137 = vadd.xlane.f32.xlu1 %v1136_v29  ;;  %v1328_v30 = vpop.permute.xlu0 %1327 }
 0x620   : > { %v1332_v33 = vsel %vm1101_vm10, %v1328_v30, 0.0 }
 0x621   : > { %v1333_v35 = vadd.f32 %v1332_v33, %v1331_v31 }
 0x623   : > { %1334 = vadd.xlane.f32.xlu0 %v1333_v35 }
 0x630   : > { %1193 = vperm.xlu1 %4375, %v4832_v63  }
 0x639   : > { %1189 = vperm.xlu0 %4374, %v4843_v2  }
 0x659   : > { %1156 = vxpose.xlu1.b32.start [1/2] (short) (narrow) %v4854_v10, 8 }
 0x65d   : > { %1157 = vxpose.xlu1.b32.end [2/2] (short) (narrow) %v4852_v9, 8 }
 0x690   : > { %v1106_v36 = vpop.xlane.xlu0 %1105 }
 0x691   : > { %v1107_v37 = vrot.slane %v1106_v36, 4 }
 0x693   : > { %v1108_v39 = vadd.f32 %v1107_v37, %v1106_v36 }
 0x695   : > { %v1109_v45 = vrot.slane %v1108_v39, 2 }
 0x697   : > { %v1110_v46 = vadd.f32 %v1109_v45, %v1108_v39 }
 0x699   : > { %v1111_v47 = vrot.slane %v1110_v46, 1 }
 0x69b   : > { %v1112_v48 = vadd.f32 %v1111_v47, %v1110_v46 }
 0x69d   : > { %4258 = vpush %v1112_v48  ;;  %v1362_v48 = vmul.f32 2.0, %v4781_v32 }
 0x6a4   : > { %v1313_v49 = vpop.xlane.xlu0 %1312 }
 0x6a5   : > { %v1314_v50 = vrot.slane %v1313_v49, 4 }
 0x6a7   : > { %v1315_v51 = vadd.f32 %v1314_v50, %v1313_v49 }
 0x6a9   : > { %v1316_v52 = vrot.slane %v1315_v51, 2 }
 0x6ab   : > { %v1317_v57 = vadd.f32 %v1316_v52, %v1315_v51  ;;  %v4939_v51 = vand.u32 127, %v1196_v15 }
 0x6ac   : > { %v1138_v53 = vpop.xlane.xlu1 %1137 }
 0x6ad   : > { %v1139_v63 = vrot.slane %v1138_v53, 4  ;;  %v1318_v0 = vrot.slane %v1317_v57, 1  ;;  %vm4942_vm11 = vcmp.eq.s32.totalorder %v1197_v22, %v4939_v51  ;;  %vm3661_vm9 = vcmp.eq.s32.totalorder %v4939_v51, 0 }
 0x6af   : > { %v1140_v55 = vadd.f32 %v1139_v63, %v1138_v53  ;;  %v1319_v7 = vadd.f32 %v1318_v0, %v1317_v57  ;;  %v1356_v53 = vadd.s32 8, %v1197_v22  ;;  %v1403_v63 = vadd.f32 %v4864_v16, %v4771_v21 }
 0x6b0   : > { %v1335_v2 = vpop.xlane.xlu0 %1334  ;;  %v1194_v20 = vpop.permute.xlu1 %1193 }
 0x6b1   : > { %v1141_v10 = vrot.slane %v1140_v55, 2  ;;  %v1336_v59 = vrot.slane %v1335_v2, 4  ;;  %vm4952_vm12 = vcmp.eq.s32.totalorder %v1356_v53, %v4939_v51 }
 0x6b3   : > { %v1337_v9 = vadd.f32 %v1336_v59, %v1335_v2  ;;  %v1142_v60 = vadd.f32 %v1141_v10, %v1140_v55  ;;  %v1405_v55 = vsel %vm4942_vm11, %v4771_v21, 0.0  ;;  %v1404_v10 = vadd.f32 %v4868_v19, %v4781_v32 }
 0x6b4   : > { %v1407_v57 = vsub.f32 %v1403_v63, %v1405_v55  ;;  %v1406_v59 = vsel %vm4952_vm12, %v4781_v32, 0.0 }
 0x6b5   : > { %v1338_v3 = vrot.slane %v1337_v9, 2  ;;  %v1143_v4 = vrot.slane %v1142_v60, 1 }
 0x6b6   : > { %v1409_v0 = vmul.f32 2.0, %v1407_v57 }
 0x6b7   : > { %v1144_v5 = vadd.f32 %v1143_v4, %v1142_v60  ;;  %v1339_v6 = vadd.f32 %v1338_v3, %v1337_v9  ;;  %v1408_v3 = vsub.f32 %v1404_v10, %v1406_v59 }
 0x6b8   : > { %v1190_v30 = vpop.permute.xlu0 %1189 }
 0x6b9   : > { %4260 = vpush %v1144_v5  ;;  %v1340_v8 = vrot.slane %v1339_v6, 1 }
 0x6ba   : > { %4262 = vpush %v1319_v7 }
 0x6bb   : > { %v1341_v58 = vadd.f32 %v1340_v8, %v1339_v6  ;;  %v1410_v8 = vmul.f32 2.0, %v1408_v3 }
 0x6bd   : > { %4264 = vpush %v1341_v58 }
 0x6ce   : > { %s4259_s3 = spop %4258 }
 0x6d9   : > { %v1172_v24 = vpop.trf.xlu1 }
 0x6da   : > { %v1199_v28 = vrot.slane %v1172_v24, %v4931_v1 }
 0x6dc   : > { %v1200_v31 = vmul.f32 %v1199_v28, %v1190_v30  ;;  %v1201_v35 = vmul.f32 %v1199_v28, %v1194_v20 }
 0x6ea   : > { %s4261_s29 = spop %4260 }
 0x6eb   : > { %s4927_s1 = spop %4262  ;;  %s1202_s26 = sadd.f32 %s4261_s29, %s4259_s3 }
 0x6ed   : > { %v1203_v27 = vstv %s1202_s26  ;;  %s5515_s26 = sld [smem:[#allocation13_spill]] }
 0x6ee   : > { %s4265_s23 = spop %4264 }
 0x6ef   : > { %s1343_s25 = sadd.f32 1e-15, %s4265_s23 }
 0x6f1   : > { %v1344_v61 = vstv %s1343_s25 }
 0x6f2   : > { %4394 = vrcp.f32 %v1344_v61 }
 0x6f3   : > { %4396 = vrcp.f32 %v4803_v44 }
 0x6f4   : > { %4398 = vrcp.f32 %v4797_v42 }
 0x6fc   : > { %v4395_v11 = vpop.eup %4394 }
 0x6fd   : > { %4266 = vpush %v4395_v11  ;;  %v4397_v23 = vpop.eup %4396 }
 0x6fe   : > { %v4399_v26 = vpop.eup %4398  ;;  %v877_v44 = vmul.f32 %v4397_v23, %v875_v62 }
 0x6ff   : > { %v878_v29 = vmul.f32 %v4399_v26, %v876_v25 }
 0x700   : > { %v1204_v42 = vmul.f32 %v1203_v27, %v877_v44 }
 0x701   : > { %v1205_v33 = vmul.f32 %v1203_v27, %v878_v29 }
 0x702   : > { %v1206_v36 = vadd.f32 %v1204_v42, %v1200_v31 }
 0x703   : > { %v1207_v56 = vadd.f32 %v1205_v33, %v1201_v35 }
 0x704   : > { %v1208_v37 = vsub.f32 0.0, %v1206_v36 }
 0x705   : > { %v1209_v45 = vsub.f32 0.0, %v1207_v56 }
 0x72e   : > { %s4267_s20 = spop %4266 }
 0x72f   : > { %s1347_s21 = smul.f32 %s4267_s20, %s4927_s1  ;;  %s618_s20 = scalar_lea.vmem %s5515_s26, %s4728_s24 }
 0x730   : > { %s4566_s24 = smov 126  }
 0x731   : > { %s1348_s3 = sand.u32 2147483647, %s1347_s21 }
 0x732   : > { %s1349_s29 = smul.f32 16.0, %s1348_s3 }
 0x734   : > { %s1350_s23 = smul.f32 4.0, %s1349_s29  ;;  %s5484_s29 = smov 0.0  }
 0x736   : > { %v1351_v39 = vstv %s1350_s23  ;;  %s4567_s23 = smov 2  }
 0x737   : > { %v1352_v46 = vmul.f32 %v1351_v39, %v1208_v37  ;;  %v1353_v47 = vmul.f32 %v1351_v39, %v1209_v45 }
 0x739   : > { %v1363_v49 = vsub.f32 %v1352_v46, %v1361_v54  ;;  %v1364_v50 = vsub.f32 %v1353_v47, %v1362_v48 }
 0x73b   : > { %1365 = vxpose.xlu0.b32.start [1/2] (short) (narrow) %v1363_v49, 16  ;;  %v1399_v16 = vsel %vm4942_vm11, %v1363_v49, 0.0  ;;  %v1400_v19 = vsel %vm4952_vm12, %v1364_v50, 0.0 }
 0x73f   : > { %1366 = vxpose.xlu0.b32.end [2/2] (short) (narrow) %v1364_v50, 16 }
 0x7bb   : > { %v1381_v9 = vpop.trf.xlu0 }
 0x7bc   : > { %v1397_v60 = vadd.f32 %v1381_v9, %v1363_v49 }
 0x7be   : > { %v4963_v4 = vsub.f32 %v1397_v60, %v1399_v16 }
 0x7bf   : > { %v1382_v5 = vpop.trf.xlu0 }
 0x7c0   : > { %v1398_v6 = vadd.f32 %v1382_v5, %v1364_v50  ;;  %v1411_v7 = vadd.f32 %v1409_v0, %v4963_v4 }
 0x7c2   : > { %v4968_v58 = vsub.f32 %v1398_v6, %v1400_v19  ;;  %v1413_v61 = vmul.f32 0.01, %v1411_v7 }
 0x7c4   : > { %v1415_v11 = vsub.f32 %v4771_v21, %v1413_v61  ;;  %v1412_v15 = vadd.f32 %v1410_v8, %v4968_v58 }
 0x7c6   : > { %v1417_v20 = vsel %vm834_vm3, %v1415_v11, -inf  ;;  %v1414_v22 = vmul.f32 0.01, %v1412_v15 }
 0x7c7   : > { %1418 = vmax.xlane.f32.xlu0 %v1417_v20 }
 0x7c8   : > { %v1416_v62 = vsub.f32 %v4781_v32, %v1414_v22 }
 0x7ca   : > { %v1420_v23 = vsel %vm834_vm3, %v1416_v62, -inf }
 0x7cb   : > { %1421 = vmax.xlane.f32.xlu1 %v1420_v23 }
 0x854   : > { %v1419_v24 = vpop.xlane.xlu0 %1418 }
 0x855   : > { %v1423_v25 = vsub.f32 %v1415_v11, %v1419_v24 }
 0x857   : > { %v1425_v26 = vmul.f32 1.442695, %v1423_v25 }
 0x858   : > { %v1422_v27 = vpop.xlane.xlu1 %1421 }
 0x859   : > { %4400 = vpow2.f32 %v1425_v26  ;;  %v1424_v28 = vsub.f32 %v1416_v62, %v1422_v27 }
 0x85b   : > { %v1427_v44 = vmul.f32 1.442695, %v1424_v28 }
 0x85d   : > { %4402 = vpow2.f32 %v1427_v44 }
 0x863   : > { %v4401_v29 = vpop.eup %4400 }
 0x864   : > { %v1429_v42 = vsel %vm834_vm3, %v4401_v29, 0.0 }
 0x865   : > { %1430 = vadd.xlane.f32.xlu1 %v1429_v42 }
 0x867   : > { %v4403_v30 = vpop.eup %4402 }
 0x868   : > { %v1432_v31 = vsel %vm834_vm3, %v4403_v30, 0.0 }
 0x869   : > { %1433 = vadd.xlane.f32.xlu0 %v1432_v31 }
 0x8f2   : > { %v1431_v33 = vpop.xlane.xlu1 %1430 }
 0x8f3   : > { %4404 = vrcp.f32 %v1431_v33 }
 0x8f6   : > { %v1434_v35 = vpop.xlane.xlu0 %1433 }
 0x8f7   : > { %4406 = vrcp.f32 %v1434_v35 }
 0x8fd   : > { %v4405_v36 = vpop.eup %4404 }
 0x8fe   : > { %v1437_v56 = vmul.f32 %v4405_v36, %v4401_v29 }
 0x900   : > { %v1439_v37 = vmul.f32 %v1437_v56, %v4771_v21 }
 0x901   : > { %v4407_v54 = vpop.eup %4406 }
 0x902   : > { %v1438_v39 = vmul.f32 %v4407_v54, %v4403_v30  ;;  %1441 = vxpose.xlu1.b32.start [1/2] (short) (narrow) %v1439_v37, 16  ;;  %v1475_v48 = vsel %vm4942_vm11, %v1439_v37, 0.0 }
 0x904   : > { %v1440_v45 = vmul.f32 %v1438_v39, %v4781_v32 }
 0x906   : > { %1442 = vxpose.xlu1.b32.end [2/2] (short) (narrow) %v1440_v45, 16  ;;  %v1476_v55 = vsel %vm4952_vm12, %v1440_v45, 0.0 }
 0x982   : > { %v1457_v46 = vpop.trf.xlu1 }
 0x983   : > { %v1473_v47 = vadd.f32 %v1457_v46, %v1439_v37 }
 0x985   : > { %v1477_v49 = vsub.f32 %v1473_v47, %v1475_v48 }
 0x986   : > { %v1458_v50 = vpop.trf.xlu1 }
 0x987   : > { %v1479_v53 = vmul.f32 2.0, %v1477_v49  ;;  %v1474_v63 = vadd.f32 %v1458_v50, %v1440_v45 }
 0x989   : > { %v1478_v57 = vsub.f32 %v1474_v63, %v1476_v55  ;;  %v1481_v10 = vadd.f32 %v1479_v53, %v4963_v4 }
 0x98b   : > { %v1480_v59 = vmul.f32 2.0, %v1478_v57  ;;  %v1483_v9 = vmul.f32 0.01, %v1481_v10 }
 0x98d   : > { %v1485_v60 = vsub.f32 %v1439_v37, %v1483_v9  ;;  %v1482_v16 = vadd.f32 %v1480_v59, %v4968_v58 }
 0x98f   : > { %v1487_v0 = vsel %vm834_vm3, %v1485_v60, -inf  ;;  %v1484_v3 = vmul.f32 0.01, %v1482_v16 }
 0x990   : > { %1488 = vmax.xlane.f32.xlu0 %v1487_v0 }
 0x991   : > { %v1486_v5 = vsub.f32 %v1440_v45, %v1484_v3 }
 0x993   : > { %v1490_v6 = vsel %vm834_vm3, %v1486_v5, -inf }
 0x994   : > { %1491 = vmax.xlane.f32.xlu0 %v1490_v6 }
 0xa1d   : > { %v1489_v7 = vpop.xlane.xlu0 %1488 }
 0xa1e   : > { %v1493_v19 = vsub.f32 %v1485_v60, %v1489_v7 }
 0xa20   : > { %v1495_v8 = vmul.f32 1.442695, %v1493_v19 }
 0xa21   : > { %v1492_v61 = vpop.xlane.xlu0 %1491 }
 0xa22   : > { %4408 = vpow2.f32 %v1495_v8  ;;  %v1494_v11 = vsub.f32 %v1486_v5, %v1492_v61 }
 0xa24   : > { %v1497_v15 = vmul.f32 1.442695, %v1494_v11 }
 0xa26   : > { %4410 = vpow2.f32 %v1497_v15 }
 0xa2c   : > { %v4409_v20 = vpop.eup %4408 }
 0xa2d   : > { %v1499_v22 = vsel %vm834_vm3, %v4409_v20, 0.0 }
 0xa2e   : > { %1500 = vadd.xlane.f32.xlu0 %v1499_v22 }
 0xa30   : > { %v4411_v62 = vpop.eup %4410 }
 0xa31   : > { %v1502_v23 = vsel %vm834_vm3, %v4411_v62, 0.0 }
 0xa32   : > { %1503 = vadd.xlane.f32.xlu0 %v1502_v23 }
 0xabb   : > { %v1501_v24 = vpop.xlane.xlu0 %1500 }
 0xabc   : > { %4412 = vrcp.f32 %v1501_v24 }
 0xabf   : > { %v1504_v25 = vpop.xlane.xlu0 %1503 }
 0xac0   : > { %4414 = vrcp.f32 %v1504_v25 }
 0xac6   : > { %v4413_v26 = vpop.eup %4412 }
 0xac7   : > { %v1507_v27 = vmul.f32 %v4413_v26, %v4409_v20 }
 0xac9   : > { %v1509_v28 = vmul.f32 %v1507_v27, %v4771_v21 }
 0xaca   : > { %v4415_v44 = vpop.eup %4414 }
 0xacb   : > { %v1508_v29 = vmul.f32 %v4415_v44, %v4411_v62  ;;  %1511 = vxpose.xlu0.b32.start [1/2] (short) (narrow) %v1509_v28, 16  ;;  %v1545_v33 = vsel %vm4942_vm11, %v1509_v28, 0.0 }
 0xacd   : > { %v1510_v42 = vmul.f32 %v1508_v29, %v4781_v32 }
 0xacf   : > { %1512 = vxpose.xlu0.b32.end [2/2] (short) (narrow) %v1510_v42, 16  ;;  %v1546_v54 = vsel %vm4952_vm12, %v1510_v42, 0.0 }
 0xb4b   : > { %v1527_v30 = vpop.trf.xlu0 }
 0xb4c   : > { %v1543_v31 = vadd.f32 %v1527_v30, %v1509_v28 }
 0xb4e   : > { %v1547_v35 = vsub.f32 %v1543_v31, %v1545_v33 }
 0xb4f   : > { %v1528_v36 = vpop.trf.xlu0 }
 0xb50   : > { %v1549_v56 = vmul.f32 2.0, %v1547_v35  ;;  %v1544_v37 = vadd.f32 %v1528_v36, %v1510_v42 }
 0xb52   : > { %v1548_v39 = vsub.f32 %v1544_v37, %v1546_v54  ;;  %v1551_v45 = vadd.f32 %v1549_v56, %v4963_v4 }
 0xb54   : > { %v1550_v46 = vmul.f32 2.0, %v1548_v39  ;;  %v1553_v47 = vmul.f32 0.01, %v1551_v45 }
 0xb56   : > { %v1555_v48 = vsub.f32 %v1509_v28, %v1553_v47  ;;  %v1552_v49 = vadd.f32 %v1550_v46, %v4968_v58 }
 0xb58   : > { %v1557_v50 = vsel %vm834_vm3, %v1555_v48, -inf  ;;  %v1554_v53 = vmul.f32 0.01, %v1552_v49 }
 0xb59   : > { %1558 = vmax.xlane.f32.xlu1 %v1557_v50 }
 0xb5a   : > { %v1556_v63 = vsub.f32 %v1510_v42, %v1554_v53 }
 0xb5c   : > { %v1560_v55 = vsel %vm834_vm3, %v1556_v63, -inf }
 0xb5d   : > { %1561 = vmax.xlane.f32.xlu0 %v1560_v55 }
 0xbe6   : > { %v1559_v57 = vpop.xlane.xlu1 %1558 }
 0xbe7   : > { %v1563_v10 = vsub.f32 %v1555_v48, %v1559_v57 }
 0xbe9   : > { %v1565_v59 = vmul.f32 1.442695, %v1563_v10 }
 0xbea   : > { %v1562_v9 = vpop.xlane.xlu0 %1561 }
 0xbeb   : > { %4416 = vpow2.f32 %v1565_v59  ;;  %v1564_v60 = vsub.f32 %v1556_v63, %v1562_v9 }
 0xbed   : > { %v1567_v16 = vmul.f32 1.442695, %v1564_v60 }
 0xbef   : > { %4418 = vpow2.f32 %v1567_v16 }
 0xbf5   : > { %v4417_v0 = vpop.eup %4416 }
 0xbf6   : > { %v1569_v3 = vsel %vm834_vm3, %v4417_v0, 0.0 }
 0xbf7   : > { %1570 = vadd.xlane.f32.xlu1 %v1569_v3 }
 0xbf9   : > { %v4419_v5 = vpop.eup %4418 }
 0xbfa   : > { %v1572_v6 = vsel %vm834_vm3, %v4419_v5, 0.0 }
 0xbfb   : > { %1573 = vadd.xlane.f32.xlu1 %v1572_v6 }
 0xc84   : > { %v1571_v7 = vpop.xlane.xlu1 %1570 }
 0xc85   : > { %4420 = vrcp.f32 %v1571_v7 }
 0xc88   : > { %v1574_v19 = vpop.xlane.xlu1 %1573 }
 0xc89   : > { %4422 = vrcp.f32 %v1574_v19 }
 0xc8f   : > { %v4421_v8 = vpop.eup %4420 }
 0xc90   : > { %v1577_v61 = vmul.f32 %v4421_v8, %v4417_v0 }
 0xc92   : > { %v1579_v11 = vmul.f32 %v1577_v61, %v4771_v21 }
 0xc93   : > { %v4423_v15 = vpop.eup %4422 }
 0xc94   : > { %v1578_v20 = vmul.f32 %v4423_v15, %v4419_v5  ;;  %1581 = vxpose.xlu1.b32.start [1/2] (short) (narrow) %v1579_v11, 16  ;;  %v1615_v24 = vsel %vm4942_vm11, %v1579_v11, 0.0  ;;  %v4563_v5 = vmov 0  }
 0xc96   : > { %v1580_v22 = vmul.f32 %v1578_v20, %v4781_v32 }
 0xc98   : > { %1582 = vxpose.xlu1.b32.end [2/2] (short) (narrow) %v1580_v22, 16  ;;  %v1616_v44 = vsel %vm4952_vm12, %v1580_v22, 0.0 }
 0xcb6   : > { %4376 = vset.pattern.permute.xlu1 %v4563_v5 }
 0xd14   : > { %v1597_v62 = vpop.trf.xlu1 }
 0xd15   : > { %v1613_v23 = vadd.f32 %v1597_v62, %v1579_v11 }
 0xd17   : > { %v1617_v25 = vsub.f32 %v1613_v23, %v1615_v24 }
 0xd18   : > { %v1598_v26 = vpop.trf.xlu1 }
 0xd19   : > { %v1619_v27 = vmul.f32 2.0, %v1617_v25  ;;  %v1614_v28 = vadd.f32 %v1598_v26, %v1580_v22 }
 0xd1b   : > { %v1618_v29 = vsub.f32 %v1614_v28, %v1616_v44  ;;  %v1621_v42 = vadd.f32 %v1619_v27, %v4963_v4  ;;  %v624_v44 = vld [vmem:[%s618_s20] sm:$0xff] }
 0xd1d   : > { %v1620_v30 = vmul.f32 2.0, %v1618_v29  ;;  %v1623_v31 = vmul.f32 0.01, %v1621_v42  ;;  %v4565_v29 = vmov 0.0   ;;  %v1810_v42 = vmul.f32 %v4800_v43, %v4786_v38 }
 0xd1e   : > { %4005 = vmatprep.mubr.msk.f32.mxu1 %vm4564_vm13, %v4565_v29 }
 0xd1f   : > { %v1625_v33 = vsub.f32 %v1579_v11, %v1623_v31  ;;  %v1622_v35 = vadd.f32 %v1620_v30, %v4968_v58  ;;  %v1812_v31 = vmul.f32 %v1810_v42, %v4786_v38 }
 0xd21   : > { %v1627_v36 = vsel %vm834_vm3, %v1625_v33, -inf  ;;  %v1624_v56 = vmul.f32 0.01, %v1622_v35  ;;  %v1814_v35 = vsel %vm811_vm2, %v1812_v31, 0.0 }
 0xd22   : > { %1628 = vmax.xlane.f32.xlu0 %v1627_v36 }
 0xd23   : > { %v1626_v37 = vsub.f32 %v1580_v22, %v1624_v56 }
 0xd25   : > { %v1630_v54 = vsel %vm834_vm3, %v1626_v37, -inf }
 0xd26   : > { %1631 = vmax.xlane.f32.xlu0 %v1630_v54 }
 0xdaf   : > { %v1629_v39 = vpop.xlane.xlu0 %1628 }
 0xdb0   : > { %v1633_v45 = vsub.f32 %v1625_v33, %v1629_v39 }
 0xdb2   : > { %v1635_v46 = vmul.f32 1.442695, %v1633_v45 }
 0xdb3   : > { %v1632_v47 = vpop.xlane.xlu0 %1631 }
 0xdb4   : > { %4424 = vpow2.f32 %v1635_v46  ;;  %v1634_v48 = vsub.f32 %v1626_v37, %v1632_v47 }
 0xdb6   : > { %v1637_v49 = vmul.f32 1.442695, %v1634_v48 }
 0xdb8   : > { %4426 = vpow2.f32 %v1637_v49 }
 0xdbe   : > { %v4425_v50 = vpop.eup %4424 }
 0xdbf   : > { %v1639_v53 = vsel %vm834_vm3, %v4425_v50, 0.0 }
 0xdc0   : > { %1640 = vadd.xlane.f32.xlu0 %v1639_v53 }
 0xdc2   : > { %v4427_v63 = vpop.eup %4426 }
 0xdc3   : > { %v1642_v55 = vsel %vm834_vm3, %v4427_v63, 0.0 }
 0xdc4   : > { %1643 = vadd.xlane.f32.xlu0 %v1642_v55 }
 0xe4d   : > { %v1641_v57 = vpop.xlane.xlu0 %1640 }
 0xe4e   : > { %4428 = vrcp.f32 %v1641_v57 }
 0xe51   : > { %v1644_v10 = vpop.xlane.xlu0 %1643 }
 0xe52   : > { %4430 = vrcp.f32 %v1644_v10  ;;  %v1937_v10 = vmul.f32 %v4790_v40, %v4790_v40 }
 0xe53   : > { %4432 = vtanh.f32 %v4756_v17 }
 0xe58   : > { %v4429_v59 = vpop.eup %4428 }
 0xe59   : > { %v1647_v9 = vmul.f32 %v4429_v59, %v4425_v50  ;;  %v1936_v59 = vmul.f32 %v4786_v38, %v4786_v38 }
 0xe5b   : > { %v1649_v60 = vmul.f32 %v1647_v9, %v4771_v21  ;;  %v1939_v9 = vsel %vm811_vm2, %v1937_v10, 0.0 }
 0xe5c   : > { %v4431_v16 = vpop.eup %4430 }
 0xe5d   : > { %v1648_v0 = vmul.f32 %v4431_v16, %v4427_v63  ;;  %1651 = vxpose.xlu0.b32.start [1/2] (short) (narrow) %v1649_v60, 16  ;;  %v1685_v19 = vsel %vm4942_vm11, %v1649_v60, 0.0  ;;  %v4433_v37 = vpop.eup %4432 }
 0xe5f   : > { %v1650_v3 = vmul.f32 %v1648_v0, %v4781_v32 }
 0xe61   : > { %1652 = vxpose.xlu0.b32.end [2/2] (short) (narrow) %v1650_v3, 16  ;;  %v1686_v21 = vsel %vm4952_vm12, %v1650_v3, 0.0 }
 0xedd   : > { %v1667_v6 = vpop.trf.xlu0 }
 0xede   : > { %v1683_v7 = vadd.f32 %v1667_v6, %v1649_v60 }
 0xee0   : > { %v1687_v8 = vsub.f32 %v1683_v7, %v1685_v19 }
 0xee1   : > { %v1668_v61 = vpop.trf.xlu0 }
 0xee2   : > { %v1689_v11 = vmul.f32 2.0, %v1687_v8  ;;  %v1684_v15 = vadd.f32 %v1668_v61, %v1650_v3  ;;  %v4492_v8 = vld [vmem:[%s4768_s19] sm:$0xff] }
 0xee4   : > { %v1688_v20 = vsub.f32 %v1684_v15, %v1686_v21  ;;  %v1691_v32 = vadd.f32 %v1689_v11, %v4963_v4  ;;  %v625_v4 = vld [vmem:[%s618_s20 + $0x8] sm:$0xff] }
 0xee6   : > { %v1690_v22 = vmul.f32 2.0, %v1688_v20  ;;  %v1693_v62 = vmul.f32 0.01, %v1691_v32  ;;  %v4493_v20 = vld [vmem:[%s4768_s19 + $0x8] sm:$0xff] }
 0xee8   : > { %v1695_v23 = vsub.f32 %v1649_v60, %v1693_v62  ;;  %v1692_v24 = vadd.f32 %v1690_v22, %v4968_v58  ;;  %v1811_v58 = vmul.f32 %v4794_v41, %v4790_v40 }
 0xeea   : > { %v1697_v25 = vsel %vm834_vm3, %v1695_v23, -inf  ;;  %v1694_v26 = vmul.f32 0.01, %v1692_v24  ;;  %v1813_v30 = vmul.f32 %v1811_v58, %v4790_v40 }
 0xeeb   : > { %1698 = vmax.xlane.f32.xlu1 %v1697_v25 }
 0xeec   : > { %v1696_v27 = vsub.f32 %v1650_v3, %v1694_v26  ;;  %v1815_v33 = vsel %vm811_vm2, %v1813_v30, 0.0 }
 0xeed   : > { %v1816_v36 = vadd.f32 %v1815_v33, %v1814_v35 }
 0xeee   : > { %v1700_v28 = vsel %vm834_vm3, %v1696_v27, -inf }
 0xeef   : > { %1701 = vmax.xlane.f32.xlu0 %v1700_v28 }
 0xefc   : > { %1991 = vperm.xlu1 %4376, %v624_v44  }
 0xf00   : > { %1996 = vperm.xlu1 %4376, %v625_v4  }
 0xf29   : > { %1831 = vxpose.xlu1.b32.start [1/2] (short) (narrow) %v4786_v38, 8 }
 0xf2d   : > { %1832 = vxpose.xlu1.b32.end [2/2] (short) (narrow) %v4790_v40, 8  ;;  %v5070_v40 = vpack.c.bf16 %v4747_v13, %v4745_v12 }
 0xf54   : > { %1817 = vadd.xlane.f32.xlu1 %v1816_v36 }
 0xf78   : > { %v1699_v56 = vpop.xlane.xlu1 %1698 }
 0xf79   : > { %v1703_v43 = vsub.f32 %v1695_v23, %v1699_v56 }
 0xf7b   : > { %v1705_v45 = vmul.f32 1.442695, %v1703_v43 }
 0xf7c   : > { %v5041_v54 = vpop.permute.xlu1 %1991  ;;  %v1702_v39 = vpop.xlane.xlu0 %1701 }
 0xf7d   : > { %v5044_v41 = vmul.f32 %v4433_v37, %v5041_v54  ;;  %v1704_v46 = vsub.f32 %v1696_v27, %v1702_v39  ;;  %4434 = vpow2.f32 %v1705_v45 }
 0xf7f   : > { %2024 = vrot.lane.b32.xlu0 %v5044_v41, %s4566_s24  ;;  %v1707_v47 = vmul.f32 1.442695, %v1704_v46 }
 0xf80   : > { %v5050_v53 = vpop.permute.xlu1 %1996 }
 0xf81   : > { %4436 = vpow2.f32 %v1707_v47 }
 0xf82   : > { %4438 = vtanh.f32 %v4758_v18  ;;  %v1938_v18 = vsel %vm811_vm2, %v1936_v59, 0.0  ;;  %vm2007_vm2 = vcmask 80912  }
 0xf83   : > { %v1940_v60 = vadd.f32 %v1939_v9, %v1938_v18 }
 0xf87   : > { %v4435_v48 = vpop.eup %4434 }
 0xf88   : > { %v1709_v17 = vsel %vm834_vm3, %v4435_v48, 0.0 }
 0xf8b   : > { %v4437_v49 = vpop.eup %4436 }
 0xf8c   : > { %v1712_v50 = vsel %vm834_vm3, %v4437_v49, 0.0  ;;  %v4439_v55 = vpop.eup %4438 }
 0xf8d   : > { %v5057_v57 = vmul.f32 %v4439_v55, %v5050_v53  ;;  %v2008_v55 = vsel %vm2007_vm2, %v5044_v41, 0.0 }
 0xf9e   : > { %1710 = vadd.xlane.f32.xlu0 %v1709_v17 }
 0xfa2   : > { %1713 = vadd.xlane.f32.xlu0 %v1712_v50 }
 0xfa9   : > { %v1847_v63 = vpop.trf.xlu1 }
 0xfaa   : > { %4006 = vmatmul.mubr.msk.f32.vlgmr.msra.gmra.mrb[4].mxu1 %vm834_vm3, %v1847_v63  ;;  %v2009_v63 = vsel %vm2007_vm2, %v5057_v57, 0.0 }
 0xfab   : > { %4019 = vmatprep.mubr.msk.f32.mxu1 %vm4564_vm13, %v4565_v29  ;;  %v2010_v10 = vadd.f32 %v2009_v63, %v2008_v55 }
 0xfad   : > { %v2011_v59 = vrot.slane %v2010_v10, 4 }
 0xfaf   : > { %v2012_v9 = vadd.f32 %v2011_v59, %v2010_v10 }
 0xfb1   : > { %v2013_v18 = vrot.slane %v2012_v9, 2 }
 0xfb8   : > { %2026 = vrot.lane.b32.xlu0 %v5057_v57, %s4566_s24 }
 0xfd7   : > { %1801 = vadd.xlane.f32.xlu0 %v4888_v34 }
 0xfdb   : > { %1941 = vadd.xlane.f32.xlu0 %v1940_v60  ;;  %v2014_v60 = vadd.f32 %v2013_v18, %v2012_v9 }
 0xfe1   : > { %v1818_v62 = vpop.xlane.xlu1 %1817 }
 0xfe2   : > { %v1819_v23 = vrot.slane %v1818_v62, 4 }
 0xfe4   : > { %v1820_v24 = vadd.f32 %v1819_v23, %v1818_v62 }
 0xfe6   : > { %v1821_v25 = vrot.slane %v1820_v24, 2 }
 0xfe8   : > { %v1822_v44 = vadd.f32 %v1821_v25, %v1820_v24 }
 0xfea   : > { %v1823_v42 = vrot.slane %v1822_v44, 1 }
 0xfec   : > { %v1824_v33 = vadd.f32 %v1823_v42, %v1822_v44 }
 0xff1   : > { %v2025_v16 = vpop.permute.xlu0 %2024 }
0x102b   : > { %v1711_v0 = vpop.xlane.xlu0 %1710 }
0x102c   : > { %4440 = vrcp.f32 %v1711_v0 }
0x102f   : > { %v1714_v3 = vpop.xlane.xlu0 %1713 }
0x1030   : > { %4442 = vrcp.f32 %v1714_v3 }
0x1033   : > { %v2027_v6 = vpop.permute.xlu0 %2026 }
0x1034   : > { %v4169_v7 = vpack.c.bf16 %v2027_v6, %v2025_v16 }
0x1036   : > { %v4441_v34 = vpop.eup %4440  ;;  %4170 = vmatprep.subr.bf16.mxu0 %v4169_v7  ;;  %4175 = vmatpush3.bf16.msra.mxu1 %v4169_v7 }
0x1037   : > { %4172 = vmatpush3.bf16.msra.mxu0 %v4169_v7  ;;  %4183 = vmatprep.subr.bf16.mxu1 %v5070_v40  ;;  %v1717_v19 = vmul.f32 %v4441_v34, %v4435_v48 }
0x1038   : > { %4178 = vmatprep.subr.msk.bf16.mxu0 %vm5074_vm14, %v4169_v7 }
0x1039   : > { %v5082_v61 = vmul.f32 %v4492_v8, %v1717_v19 }
0x103a   : > { %v4443_v11 = vpop.eup %4442 }
0x103b   : > { %v1718_v15 = vmul.f32 %v4443_v11, %v4437_v49  ;;  %4012 = vmatprep.mubr.msk.f32.mxu0 %vm834_vm3, %v5082_v61  ;;  %v2001_v21 = vsel %vm834_vm3, %v5082_v61, 0.0 }
0x103c   : > { %2002 = vadd.xlane.f32.xlu1 %v2001_v21 }
0x103d   : > { %v5089_v32 = vmul.f32 %v4493_v20, %v1718_v15 }
0x103f   : > { %4013 = vmatmul.mubr.msk.f32.vlgmr.msra.gmra.mrb[8].mxu0 %vm834_vm3, %v5089_v32  ;;  %v2004_v22 = vsel %vm834_vm3, %v5089_v32, 0.0 }
0x1040   : > { %2005 = vadd.xlane.f32.xlu1 %v2004_v22  ;;  %4181 = vmatpush3.bf16.xpose.msk.msra.mxu0 %vm5074_vm14, %v4169_v7  ;;  %vm3667_vm14 = vcmp.eq.s32.totalorder %v4939_v51, 2 }
0x1041   : > { %4026 = vmatprep.mubr.msk.f32.mxu0 %vm636_vm0, %v2025_v16 }
0x1047   : > { %4027 = vmatmul.mubr.msk.f32.vlgmr.msra.gmra.mrb[10].mxu0 %vm636_vm0, %v2027_v6 }
0x1064   : > { %v1802_v26 = vpop.xlane.xlu0 %1801 }
0x1065   : > { %v1803_v27 = vrot.slane %v1802_v26, 4 }
0x1067   : > { %v1804_v28 = vadd.f32 %v1803_v27, %v1802_v26 }
0x1068   : > { %v1942_v43 = vpop.xlane.xlu0 %1941 }
0x1069   : > { %v1805_v4 = vrot.slane %v1804_v28, 2  ;;  %v1943_v39 = vrot.slane %v1942_v43, 4 }
0x106b   : > { %v1806_v58 = vadd.f32 %v1805_v4, %v1804_v28  ;;  %v1944_v45 = vadd.f32 %v1943_v39, %v1942_v43 }
0x106d   : > { %v1807_v30 = vrot.slane %v1806_v58, 1  ;;  %v1945_v46 = vrot.slane %v1944_v45, 2 }
0x106f   : > { %v1808_v31 = vadd.f32 %v1807_v30, %v1806_v58  ;;  %v1946_v48 = vadd.f32 %v1945_v46, %v1944_v45 }
0x1071   : > { %4268 = vpush %v1808_v31  ;;  %v1947_v17 = vrot.slane %v1946_v48, 1 }
0x1072   : > { %4270 = vpush %v1824_v33 }
0x1073   : > { %v1948_v50 = vadd.f32 %v1947_v17, %v1946_v48 }
0x107d   : > { %v1932_v35 = vpop.f32.mrb[4].mxu1 }
0x107e   : > { %v1950_v36 = vmul.f32 %v1932_v35, %v1932_v35  ;;  %v4007_v56 = vpop.f32.mrb[5].mxu1 }
0x1080   : > { %v1952_v37 = vsel %vm1951_vm15, %v1950_v36, 0.0  ;;  %vm3670_vm15 = vcmp.eq.s32.totalorder %v4939_v51, 3 }
0x1081   : > { %1953 = vadd.xlane.f32.xlu0 %v1952_v37 }
0x10a2   : > { %s5099_s19 = spop %4268 }
0x10a3   : > { %s4271_s21 = spop %4270 }
0x10a4   : > { %v1826_v47 = vstv %s4271_s21 }
0x10a5   : > { %4444 = vrcp.f32 %v1826_v47 }
0x10ae   : > { %2170 = vxpose.xlu0.b32.start [1/2] (short) (narrow) %v2025_v16, 8  ;;  %v2015_v16 = vrot.slane %v2014_v60, 1 }
0x10af   : > { %v4445_v49 = vpop.eup %4444 }
0x10b0   : > { %4272 = vpush %v4445_v49 }
0x10b1   : > { %4274 = vpush %v1948_v50 }
0x10b2   : > { %2171 = vxpose.xlu0.b32.end [2/2] (short) (narrow) %v2027_v6, 8  ;;  %v2016_v6 = vadd.f32 %v2015_v16, %v2014_v60 }
0x10b4   : > { %v2019_v15 = vmul.f32 1e-15, %v2016_v6 }
0x10c9   : > { %v5107_v3 = vpop.xlane.xlu1 %2002 }
0x10ca   : > { %v2017_v34 = vmul.f32 %v5107_v3, %v5044_v41 }
0x10cc   : > { %v2020_v20 = vadd.f32 %v2019_v15, %v2017_v34 }
0x10cd   : > { %v5121_v30 = vpop.xlane.xlu1 %2005 }
0x10ce   : > { %v2143_v24 = vmul.f32 %v2020_v20, %v5044_v41  ;;  %v2018_v31 = vmul.f32 %v5121_v30, %v5057_v57 }
0x10e1   : > { %s5101_s3 = spop %4272 }
0x10e2   : > { %s5119_s1 = spop %4274 }
0x10e3   : > { %s1971_s20 = smul.f32 1.4142135, %s5119_s1 }
0x110e   : > { %v1954_v0 = vpop.xlane.xlu0 %1953 }
0x110f   : > { %v1955_v7 = vrot.slane %v1954_v0, 4 }
0x1111   : > { %v1956_v38 = vadd.f32 %v1955_v7, %v1954_v0 }
0x1112   : > { %v4014_v19 = vpop.f32.mrb[8].mxu0 }
0x1113   : > { %v1957_v8 = vrot.slane %v1956_v38, 2  ;;  %v2102_v11 = vpop.f32.mrb[9].mxu0 }
0x1114   : > { %2113 = vrot.lane.b32.xlu1 %v2102_v11, %s4567_s23 }
0x1115   : > { %v1958_v21 = vadd.f32 %v1957_v8, %v1956_v38  ;;  %v2276_v8 = vmul.f32 %v5057_v57, %v5057_v57 }
0x1117   : > { %v1959_v22 = vrot.slane %v1958_v21, 1 }
0x1118   : > { %2115 = vrot.lane.b32.xlu1 %v4014_v19, %s4567_s23  ;;  %v2275_v19 = vmul.f32 %v5044_v41, %v5044_v41 }
0x1119   : > { %v1960_v62 = vadd.f32 %v1959_v22, %v1958_v21 }
0x111a   : > { %v5111_v23 = vpop.f32.mrb[10].mxu0 }
0x111b   : > { %4276 = vpush %v1960_v62  ;;  %v5114_v25 = vpop.f32.mrb[11].mxu0 }
0x111c   : > { %2147 = vrot.lane.b32.xlu1 %v2143_v24, %s4566_s24 }
0x112e   : > { %v2186_v26 = vpop.trf.xlu0 }
0x112f   : > { %4020 = vmatmul.mubr.msk.f32.vlgmr.msra.gmra.mrb[6].mxu1 %vm834_vm3, %v2186_v26 }
0x1130   : > { %4185 = vmatpush3.bf16.msra.mxu1 %v5070_v40  ;;  %v2021_v40 = vadd.f32 %v2019_v15, %v2018_v31 }
0x1132   : > { %v2144_v45 = vmul.f32 %v2021_v40, %v5057_v57 }
0x114c   : > { %s4277_s25 = spop %4276 }
0x114d   : > { %v1962_v27 = vstv %s4277_s25 }
0x114e   : > { %4446 = vrsqrt.f32 %v1962_v27  ;;  %vm1965_vm4 = vcmp.eq.f32.partialorder %v1962_v27, inf  ;;  %v1968_v44 = vand.u32 2147483648, %v1962_v27  ;;  %vm1967_vm5 = vcmp.eq.f32.partialorder %v1962_v27, 0.0 }
0x1158   : > { %v4447_v28 = vpop.eup %4446 }
0x1159   : > { %v1964_v4 = vmul.f32 %v4447_v28, %v1962_v27 }
0x115b   : > { %v1966_v58 = vsel %vm1965_vm4, %v1962_v27, %v1964_v4 }
0x115c   : > { %v1969_v42 = vsel %vm1967_vm5, %v1968_v44, %v1966_v58 }
0x115d   : > { %4278 = vpush %v1969_v42 }
0x1186   : > { %v2114_v33 = vpop.permute.xlu1 %2113 }
0x1187   : > { %v2119_v56 = vsub.f32 %v2020_v20, %v2114_v33  ;;  %v2326_v33 = vsel %vm1101_vm10, %v5121_v30, 0.0 }
0x1189   : > { %v2121_v39 = vmul.f32 %v2119_v56, %v5044_v41 }
0x118a   : > { %v2116_v35 = vpop.permute.xlu1 %2115 }
0x118b   : > { %v2120_v36 = vsub.f32 %v2021_v40, %v2116_v35 }
0x118d   : > { %v2122_v37 = vmul.f32 %v2120_v36, %v5057_v57  ;;  %v2325_v36 = vsel %vm1101_vm10, %v5107_v3, 0.0  ;;  %vm3664_vm10 = vcmp.eq.s32.totalorder %v4939_v51, 1 }
0x118e   : > { %s4279_s26 = spop %4278  ;;  %v2148_v55 = vpop.permute.xlu1 %2147 }
0x118f   : > { %v1972_v43 = vstv %s4279_s26  ;;  %2127 = vrot.lane.b32.xlu1 %v2122_v37, %s4566_s24  ;;  %v2153_v6 = vsel %vm636_vm0, %v2148_v55, 0.0  ;;  %v2327_v37 = vadd.f32 %v2326_v33, %v2325_v36 }
0x1190   : > { %4448 = vrcp.f32 %v1972_v43 }
0x1193   : > { %2125 = vrot.lane.b32.xlu1 %v2121_v39, %s4566_s24 }
0x1197   : > { %2149 = vrot.lane.b32.xlu1 %v2144_v45, %s4566_s24 }
0x119a   : > { %v4449_v46 = vpop.eup %4448 }
0x119b   : > { %4280 = vpush %v4449_v46 }
0x11cc   : > { %s4281_s21 = spop %4280 }
0x11cd   : > { %s1975_s23 = smul.f32 %s4281_s21, %s1971_s20 }
0x11cf   : > { %s1976_s25 = ssub.f32 2.0, %s1975_s23 }
0x11d1   : > { %s1977_s26 = smax.f32 %s5484_s29, %s1976_s25 }
0x11d2   : > { %v1978_v47 = vstv %s1977_s26 }
0x11d3   : > { %4450 = vrsqrt.f32 %v1978_v47  ;;  %vm1981_vm6 = vcmp.eq.f32.partialorder %v1978_v47, inf  ;;  %v1984_v49 = vand.u32 2147483648, %v1978_v47  ;;  %vm1983_vm7 = vcmp.eq.f32.partialorder %v1978_v47, 0.0 }
0x11dd   : > { %v4451_v48 = vpop.eup %4450 }
0x11de   : > { %v1980_v17 = vmul.f32 %v4451_v48, %v1978_v47 }
0x11e0   : > { %v1982_v50 = vsel %vm1981_vm6, %v1978_v47, %v1980_v17 }
0x11e1   : > { %v1985_v63 = vsel %vm1983_vm7, %v1984_v49, %v1982_v50  ;;  %vm2591_vm7 = vcmask 523264  }
0x11e2   : > { %4282 = vpush %v1985_v63 }
0x1201   : > { %v2128_v10 = vpop.permute.xlu1 %2127 }
0x1202   : > { %v2271_v59 = vpop.f32.mrb[6].mxu1  ;;  %v2132_v60 = vsel %vm636_vm0, %v2128_v10, 0.0 }
0x1203   : > { %v4021_v9 = vpop.f32.mrb[7].mxu1  ;;  %v2297_v11 = vmul.f32 %v2271_v59, %v2271_v59 }
0x1205   : > { %v2126_v18 = vpop.permute.xlu1 %2125  ;;  %v2298_v15 = vsel %vm636_vm0, %v2297_v11, 0.0 }
0x1206   : > { %v2131_v16 = vsel %vm636_vm0, %v2126_v18, 0.0 }
0x1207   : > { %v2133_v0 = vadd.f32 %v2132_v60, %v2131_v16 }
0x1209   : > { %v2150_v7 = vpop.permute.xlu1 %2149  ;;  %2134 = vadd.xlane.f32.xlu0 %v2133_v0 }
0x120a   : > { %v2154_v38 = vsel %vm636_vm0, %v2150_v7, 0.0 }
0x120b   : > { %v2155_v34 = vadd.f32 %v2154_v38, %v2153_v6 }
0x120d   : > { %2156 = vadd.xlane.f32.xlu1 %v2155_v34 }
0x1213   : > { %s5154_s1 = spop %4282 }
0x121e   : > { %2279 = vrot.lane.b32.xlu1 %v2275_v19, %s4566_s24 }
0x121f   : > { %2281 = vrot.lane.b32.xlu0 %v2276_v8, %s4566_s24  ;;  %s5482_s24 = smov 32  }
0x123e   : > { %2299 = vadd.xlane.f32.xlu0 %v2298_v15 }
0x1296   : > { %v2135_v21 = vpop.xlane.xlu0 %2134 }
0x1297   : > { %v2136_v20 = vrot.slane %v2135_v21, 4 }
0x1299   : > { %v2137_v22 = vadd.f32 %v2136_v20, %v2135_v21  ;;  %v2576_v20 = vld [vmem:[%s5466_s7] sm:$0xff] }
0x129a   : > { %v2157_v62 = vpop.xlane.xlu1 %2156  ;;  %v2282_v24 = vpop.permute.xlu0 %2281 }
0x129b   : > { %v2138_v26 = vrot.slane %v2137_v22, 2  ;;  %v2158_v27 = vrot.slane %v2157_v62, 4  ;;  %v2286_v41 = vsel %vm636_vm0, %v2282_v24, 0.0 }
0x129c   : > { %2419 = vadd.xlane.f32.xlu0 %v2286_v41 }
0x129d   : > { %v2159_v28 = vadd.f32 %v2158_v27, %v2157_v62  ;;  %v2139_v57 = vadd.f32 %v2138_v26, %v2137_v22  ;;  %v2577_v22 = vld [vmem:[%s5466_s7 + $0x8] sm:$0xff] }
0x129e   : > { %v2280_v44 = vpop.permute.xlu1 %2279  ;;  %v5174_v62 = vpack.c.bf16 %v2577_v22, %v2576_v20 }
0x129f   : > { %v2160_v4 = vrot.slane %v2159_v28, 2  ;;  %v2285_v58 = vsel %vm636_vm0, %v2280_v44, 0.0  ;;  %v2140_v42 = vrot.slane %v2139_v57, 1 }
0x12a0   : > { %v2287_v31 = vadd.f32 %v2286_v41, %v2285_v58  ;;  %4187 = vmatprep.subr.bf16.mxu1 %v5174_v62 }
0x12a1   : > { %v2141_v40 = vadd.f32 %v2140_v42, %v2139_v57  ;;  %v2161_v35 = vadd.f32 %v2160_v4, %v2159_v28  ;;  %v3665_v28 = vstv %s5154_s1 }
0x12a2   : > { %2288 = vadd.xlane.f32.xlu1 %v2287_v31 }
0x12a3   : > { %4284 = vpush %v2141_v40  ;;  %v2162_v56 = vrot.slane %v2161_v35, 1 }
0x12a5   : > { %v2163_v43 = vadd.f32 %v2162_v56, %v2161_v35 }
0x12a6   : > { %2328 = vadd.xlane.f32.xlu1 %v2327_v37 }
0x12a7   : > { %4286 = vpush %v2163_v43  ;;  %v2459_v43 = vmul.f32 2.0, %v5114_v25 }
0x12aa   : > { %2417 = vadd.xlane.f32.xlu1 %v2285_v58 }
0x12b2   : > { %2568 = vrot.lane.b32.xlu0 %v4745_v12, %s5482_s24 }
0x12b6   : > { %2570 = vrot.lane.b32.xlu0 %v4747_v13, %s5482_s24 }
0x12cb   : > { %v2300_v39 = vpop.xlane.xlu0 %2299 }
0x12cc   : > { %v2301_v45 = vrot.slane %v2300_v39, 4 }
0x12ce   : > { %v2302_v46 = vadd.f32 %v2301_v45, %v2300_v39 }
0x12d0   : > { %v2303_v47 = vrot.slane %v2302_v46, 2 }
0x12d2   : > { %v2304_v50 = vadd.f32 %v2303_v47, %v2302_v46 }
0x12d4   : > { %s5156_s20 = spop %4284  ;;  %v2305_v10 = vrot.slane %v2304_v50, 1 }
0x12d6   : > { %v2306_v60 = vadd.f32 %v2305_v10, %v2304_v50 }
0x12d8   : > { %s4287_s21 = spop %4286 }
0x12d9   : > { %s2165_s23 = sadd.f32 1e-15, %s4287_s21 }
0x12db   : > { %v2166_v3 = vstv %s2165_s23 }
0x12dc   : > { %4452 = vrcp.f32 %v2166_v3  ;;  %v2460_v3 = vmul.f32 2.0, %v5111_v23 }
0x12e6   : > { %v4453_v30 = vpop.eup %4452 }
0x12e7   : > { %4288 = vpush %v4453_v30 }
0x1318   : > { %s5164_s25 = spop %4288 }
0x1319   : > { %s2169_s27 = smul.f32 %s5164_s25, %s5156_s20 }
0x131b   : > { %v3668_v44 = vstv %s2169_s27 }
0x1329   : > { %v5161_v18 = vpop.xlane.xlu0 %2419 }
0x132f   : > { %v2289_v48 = vpop.xlane.xlu1 %2288 }
0x1330   : > { %v2290_v17 = vrot.slane %v2289_v48, 4 }
0x1332   : > { %v2291_v12 = vadd.f32 %v2290_v17, %v2289_v48 }
0x1333   : > { %v2329_v49 = vpop.xlane.xlu1 %2328 }
0x1334   : > { %v2292_v13 = vrot.slane %v2291_v12, 2  ;;  %v2330_v19 = vrot.slane %v2329_v49, 4 }
0x1336   : > { %v2293_v63 = vadd.f32 %v2292_v13, %v2291_v12  ;;  %v2331_v8 = vadd.f32 %v2330_v19, %v2329_v49  ;;  %v2673_v19 = vld [vmem:[%s5468_s9] sm:$0xff] }
0x1337   : > { %v5158_v55 = vpop.xlane.xlu1 %2417 }
0x1338   : > { %2421 = vxpose.xlu1.b32.start [1/2] (short) (narrow) %v5158_v55, 8  ;;  %v2294_v59 = vrot.slane %v2293_v63, 1  ;;  %v2332_v11 = vrot.slane %v2331_v8, 2 }
0x133a   : > { %v2295_v9 = vadd.f32 %v2294_v59, %v2293_v63  ;;  %v2333_v21 = vadd.f32 %v2332_v11, %v2331_v8  ;;  %v2674_v8 = vld [vmem:[%s5468_s9 + $0x8] sm:$0xff] }
0x133b   : > { %v4202_v11 = vpack.c.bf16 %v2674_v8, %v2673_v19 }
0x133c   : > { %4290 = vpush %v2295_v9  ;;  %2422 = vxpose.xlu1.b32.end [2/2] (short) (narrow) %v5161_v18, 8  ;;  %v2334_v24 = vrot.slane %v2333_v21, 1  ;;  %v2578_v9 = vld [vmem:[%s5466_s7 + $0x10] sm:$0xff] }
0x133d   : > { %4292 = vpush %v2306_v60  ;;  %4203 = vmatprep.subr.bf16.mxu0 %v4202_v11 }
0x133e   : > { %v2335_v27 = vadd.f32 %v2334_v24, %v2333_v21  ;;  %4205 = vmatpush3.bf16.msra.mxu0 %v4202_v11 }
0x136d   : > { %s5166_s26 = spop %4290 }
0x136e   : > { %s4293_s21 = spop %4292  ;;  %s2317_s6 = smul.f32 2.0, %s5166_s26 }
0x136f   : > { %v2308_v16 = vstv %s4293_s21 }
0x1370   : > { %4454 = vrsqrt.f32 %v2308_v16  ;;  %vm2311_vm0 = vcmp.eq.f32.partialorder %v2308_v16, inf  ;;  %v2314_v6 = vand.u32 2147483648, %v2308_v16  ;;  %vm2313_vm8 = vcmp.eq.f32.partialorder %v2308_v16, 0.0 }
0x137a   : > { %v4455_v0 = vpop.eup %4454 }
0x137b   : > { %v2310_v7 = vmul.f32 %v4455_v0, %v2308_v16 }
0x137d   : > { %v2312_v38 = vsel %vm2311_vm0, %v2308_v16, %v2310_v7  ;;  %v2580_v7 = vld [vmem:[%s5466_s7 + $0x20] sm:$0xff] }
0x137e   : > { %v2315_v34 = vsel %vm2313_vm8, %v2314_v6, %v2312_v38  ;;  %v2581_v6 = vld [vmem:[%s5466_s7 + $0x28] sm:$0xff]  ;;  %v2583_v38 = vld [vmem:[%s5466_s7 + $0x38] sm:$0xff] }
0x137f   : > { %4294 = vpush %v2315_v34 }
0x13b0   : > { %s4295_s23 = spop %4294 }
0x13b1   : > { %v2318_v15 = vstv %s4295_s23  ;;  %s5518_s23 = smul.f32 %s5101_s3, %s5099_s19 }
0x13b2   : > { %4456 = vrcp.f32 %v2318_v15  ;;  %v2569_v15 = vpop.permute.xlu0 %2568 }
0x13b3   : > { %s1830_s5 = ssub.f32 0.0, %s5518_s23 }
0x13b5   : > { %v3662_v41 = vstv %s1830_s5 }
0x13b6   : > { %v3663_v4 = vsel %vm3661_vm9, %v3662_v41, 0.0  ;;  %v2571_v22 = vpop.permute.xlu0 %2570 }
0x13b7   : > { %v3666_v58 = vsel %vm3664_vm10, %v3665_v28, %v3663_v4  ;;  %v3831_v28 = vld [vmem:[%s5467_s8] ss:$0 sm:$0xff] }
0x13b8   : > { %v3669_v42 = vsel %vm3667_vm14, %v3668_v44, %v3666_v58  ;;  %v2437_v35 = vpop.trf.xlu1 }
0x13b9   : > { %v2456_v36 = vrot.slane %v2437_v35, %v4931_v1  ;;  %v3834_v35 = vld [vmem:[%s5469_s10] ss:$0 sm:$0xff] }
0x13bb   : > { %v2457_v56 = vadd.f32 %v2456_v36, %v5158_v55  ;;  %v2458_v37 = vadd.f32 %v2456_v36, %v5161_v18  ;;  %v2579_v18 = vld [vmem:[%s5466_s7 + $0x18] sm:$0xff] }
0x13bc   : > { %v4457_v26 = vpop.eup %4456  ;;  %v4190_v0 = vpack.c.bf16 %v2579_v18, %v2578_v9 }
0x13bd   : > { %4296 = vpush %v4457_v26  ;;  %v2461_v30 = vsub.f32 %v2457_v56, %v2459_v43  ;;  %v2462_v39 = vsub.f32 %v2458_v37, %v2460_v3  ;;  %v2675_v26 = vld [vmem:[%s5468_s9 + $0x10] sm:$0xff] }
0x13be   : > { %4298 = vpush %v2335_v27  ;;  %v2676_v27 = vld [vmem:[%s5468_s9 + $0x18] sm:$0xff] }
0x13bf   : > { %v2463_v45 = vmax.f32 %v2461_v30, 0.0  ;;  %v2464_v46 = vmax.f32 %v2462_v39, 0.0  ;;  %v4206_v41 = vpack.c.bf16 %v2676_v27, %v2675_v26 }
0x13c1   : > { %vm2467_vm2 = vcmp.eq.f32.partialorder %v2463_v45, inf  ;;  %vm2474_vm4 = vcmp.eq.f32.partialorder %v2464_v46, inf  ;;  %v2470_v13 = vand.u32 2147483648, %v2463_v45  ;;  %v2477_v63 = vand.u32 2147483648, %v2464_v46  ;;  %4207 = vmatprep.subr.bf16.mxu0 %v4206_v41 }
0x13c2   : > { %vm2469_vm5 = vcmp.eq.f32.partialorder %v2463_v45, 0.0  ;;  %vm2476_vm6 = vcmp.eq.f32.partialorder %v2464_v46, 0.0  ;;  %4209 = vmatpush3.bf16.msra.mxu0 %v4206_v41 }
0x13ee   : > { %s4297_s24 = spop %4296 }
0x13ef   : > { %s2321_s21 = smul.f32 %s4297_s24, %s2317_s6  ;;  %s4299_s30 = spop %4298 }
0x13f0   : > { %s2337_s18 = sadd.f32 1.6e-14, %s4299_s30  ;;  %s5519_s6 = smov 0.0  }
0x13f1   : > { %s2322_s4 = ssub.f32 1.0, %s2321_s21  ;;  %s5520_s24 = smov 32  }
0x13f2   : > { %v2479_v57 = vstv %s2337_s18 }
0x13f3   : > { %s2323_s29 = sadd.f32 8.0, %s2322_s4  ;;  %4458 = vrcp.f32 %v2479_v57 }
0x13f4   : > { %4460 = vrsqrt.f32 %v2463_v45 }
0x13f5   : > { %s2324_s19 = smax.f32 %s5519_s6, %s2323_s29  ;;  %4462 = vrsqrt.f32 %v2464_v46 }
0x13f6   : > { %v3671_v31 = vstv %s2324_s19  ;;  %s621_s19 = scalar_lea.vmem %s5476_s17, %s4725_s22  ;;  %s602_s22 = sand.u32 1, %s4548_s28  }
0x13f7   : > { %v5189_v33 = vsel %vm3670_vm15, %v3671_v31, %v3669_v42 }
0x13fd   : > { %v4459_v40 = vpop.eup %4458 }
0x13fe   : > { %4300 = vpush %v4459_v40  ;;  %v4461_v47 = vpop.eup %4460 }
0x13ff   : > { %v4463_v48 = vpop.eup %4462  ;;  %v2466_v17 = vmul.f32 %v4461_v47, %v2463_v45 }
0x1400   : > { %v2473_v12 = vmul.f32 %v4463_v48, %v2464_v46 }
0x1401   : > { %v2468_v49 = vsel %vm2467_vm2, %v2463_v45, %v2466_v17  ;;  %vm3646_vm2 = vcmask 24576  }
0x1402   : > { %v2475_v50 = vsel %vm2474_vm4, %v2464_v46, %v2473_v12  ;;  %v2471_v23 = vsel %vm2469_vm5, %v2470_v13, %v2468_v49 }
0x1403   : > { %v2478_v25 = vsel %vm2476_vm6, %v2477_v63, %v2475_v50 }
0x142f   : > { %s4301_s5 = spop %4300 }
0x1430   : > { %v2482_v55 = vstv %s4301_s5 }
0x1431   : > { %v2483_v10 = vmul.f32 %v2482_v55, %v2471_v23  ;;  %v2484_v59 = vmul.f32 %v2482_v55, %v2478_v25 }
0x1433   : > { %v5203_v60 = vmul.f32 %v2483_v10, %v5082_v61  ;;  %v5206_v16 = vmul.f32 %v2484_v59, %v5089_v32  ;;  %v4194_v61 = vpack.c.bf16 %v2581_v6, %v2580_v7  ;;  %v2582_v32 = vld [vmem:[%s5466_s7 + $0x30] sm:$0xff] }
0x1434   : > { %v4198_v34 = vpack.c.bf16 %v2583_v38, %v2582_v32 }
0x1435   : > { %4033 = vmatprep.mubr.msk.f32.mxu1 %vm834_vm3, %v5203_v60  ;;  %v3068_v41 = vsel %vm834_vm3, %v5203_v60, 0.0 }
0x1436   : > { %4034 = vmatmul.mubr.msk.f32.vlgmr.msra.gmra.mrb[8].mxu1 %vm834_vm3, %v5206_v16 }
0x1437   : > { %4189 = vmatpush3.bf16.msra.mxu1 %v5174_v62 }
0x1438   : > { %4191 = vmatprep.subr.bf16.mxu1 %v4190_v0 }
0x143b   : > { %4193 = vmatpush3.bf16.msra.mxu1 %v4190_v0 }
0x143c   : > { %4195 = vmatprep.subr.bf16.mxu1 %v4194_v61 }
0x143f   : > { %4197 = vmatpush3.bf16.msra.mxu1 %v4194_v61 }
0x1440   : > { %4199 = vmatprep.subr.bf16.mxu1 %v4198_v34 }
0x1443   : > { %4201 = vmatpush3.bf16.msra.mxu1 %v4198_v34 }
0x1509   : > { %v4035_v21 = vpop.f32.mrb[8].mxu1 }
0x150a   : > { %v2559_v20 = vpop.f32.mrb[9].mxu1  ;;  %v2575_v24 = vsel %vm729_vm1, %v4035_v21, %v2571_v22 }
0x150b   : > { %v2574_v62 = vsel %vm729_vm1, %v2559_v20, %v2569_v15 }
0x150c   : > { %4052 = vmatprep.mubr.msk.f32.mxu1 %vm2591_vm7, %v2574_v62 }
0x150d   : > { %4053 = vmatmul.mubr.msk.f32.vlgmr.msra.gmra.mrb[10].mxu1 %vm2591_vm7, %v2575_v24 }
0x15e0   : > { %v4054_v57 = vpop.f32.mrb[10].mxu1 }
0x15e1   : > { %v2670_v44 = vadd.f32 %v4054_v57, %v3831_v28  ;;  %v2664_v4 = vpop.f32.mrb[11].mxu1 }
0x15e2   : > { %v2665_v58 = vadd.f32 %v3831_v28, %v2664_v4 }
0x15e3   : > { %v2790_v42 = vmul.f32 %v2670_v44, %v5050_v53 }
0x15e4   : > { %v2789_v31 = vmul.f32 %v2665_v58, %v5041_v54  ;;  %4063 = vmatprep.mubr.msk.f32.mxu0 %vm729_vm1, %v2665_v58 }
0x15e5   : > { %4064 = vmatmul.mubr.msk.f32.vlgmr.msra.gmra.mrb[12].mxu0 %vm729_vm1, %v2670_v44 }
0x15e6   : > { %v4210_v40 = vpack.c.bf16 %v2790_v42, %v2789_v31 }
0x15e8   : > { %4211 = vmatprep.subr.bf16.mxu0 %v4210_v40 }
0x15e9   : > { %4213 = vmatpush3.bf16.msra.mxu0 %v4210_v40 }
0x16b8   : > { %v4065_v36 = vpop.f32.mrb[12].mxu0 }
0x16b9   : > { %v2762_v56 = vadd.f32 %v4065_v36, %v3834_v35  ;;  %v2756_v37 = vpop.f32.mrb[13].mxu0 }
0x16ba   : > { %v2757_v43 = vadd.f32 %v3834_v35, %v2756_v37 }
0x16bb   : > { %v2768_v3 = vsel %vm834_vm3, %v2762_v56, -inf }
0x16bc   : > { %2769 = vmax.xlane.f32.xlu1 %v2768_v3  ;;  %v2765_v30 = vsel %vm834_vm3, %v2757_v43, -inf }
0x16bd   : > { %2766 = vmax.xlane.f32.xlu0 %v2765_v30 }
0x1749   : > { %v2770_v39 = vpop.xlane.xlu1 %2769 }
0x174a   : > { %v2772_v45 = vsub.f32 %v2762_v56, %v2770_v39  ;;  %v2767_v46 = vpop.xlane.xlu0 %2766 }
0x174b   : > { %v2771_v47 = vsub.f32 %v2757_v43, %v2767_v46 }
0x174c   : > { %v2775_v48 = vmul.f32 1.442695, %v2772_v45 }
0x174d   : > { %v2773_v17 = vmul.f32 1.442695, %v2771_v47 }
0x174f   : > { %4464 = vpow2.f32 %v2773_v17 }
0x1750   : > { %4466 = vpow2.f32 %v2775_v48 }
0x1759   : > { %v4465_v12 = vpop.eup %4464 }
0x175a   : > { %v2777_v49 = vsel %vm834_vm3, %v4465_v12, 0.0  ;;  %v4467_v50 = vpop.eup %4466 }
0x175b   : > { %2778 = vadd.xlane.f32.xlu0 %v2777_v49  ;;  %v2780_v13 = vsel %vm834_vm3, %v4467_v50, 0.0 }
0x175f   : > { %2781 = vadd.xlane.f32.xlu0 %v2780_v13 }
0x17e8   : > { %v2779_v63 = vpop.xlane.xlu0 %2778 }
0x17e9   : > { %4468 = vrcp.f32 %v2779_v63 }
0x17ec   : > { %v2782_v23 = vpop.xlane.xlu0 %2781 }
0x17ed   : > { %4470 = vrcp.f32 %v2782_v23 }
0x17f3   : > { %v4469_v25 = vpop.eup %4468 }
0x17f4   : > { %v2785_v55 = vmul.f32 %v4469_v25, %v4465_v12 }
0x17f6   : > { %v5256_v10 = vmul.f32 %v2785_v55, %v5041_v54 }
0x17f7   : > { %v4471_v59 = vpop.eup %4470 }
0x17f8   : > { %v2786_v9 = vmul.f32 %v4471_v59, %v4467_v50  ;;  %2791 = vxpose.xlu0.b32.start [1/2] (short) (narrow) %v5256_v10, 16 }
0x17fa   : > { %v5260_v18 = vmul.f32 %v2786_v9, %v5050_v53  ;;  %v3071_v9 = vsel %vm834_vm3, %v5206_v16, 0.0 }
0x17fc   : > { %2792 = vxpose.xlu0.b32.end [2/2] (short) (narrow) %v5260_v18, 16  ;;  %v4214_v0 = vpack.c.bf16 %v5260_v18, %v5256_v10 }
0x17fe   : > { %4215 = vmatprep.subr.bf16.mxu0 %v4214_v0 }
0x1825   : > { %4377 = vset.pattern.permute.xlu0 %v4563_v5 }
0x1878   : > { %v2807_v7 = vpop.trf.xlu0 }
0x1879   : > { %4070 = vmatprep.mubr.msk.f32.mxu0 %vm834_vm3, %v2807_v7  ;;  %4084 = vmatprep.mubr.msk.f32.mxu1 %vm834_vm3, %v2807_v7 }
0x187c   : > { %v2808_v54 = vpop.trf.xlu0 }
0x187d   : > { %4071 = vmatmul.mubr.msk.f32.vlgmr.msra.gmra.mrb[14].mxu0 %vm834_vm3, %v2808_v54 }
0x187e   : > { %4217 = vmatpush3.bf16.msra.mxu0 %v4214_v0  ;;  %4077 = vmatprep.mubr.msk.f32.mxu0 %vm834_vm3, %v5203_v60 }
0x187f   : > { %4223 = vmatprep.subr.bf16.mxu0 %v4214_v0 }
0x1881   : > { %4078 = vmatmul.mubr.msk.f32.vlgmr.msra.gmra.mrb[16].mxu0 %vm834_vm3, %v5206_v16  ;;  %v3388_v16 = vld [vmem:[%s5470_s11 + $0x20] sm:$0xff] }
0x1882   : > { %4225 = vmatpush3.bf16.msra.mxu0 %v4214_v0  ;;  %4091 = vmatprep.mubr.msk.f32.mxu0 %vm834_vm3, %v2807_v7  ;;  %v3384_v0 = vld [vmem:[%s5470_s11] sm:$0xff]  ;;  %v3385_v7 = vld [vmem:[%s5470_s11 + $0x8] sm:$0xff] }
0x1885   : > { %4092 = vmatmul.mubr.msk.f32.vlgmr.msra.gmra.mrb[18].mxu0 %vm834_vm3, %v2808_v54 }
0x1950   : > { %v5275_v5 = vpop.f32.mrb[14].mxu0 }
0x1951   : > { %v2895_v53 = vpop.f32.mrb[15].mxu0 }
0x1952   : > { %v4226_v6 = vpack.c.bf16 %v5275_v5, %v2895_v53  ;;  %3376 = vrot.lane.b32.xlu0 %v2895_v53, %s5520_s24  ;;  %v4230_v53 = vpack.c.bf16 %v3385_v7, %v3384_v0  ;;  %v3489_v7 = vld [vmem:[%s5472_s13] sm:$0xff] }
0x1954   : > { %v4079_v61 = vpop.f32.mrb[16].mxu0  ;;  %4231 = vmatprep.subr.bf16.mxu0 %v4230_v53 }
0x1955   : > { %v3055_v32 = vmul.f32 %v4079_v61, %v5260_v18  ;;  %v2970_v38 = vpop.f32.mrb[17].mxu0  ;;  %4233 = vmatpush3.bf16.msra.mxu0 %v4230_v53 }
0x1956   : > { %v4218_v34 = vpack.c.bf16 %v4079_v61, %v2970_v38  ;;  %v3054_v19 = vmul.f32 %v2970_v38, %v5256_v10  ;;  %v3389_v61 = vld [vmem:[%s5470_s11 + $0x28] sm:$0xff] }
0x1957   : > { %v3057_v8 = vsel %vm834_vm3, %v3055_v32, 0.0  ;;  %v4238_v32 = vpack.c.bf16 %v3389_v61, %v3388_v16 }
0x1958   : > { %v3056_v11 = vsel %vm834_vm3, %v3054_v19, 0.0  ;;  %4219 = vmatprep.subr.bf16.mxu1 %v4218_v34  ;;  %v4093_v15 = vpop.f32.mrb[18].mxu0 }
0x1959   : > { %v3187_v21 = vmul.f32 %v4093_v15, %v4093_v15  ;;  %4221 = vmatpush3.bf16.msra.mxu1 %v4218_v34  ;;  %v3163_v20 = vpop.f32.mrb[19].mxu0  ;;  %v3058_v22 = vadd.f32 %v3057_v8, %v3056_v11 }
0x195a   : > { %v3186_v62 = vmul.f32 %v3163_v20, %v3163_v20  ;;  %4227 = vmatprep.subr.bf16.mxu1 %v4226_v6 }
0x195b   : > { %v3189_v24 = vsel %vm834_vm3, %v3187_v21, 0.0 }
0x195c   : > { %v3188_v26 = vsel %vm834_vm3, %v3186_v62, 0.0  ;;  %4085 = vmatmul.mubr.msk.f32.vlgmr.msra.gmra.mrb[12].mxu1 %vm834_vm3, %v2808_v54  ;;  %v3386_v54 = vld [vmem:[%s5470_s11 + $0x10] sm:$0xff] }
0x195d   : > { %v5286_v27 = vadd.f32 %v3189_v24, %v3188_v26  ;;  %4229 = vmatpush3.bf16.msra.mxu1 %v4226_v6 }
0x195e   : > { %4246 = vmatprep.subr.bf16.mxu1 %v4561_v14 }
0x1971   : > { %3069 = vadd.xlane.f32.xlu0 %v3068_v41  ;;  %v3390_v41 = vld [vmem:[%s5470_s11 + $0x30] sm:$0xff] }
0x1975   : > { %3059 = vadd.xlane.f32.xlu0 %v3058_v22 }
0x19c4   : > { %v5291_v28 = vpop.permute.xlu0 %3376 }
0x19fe   : > { %v5293_v57 = vpop.xlane.xlu0 %3069 }
0x19ff   : > { %v3074_v21 = vadd.f32 1e-15, %v5293_v57  ;;  %v3173_v57 = vmul.f32 %v5260_v18, %v5260_v18 }
0x1a01   : > { %v3076_v22 = vmul.f32 %v3074_v21, %v5256_v10 }
0x1a02   : > { %v3060_v44 = vpop.xlane.xlu0 %3059 }
0x1a03   : > { %v3061_v4 = vrot.slane %v3060_v44, 4  ;;  %v3078_v26 = vmul.f32 %v3076_v22, %v5256_v10 }
0x1a05   : > { %v3062_v58 = vadd.f32 %v3061_v4, %v3060_v44  ;;  %v3391_v44 = vld [vmem:[%s5470_s11 + $0x38] sm:$0xff] }
0x1a07   : > { %v3063_v42 = vrot.slane %v3062_v58, 2 }
0x1a09   : > { %v3064_v31 = vadd.f32 %v3063_v42, %v3062_v58  ;;  %v4242_v58 = vpack.c.bf16 %v3391_v44, %v3390_v41  ;;  %v3080_v42 = vsel %vm834_vm3, %v3078_v26, 0.0 }
0x1a0b   : > { %v3065_v40 = vrot.slane %v3064_v31, 1 }
0x1a0d   : > { %v3066_v35 = vadd.f32 %v3065_v40, %v3064_v31  ;;  %v3172_v40 = vmul.f32 %v5256_v10, %v5256_v10 }
0x1a0f   : > { %4302 = vpush %v3066_v35 }
0x1a2f   : > { %v4086_v36 = vpop.f32.mrb[12].mxu1 }
0x1a30   : > { %v3045_v56 = vpop.f32.mrb[13].mxu1  ;;  %v3226_v43 = vsel %vm4952_vm12, 0.0, %v4086_v36  ;;  %v3175_v36 = vsel %vm834_vm3, %v3173_v57, 0.0 }
0x1a31   : > { %v3225_v37 = vsel %vm4942_vm11, 0.0, %v3045_v56  ;;  %v3230_v3 = vsel %vm834_vm3, %v3226_v43, 0.0  ;;  %v3174_v56 = vsel %vm834_vm3, %v3172_v40, 0.0  ;;  %v3569_v40 = vld [vmem:[%s5474_s15 + $0x8] sm:$0xff] }
0x1a32   : > { %v3227_v60 = vsel %vm834_vm3, %v3225_v37, 0.0 }
0x1a33   : > { %3228 = vadd.xlane.f32.xlu1 %v3227_v60 }
0x1a37   : > { %3231 = vadd.xlane.f32.xlu1 %v3230_v3 }
0x1a40   : > { %s5353_s4 = spop %4302 }
0x1ac0   : > { %v3229_v30 = vpop.xlane.xlu1 %3228 }
0x1ac1   : > { %v3233_v39 = vadd.f32 1e-15, %v3229_v30 }
0x1ac3   : > { %4472 = vrsqrt.f32 %v3233_v39  ;;  %vm3237_vm0 = vcmp.eq.f32.partialorder %v3233_v39, inf  ;;  %v3240_v52 = vand.u32 2147483648, %v3233_v39  ;;  %vm3239_vm11 = vcmp.eq.f32.partialorder %v3233_v39, 0.0 }
0x1ac4   : > { %v3232_v45 = vpop.xlane.xlu1 %3231 }
0x1ac5   : > { %v3234_v46 = vadd.f32 1e-15, %v3232_v45 }
0x1ac7   : > { %4474 = vrsqrt.f32 %v3234_v46  ;;  %vm3244_vm12 = vcmp.eq.f32.partialorder %v3234_v46, inf  ;;  %v3247_v13 = vand.u32 2147483648, %v3234_v46  ;;  %vm3246_vm8 = vcmp.eq.f32.partialorder %v3234_v46, 0.0 }
0x1acd   : > { %v4473_v47 = vpop.eup %4472 }
0x1ace   : > { %v3236_v48 = vmul.f32 %v4473_v47, %v3233_v39 }
0x1ad0   : > { %v3238_v17 = vsel %vm3237_vm0, %v3233_v39, %v3236_v48 }
0x1ad1   : > { %v4475_v12 = vpop.eup %4474  ;;  %v3241_v49 = vsel %vm3239_vm11, %v3240_v52, %v3238_v17 }
0x1ad2   : > { %v3249_v2 = vadd.f32 1e-15, %v3241_v49  ;;  %v3243_v50 = vmul.f32 %v4475_v12, %v3234_v46 }
0x1ad4   : > { %4476 = vrcp.f32 %v3249_v2  ;;  %v3245_v63 = vsel %vm3244_vm12, %v3234_v46, %v3243_v50 }
0x1ad5   : > { %v3248_v23 = vsel %vm3246_vm8, %v3247_v13, %v3245_v63 }
0x1ad6   : > { %v3250_v25 = vadd.f32 1e-15, %v3248_v23 }
0x1ad8   : > { %4478 = vrcp.f32 %v3250_v25 }
0x1ade   : > { %v4477_v55 = vpop.eup %4476 }
0x1adf   : > { %3255 = vxpose.xlu1.b32.start [1/2] (short) (narrow) %v4477_v55, 8  ;;  %v3253_v34 = vmul.f32 %v4477_v55, %v3225_v37  ;;  %v3176_v37 = vadd.f32 %v3175_v36, %v3174_v56 }
0x1ae2   : > { %v4479_v59 = vpop.eup %4478 }
0x1ae3   : > { %3256 = vxpose.xlu1.b32.end [2/2] (short) (narrow) %v4479_v59, 8  ;;  %v3254_v19 = vmul.f32 %v4479_v59, %v3226_v43 }
0x1b01   : > { %3378 = vrot.lane.b32.xlu1 %v5275_v5, %s5520_s24  ;;  %v3387_v5 = vld [vmem:[%s5470_s11 + $0x18] sm:$0xff] }
0x1b02   : > { %v4234_v6 = vpack.c.bf16 %v3387_v5, %v3386_v54  ;;  %v3490_v54 = vld [vmem:[%s5472_s13 + $0x8] sm:$0xff]  ;;  %v3491_v5 = vld [vmem:[%s5472_s13 + $0x10] sm:$0xff] }
0x1b03   : > { %v4247_v53 = vpack.c.bf16 %v3490_v54, %v3489_v7 }
0x1b04   : > { %4235 = vmatprep.subr.bf16.mxu0 %v4234_v6 }
0x1b05   : > { %4237 = vmatpush3.bf16.msra.mxu0 %v4234_v6  ;;  %v3492_v6 = vld [vmem:[%s5472_s13 + $0x18] sm:$0xff] }
0x1b06   : > { %4239 = vmatprep.subr.bf16.mxu0 %v4238_v32  ;;  %v4250_v16 = vpack.c.bf16 %v3492_v6, %v3491_v5 }
0x1b09   : > { %4241 = vmatpush3.bf16.msra.mxu0 %v4238_v32 }
0x1b0a   : > { %4243 = vmatprep.subr.bf16.mxu0 %v4242_v58 }
0x1b0d   : > { %4245 = vmatpush3.bf16.msra.mxu0 %v4242_v58 }
0x1b25   : > { %3072 = vadd.xlane.f32.xlu1 %v3071_v9 }
0x1b5f   : > { %v3271_v38 = vpop.trf.xlu1 }
0x1b60   : > { %v3290_v8 = vrot.slane %v3271_v38, %v4931_v1 }
0x1b62   : > { %v3291_v11 = vmul.f32 %v3290_v8, %v3253_v34  ;;  %v3292_v15 = vmul.f32 %v3290_v8, %v3254_v19 }
0x1b64   : > { %4098 = vmatprep.mubr.msk.f32.mxu1 %vm834_vm3, %v3291_v11 }
0x1b65   : > { %4099 = vmatmul.mubr.msk.f32.vlgmr.msra.gmra.mrb[14].mxu1 %vm834_vm3, %v3292_v15 }
0x1b66   : > { %4128 = vmatprep.mubr.msk.f32.mxu1 %vm4564_vm13, %v4565_v29  ;;  %4248 = vmatpush3.bf16.msra.mxu1 %v4247_v53 }
0x1b67   : > { %4249 = vmatprep.subr.bf16.mxu1 %v4561_v14 }
0x1b6a   : > { %4251 = vmatpush3.bf16.msra.mxu1 %v4250_v16 }
0x1b6b   : > { %4252 = vmatprep.subr.bf16.mxu1 %v4561_v14 }
0x1b73   : > { %v3379_v20 = vpop.permute.xlu1 %3378 }
0x1bb2   : > { %v3073_v62 = vpop.xlane.xlu1 %3072 }
0x1bb3   : > { %v3075_v24 = vadd.f32 1e-15, %v3073_v62 }
0x1bb5   : > { %v3077_v1 = vmul.f32 %v3075_v24, %v5260_v18 }
0x1bb7   : > { %v3079_v4 = vmul.f32 %v3077_v1, %v5260_v18 }
0x1bb9   : > { %v3081_v31 = vsel %vm834_vm3, %v3079_v4, 0.0  ;;  %vm3673_vm3 = vcmp.eq.s32.totalorder %v4939_v51, 4 }
0x1bba   : > { %v3082_v35 = vadd.f32 %v3081_v31, %v3080_v42  ;;  %v3568_v31 = vld [vmem:[%s5474_s15] sm:$0xff] }
0x1bbb   : > { %v4253_v36 = vpack.c.bf16 %v3569_v40, %v3568_v31 }
0x1bbc   : > { %3083 = vadd.xlane.f32.xlu0 %v3082_v35 }
0x1bc0   : > { %3177 = vadd.xlane.f32.xlu0 %v3176_v37 }
0x1bc4   : > { %3191 = vadd.xlane.f32.xlu0 %v5286_v27 }
0x1c38   : > { %v4100_v18 = vpop.f32.mrb[14].mxu1 }
0x1c39   : > { %v3365_v60 = vpop.f32.mrb[15].mxu1  ;;  %v3383_v3 = vsel %vm729_vm1, %v4100_v18, %v3379_v20  ;;  %v3847_v20 = vld [vmem:[%s5471_s12] ss:$0 sm:$0xff] }
0x1c3a   : > { %v3382_v43 = vsel %vm729_vm1, %v3365_v60, %v5291_v28 }
0x1c3b   : > { %4117 = vmatprep.mubr.msk.f32.mxu0 %vm2591_vm7, %v3382_v43 }
0x1c3c   : > { %4118 = vmatmul.mubr.msk.f32.vlgmr.msra.gmra.mrb[20].mxu0 %vm2591_vm7, %v3383_v3 }
0x1c49   : > { %v3084_v10 = vpop.xlane.xlu0 %3083 }
0x1c4a   : > { %v3085_v30 = vrot.slane %v3084_v10, 4 }
0x1c4c   : > { %v3086_v39 = vadd.f32 %v3085_v30, %v3084_v10 }
0x1c4d   : > { %v3178_v27 = vpop.xlane.xlu0 %3177 }
0x1c4e   : > { %v3087_v45 = vrot.slane %v3086_v39, 2  ;;  %v3179_v17 = vrot.slane %v3178_v27, 4 }
0x1c50   : > { %v3088_v46 = vadd.f32 %v3087_v45, %v3086_v39  ;;  %v3180_v49 = vadd.f32 %v3179_v17, %v3178_v27 }
0x1c51   : > { %v3192_v52 = vpop.xlane.xlu0 %3191 }
0x1c52   : > { %v3089_v47 = vrot.slane %v3088_v46, 1  ;;  %v3193_v12 = vrot.slane %v3192_v52, 4  ;;  %v3181_v2 = vrot.slane %v3180_v49, 2 }
0x1c54   : > { %v3090_v48 = vadd.f32 %v3089_v47, %v3088_v46  ;;  %v3194_v28 = vadd.f32 %v3193_v12, %v3192_v52  ;;  %v3182_v63 = vadd.f32 %v3181_v2, %v3180_v49  ;;  %v3493_v46 = vld [vmem:[%s5473_s14] sm:$0x1] }
0x1c56   : > { %4304 = vpush %v3090_v48  ;;  %v3195_v50 = vrot.slane %v3194_v28, 2  ;;  %v3183_v25 = vrot.slane %v3182_v63, 1 }
0x1c58   : > { %v3196_v23 = vadd.f32 %v3195_v50, %v3194_v28  ;;  %v3184_v9 = vadd.f32 %v3183_v25, %v3182_v63 }
0x1c5a   : > { %v3197_v55 = vrot.slane %v3196_v23, 1 }
0x1c5c   : > { %v3198_v0 = vadd.f32 %v3197_v55, %v3196_v23 }
0x1c87   : > { %s4305_s29 = spop %4304 }
0x1c88   : > { %v3092_v13 = vstv %s4305_s29 }
0x1c89   : > { %4480 = vrcp.f32 %v3092_v13 }
0x1c93   : > { %v4481_v59 = vpop.eup %4480 }
0x1c94   : > { %4306 = vpush %v4481_v59 }
0x1c95   : > { %4308 = vpush %v3184_v9 }
0x1c96   : > { %4310 = vpush %v3198_v0 }
0x1cc5   : > { %s4307_s25 = spop %4306 }
0x1cc6   : > { %s3095_s26 = smul.f32 %s4307_s25, %s5353_s4  ;;  %s5370_s23 = spop %4308 }
0x1cc7   : > { %s4311_s24 = spop %4310  ;;  %s3209_s3 = smul.f32 0.5, %s5370_s23 }
0x1cc8   : > { %s3096_s21 = ssub.f32 0.0, %s3095_s26  ;;  %v3200_v61 = vstv %s4311_s24 }
0x1cc9   : > { %4482 = vrsqrt.f32 %v3200_v61  ;;  %vm3203_vm9 = vcmp.eq.f32.partialorder %v3200_v61, inf  ;;  %v3206_v8 = vand.u32 2147483648, %v3200_v61  ;;  %vm3205_vm10 = vcmp.eq.f32.partialorder %v3200_v61, 0.0 }
0x1cca   : > { %v3674_v32 = vstv %s3096_s21  ;;  %s5521_s21 = sld [smem:[#allocation18_spill]] }
0x1ccb   : > { %v3675_v38 = vsel %vm3673_vm3, %v3674_v32, %v5189_v33 }
0x1cd3   : > { %v4483_v34 = vpop.eup %4482 }
0x1cd4   : > { %v3202_v19 = vmul.f32 %v4483_v34, %v3200_v61 }
0x1cd6   : > { %v3204_v11 = vsel %vm3203_vm9, %v3200_v61, %v3202_v19 }
0x1cd7   : > { %v3207_v15 = vsel %vm3205_vm10, %v3206_v8, %v3204_v11 }
0x1cd8   : > { %4312 = vpush %v3207_v15 }
0x1d09   : > { %s4313_s4 = spop %4312 }
0x1d0a   : > { %v3210_v21 = vstv %s4313_s4  ;;  %s3684_s4 = scalar_lea.sflag [#allocation3], %s602_s22 }
0x1d0b   : > { %4484 = vrcp.f32 %v3210_v21 }
0x1d0f   : > { %v4119_v22 = vpop.f32.mrb[20].mxu0 }
0x1d10   : > { %v3477_v62 = vadd.f32 %v4119_v22, %v3847_v20  ;;  %v3471_v24 = vpop.f32.mrb[21].mxu0 }
0x1d11   : > { %v3472_v26 = vadd.f32 %v3847_v20, %v3471_v24 }
0x1d12   : > { %v3481_v33 = vsel %vm729_vm1, %v3477_v62, 0.0 }
0x1d13   : > { %v3480_v1 = vsel %vm729_vm1, %v3472_v26, 0.0 }
0x1d14   : > { %v3482_v41 = vadd.f32 %v3481_v33, %v3480_v1 }
0x1d15   : > { %v4485_v44 = vpop.eup %4484 }
0x1d16   : > { %v3483_v4 = vrot.slane %v3482_v41, 4  ;;  %4314 = vpush %v4485_v44 }
0x1d18   : > { %v3484_v57 = vadd.f32 %v3483_v4, %v3482_v41 }
0x1d1a   : > { %v3485_v58 = vrot.slane %v3484_v57, 2 }
0x1d1c   : > { %v3486_v42 = vadd.f32 %v3485_v58, %v3484_v57 }
0x1d1e   : > { %v3487_v35 = vrot.slane %v3486_v42, 1 }
0x1d20   : > { %v3488_v56 = vadd.f32 %v3487_v35, %v3486_v42 }
0x1d22   : > { %4129 = vmatmul.mubr.msk.f32.vlgmr.msra.gmra.mrb[16].mxu1 %vm729_vm1, %v3488_v56 }
0x1d23   : > { %4254 = vmatpush3.bf16.msra.mxu1 %v4253_v36  ;;  %4139 = vmatprep.mubr.msk.f32.mxu1 %vm4564_vm13, %v4565_v29  ;;  %v3571_v29 = vld [vmem:[%s5474_s15 + $0x18] sm:$0xff]  ;;  %vm3676_vm13 = vcmp.eq.s32.totalorder %v4939_v51, 5  ;;  %v3572_v51 = vld [vmem:[%s5475_s16] sm:$0x1] }
0x1d24   : > { %4255 = vmatprep.subr.bf16.mxu1 %v4561_v14  ;;  %v3570_v14 = vld [vmem:[%s5474_s15 + $0x10] sm:$0xff] }
0x1d25   : > { %v4256_v30 = vpack.c.bf16 %v3571_v29, %v3570_v14 }
0x1d27   : > { %4257 = vmatpush3.bf16.msra.mxu1 %v4256_v30 }
0x1d47   : > { %s4315_s1 = spop %4314 }
0x1d48   : > { %s3213_s20 = smul.f32 %s4315_s1, %s3209_s3  ;;  %s3852_s1 = sshll.u32 %s4687_s0, 4 }
0x1d49   : > { %s5416_s23 = scalar_lea.hbm %s5521_s21, %s3852_s1  ;;  %s4570_s0 = smov [#allocation2]  }
0x1d4a   : > { %s3214_s25 = ssub.f32 2.0, %s3213_s20  ;;  %s603_s20 = scalar_lea.vmem [#allocation2], %s602_s22 }
0x1d4b   : > { %s4498_s29 = sshll.u32 %s4570_s0, 4  ;;  %s4499_s29 = int_to_ptr.vmem [resolvable:$false] %s4498_s29 }
0x1d4c   : > { %s3215_s26 = smax.f32 %s5519_s6, %s3214_s25  ;;  %s3699_s25 = sshll.u32 %s603_s20, 4  ;;  %s5418_s25 = int_to_ptr.vmem [resolvable:$true] %s3699_s25 }
0x1d4d   : > { %v3216_v37 = vstv %s3215_s26  ;;  %s4494_s6 = scalar_lea.vmem %s5418_s25, 16  ;;  %p4501_p0 = scmp.lt.s32.totalorder %s5418_s25, %s4499_s29 }
0x1d4e   : > { %4486 = vrsqrt.f32 %v3216_v37  ;;  %vm3219_vm14 = vcmp.eq.f32.partialorder %v3216_v37, inf  ;;  %v3222_v43 = vand.u32 2147483648, %v3216_v37  ;;  %vm3221_vm15 = vcmp.eq.f32.partialorder %v3216_v37, 0.0  ;;  %p4495_p11 = scmp.ne.s32.totalorder %s5418_s25, %s4494_s6 }
0x1d50   : > { %p4496_p12 = pnand %p4495_p11, %p4704_p5 }
0x1d52   : > { %p4497_p13 = pneg %p4496_p12 }
0x1d58   : > { %v4487_v18 = vpop.eup %4486 }
0x1d59   : > { %v3218_v60 = vmul.f32 %v4487_v18, %v3216_v37 }
0x1d5b   : > { %v3220_v3 = vsel %vm3219_vm14, %v3216_v37, %v3218_v60 }
0x1d5c   : > { %v3223_v10 = vsel %vm3221_vm15, %v3222_v43, %v3220_v3 }
0x1d5d   : > { %4316 = vpush %v3223_v10 }
0x1d8e   : > { %s4317_s5 = spop %4316 }
0x1d8f   : > { %v3677_v39 = vstv %s4317_s5 }
0x1d90   : > { %v3678_v45 = vsel %vm3676_vm13, %v3677_v39, %v3675_v38 }
0x1d91   : > { %3679 = vst [vmem:[%s621_s19] sm:$0x1] %v3678_v45  ;;  %s4500_s19 = scalar_lea.vmem %s4499_s29, 32 }
0x1d92   : > { %p4502_p1 = scmp.lt.s32.totalorder %s4500_s19, %s4494_s6 }
0x1d94   : > { %p4503_p2 = por %p4502_p1, %p4501_p0 }
0x1d96   : > { %p4504_p3 = pnand %p4503_p2, %p4497_p13 }
0x1df5   : > { %v3563_v47 = vpop.f32.mrb[16].mxu1 }
0x1df6   : > { %v3564_v48 = vadd.f32 %v3563_v47, %v3493_v46  ;;  %v4130_v27 = vpop.f32.mrb[17].mxu1 }
0x1df8   : > { %v3567_v52 = vmax.f32 %v3564_v48, 0.0 }
0x1dfa   : > { %4140 = vmatmul.mubr.msk.f32.vlgmr.msra.gmra.mrb[18].mxu1 %vm729_vm1, %v3567_v52 }
0x1ecd   : > { %v3642_v17 = vpop.f32.mrb[18].mxu1 }
0x1ece   : > { %v3643_v12 = vadd.f32 %v3642_v17, %v3572_v51  ;;  %v4141_v49 = vpop.f32.mrb[19].mxu1 }
0x1ed0   : > { %v3647_v28 = vsel %vm3646_vm2, %v3643_v12, -inf }
0x1ed1   : > { %3648 = vmax.xlane.f32.xlu0 %v3647_v28 }
0x1f5e   : > { %v3649_v2 = vpop.xlane.xlu0 %3648 }
0x1f5f   : > { %v3650_v50 = vsub.f32 %v3643_v12, %v3649_v2 }
0x1f61   : > { %v3651_v13 = vmul.f32 1.442695, %v3650_v50 }
0x1f63   : > { %4488 = vpow2.f32 %v3651_v13 }
0x1f6d   : > { %v4489_v63 = vpop.eup %4488 }
0x1f6e   : > { %v3653_v23 = vsel %vm3646_vm2, %v4489_v63, 0.0 }
0x1f6f   : > { %3654 = vadd.xlane.f32.xlu0 %v3653_v23 }
0x1ffc   : > { %v3655_v25 = vpop.xlane.xlu0 %3654 }
0x1ffd   : > { %4490 = vlog2.f32 %v3655_v25 }
0x2007   : > { %v4491_v55 = vpop.eup %4490 }
0x2008   : > { %v3657_v59 = vmul.f32 0.6931472, %v4491_v55 }
0x200a   : > { %v3658_v9 = vadd.f32 %v3657_v59, %v3649_v2 }
0x200c   : > { %v3659_v0 = vsub.f32 %v3643_v12, %v3658_v9 }
0x200e   : > { %3660 = vst.msk [vmem:[%s603_s20] sm:$0x1] %vm3646_vm2, %v3659_v0 }
0x200f   : > { %4507 = shalt.err (!%p4504_p3)
}
0x2010   : > { %s4508_s5 = scalar_lea.hbm %s5416_s23, 16  ;;  %s4512_s30 = scalar_lea.hbm %s5521_s21, 32 }
0x2011   : > { %p4509_p4 = scmp.ne.s32.totalorder %s5416_s23, %s4508_s5  ;;  %p4513_p9 = scmp.lt.u32.totalorder %s5416_s23, %s5521_s21 }
0x2012   : > { %p4514_p10 = scmp.lt.u32.totalorder %s4512_s30, %s4508_s5  ;;  %p4516_p12 = scmp.lt.u32.totalorder %s4508_s5, %s5416_s23 }
0x2013   : > { %p4510_p7 = pnand %p4509_p4, %p4704_p5 }
0x2014   : > { %p4515_p11 = por %p4514_p10, %p4513_p9 }
0x2015   : > { %p4511_p8 = pneg %p4510_p7 }
0x2016   : > { %p4517_p13 = por %p4516_p12, %p4515_p11 }
0x2018   : > { %p4518_p0 = pnand %p4517_p13, %p4511_p8 }
0x201a   : > { %4521 = shalt.err (!%p4518_p0)
}
0x201b   : > { %4318 = dma.vmem_to_hbm [thread:$0]  (%p4704_p5), %s5418_s25, 16, %s5416_s23, %s3684_s4  }
0x201c PF: > { %s5522_s1 = sld [smem:[#allocation7_spill]]  ;;  %s5523_s20 = sld [smem:[#allocation5_spill]] }
0x2022   : > { %p4324_p1 = scmp.ge.s32.totalorder %s5522_s1, 2  ;;  %s3717_s24 = sand.u32 1, %s5523_s20  }
0x2023   : > { %s3718_s6 = scalar_lea.sflag [#allocation3], %s3717_s24 }
0x2024   : > { %p4321_p2 = pnand %p4324_p1, %p4708_p6 }
0x2026   : > { %4539 = dma.done.wait (!%p4321_p2), %s3718_s6, 16  }
0x2027   : > { %4541 = vsyncadd (!%p4321_p2), %s3718_s6, 4294967280  ;;  %s5525_s30 = sld [smem:[#allocation8_spill]]  ;;  %s5526_s0 = sld [smem:[#allocation6_spill]] }
0x2028   : > { %s5527_s29 = sld [smem:[#allocation9_spill]]  ;;  %s5528_s27 = smov %s4548_s28 }
0x202d   : > { %p29_p3 = scmp.ge.s32.totalorder %s5525_s30, 4   ;;  %s5529_s28 = smov %s5526_s0 }
0x202f   :  { %31 = sbr.rel (!%p29_p3) target bundleno = 12 (0xc), region = 141 }
0x2036   :  { %3722 = vsyncpa [#allocation3], 1 }
0x2037   :  { %3724 = vsyncpa [#allocation3 + $0x1], 1 }

</bundles_post_ra>
